<compile_context>
chip_gen: v5e
topology: v5e:2x2
jax: 0.10.0
libtpu: 0.0.40
codegen_flags: <defaults>
</compile_context>

<pallas_src>
import jax
import jax.numpy as jnp
from jax.experimental import pallas as pl
from jax.experimental.pallas import tpu as pltpu

# ---------------------------------------------------------------------------
# Problem sizes (small, consistent with the module's forward)
# ---------------------------------------------------------------------------
B = 2          # batch
C_IN = 4       # input channels
H = W = 16     # spatial
C_FEAT = 8     # feature channels produced by features_encoder
Z_DIM = 32     # latent dimension
KH = KW = 3
HW = H * W                      # 256
N_FEATURES = C_FEAT * H * W     # 2048
N_OUT = C_IN * H * W            # 1024

# Padded-scratch geometry for the in-kernel 3x3 / pad=1 conv:
# the image is stored at sublane offset PAD_L (8-aligned store); the nine taps
# read 16-wide windows starting at sublane offsets {7, 8, 9} (unaligned loads
# are cheap, unaligned stores are avoided).
PAD_L = 8
PAD_W = PAD_L + W + 1           # 25


# ---------------------------------------------------------------------------
# Fused Pallas kernel: one grid step == one sample of the VAE forward
# ---------------------------------------------------------------------------
def _vae_fused_kernel(x_ref, ecw_ref, ecb_ref, mlw_ref, mlb_ref, u_ref,
                      dw_ref, db_ref,
                      xr_ref, mu_ref, ls_ref,
                      xpad_ref):
    f32 = jnp.float32

    # ---- features_encoder: Conv2d(C_IN -> C_FEAT, 3x3, pad=1) + ReLU -------
    xpad_ref[...] = jnp.zeros(xpad_ref.shape, f32)
    xpad_ref[1:1 + H, PAD_L:PAD_L + W, :] = x_ref[0]
    acc = jnp.zeros((HW, C_FEAT), f32)
    for di in range(KH):
        for dj in range(KW):
            win = xpad_ref[di:di + H, PAD_L - 1 + dj:PAD_L - 1 + dj + W, :]
            acc = acc + jnp.dot(win.reshape(HW, C_IN),
                                ecw_ref[di * KW + dj],
                                preferred_element_type=f32)
    h = jnp.maximum(acc + ecb_ref[...], 0.0)                  # (HW, C_FEAT)

    # ---- enc_mean / enc_log_sigma2 (fused) + reparameterisation ------------
    # ml[n] = sum_{c,s} h[s, c] * Wml[c*HW + s, n]; the fused weight is stored
    # as (C_FEAT, HW, 2*Z_DIM) so h is consumed in its natural layout.
    t = jnp.zeros((HW, 2 * Z_DIM), f32)
    for c in range(C_FEAT):
        t = t + h[:, c:c + 1] * mlw_ref[c]                    # (HW, 64)
    ml = jnp.sum(t, axis=0, keepdims=True) + mlb_ref[...]     # (1, 64)
    mu = ml[:, :Z_DIM]
    ls = ml[:, Z_DIM:]
    z = mu + jnp.exp(ls * 0.5) * u_ref[0]                     # (1, Z_DIM)

    # ---- decode: (fc_decoder o features_decoder) composed offline + tanh ---
    # dec_w = fc_decoder weight with the (linear) decoder conv pre-applied and
    # columns permuted to NCHW-flat order -> one lane-dense (1, 1024) matmul.
    xr = jnp.tanh(jnp.dot(z, dw_ref[...], preferred_element_type=f32)
                  + db_ref[...])                              # (1, N_OUT)

    xr_ref[0] = xr
    mu_ref[0] = mu
    ls_ref[0] = ls


def vae_forward_pallas(packed, x, u):
    b = x.shape[0]
    x_nhwc = jnp.transpose(x, (0, 2, 3, 1))    # tiny one-time entry adapter
    u3 = u.reshape(b, 1, Z_DIM)

    grid_spec = pltpu.PrefetchScalarGridSpec(
        num_scalar_prefetch=0,
        grid=(b,),
        in_specs=[
            pl.BlockSpec((1, H, W, C_IN), lambda i: (i, 0, 0, 0)),          # x
            pl.BlockSpec((KH * KW, C_IN, C_FEAT), lambda i: (0, 0, 0)),     # enc taps
            pl.BlockSpec((1, C_FEAT), lambda i: (0, 0)),                    # enc bias
            pl.BlockSpec((C_FEAT, HW, 2 * Z_DIM), lambda i: (0, 0, 0)),     # mu||ls W
            pl.BlockSpec((1, 2 * Z_DIM), lambda i: (0, 0)),                 # mu||ls b
            pl.BlockSpec((1, 1, Z_DIM), lambda i: (i, 0, 0)),               # noise u
            pl.BlockSpec((Z_DIM, N_OUT), lambda i: (0, 0)),                 # composed dec W
            pl.BlockSpec((1, N_OUT), lambda i: (0, 0)),                     # composed dec b
        ],
        out_specs=(
            pl.BlockSpec((1, 1, N_OUT), lambda i: (i, 0, 0)),               # x_rec (NCHW-flat)
            pl.BlockSpec((1, 1, Z_DIM), lambda i: (i, 0, 0)),               # mu
            pl.BlockSpec((1, 1, Z_DIM), lambda i: (i, 0, 0)),               # log_sigma2
        ),
        scratch_shapes=[pltpu.VMEM((H + 2, PAD_W, C_IN), jnp.float32)],
    )

    xr3, mu3, ls3 = pl.pallas_call(
        _vae_fused_kernel,
        out_shape=(jax.ShapeDtypeStruct((b, 1, N_OUT), jnp.float32),
                   jax.ShapeDtypeStruct((b, 1, Z_DIM), jnp.float32),
                   jax.ShapeDtypeStruct((b, 1, Z_DIM), jnp.float32)),
        grid_spec=grid_spec,
        compiler_params=pltpu.CompilerParams(
            dimension_semantics=("parallel",)),
    )(x_nhwc, packed["enc_taps"], packed["enc_b"], packed["ml_w"],
      packed["ml_b"], u3, packed["dec_w"], packed["dec_b"])

    x_rec = xr3.reshape(b, C_IN, H, W)         # free view: columns already NCHW
    return x_rec, mu3.reshape(b, Z_DIM), ls3.reshape(b, Z_DIM)


def vae_forward(packed, x, noise_key):
    # TODO(synk): torch.randn_like lives inside encode(); here the Gaussian
    # noise is drawn with jax.random outside the kernel (different RNG stream).
    u = jax.random.normal(noise_key, (x.shape[0], Z_DIM), dtype=jnp.float32)
    return vae_forward_pallas(packed, x, u)


# ---------------------------------------------------------------------------
# Host-side glue: im2col (used only for parameter packing + the reference)
# ---------------------------------------------------------------------------
def im2col(x, kh=KH, kw=KW, pad=1):
    """x: (B, C, H, W) NCHW -> (B*H*W, C*kh*kw), columns ordered (C, kh, kw)."""
    b, c, h, w = x.shape
    xp = jnp.pad(x, ((0, 0), (0, 0), (pad, pad), (pad, pad)))
    cols = []
    for i in range(kh):
        for j in range(kw):
            cols.append(xp[:, :, i:i + h, j:j + w])
    patches = jnp.stack(cols, axis=2)                 # (B, C, kh*kw, H, W)
    patches = patches.transpose(0, 3, 4, 1, 2)        # (B, H, W, C, kh*kw)
    return patches.reshape(b * h * w, c * kh * kw)


# ---------------------------------------------------------------------------
# Parameters: canonical (PyTorch-layout) init + offline packing for the kernel
# ---------------------------------------------------------------------------
def _uniform(key, shape, fan_in):
    bound = 1.0 / jnp.sqrt(jnp.float32(fan_in))
    return jax.random.uniform(key, shape, jnp.float32, -bound, bound)


def init_params(key):
    ks = jax.random.split(key, 10)
    p = {}
    fan = C_IN * KH * KW
    # features_encoder: Conv2d(C_IN -> C_FEAT, 3x3, pad=1) + ReLU
    p["enc_conv_w"] = _uniform(ks[0], (fan, C_FEAT), fan)       # rows (C,kh,kw)
    p["enc_conv_b"] = _uniform(ks[1], (1, C_FEAT), fan)
    # enc_mean / enc_log_sigma2: Linear(N_FEATURES -> Z_DIM), NCHW row order
    p["mu_w"] = _uniform(ks[2], (N_FEATURES, Z_DIM), N_FEATURES)
    p["mu_b"] = _uniform(ks[3], (1, Z_DIM), N_FEATURES)
    p["ls_w"] = _uniform(ks[4], (N_FEATURES, Z_DIM), N_FEATURES)
    p["ls_b"] = _uniform(ks[5], (1, Z_DIM), N_FEATURES)
    # fc_decoder: Linear(Z_DIM -> N_FEATURES), NCHW column order
    p["fcdec_w"] = _uniform(ks[6], (Z_DIM, N_FEATURES), Z_DIM)
    p["fcdec_b"] = _uniform(ks[7], (1, N_FEATURES), Z_DIM)
    # features_decoder: Conv2d(C_FEAT -> C_IN, 3x3, pad=1)  (purely linear)
    fan_d = C_FEAT * KH * KW
    p["dec_conv_w"] = _uniform(ks[8], (fan_d, C_IN), fan_d)
    p["dec_conv_b"] = _uniform(ks[9], (1, C_IN), fan_d)
    return p


def pack_params(p):
    """Fold all layout permutations / linear compositions into the weights."""
    q = {}
    # per-tap conv weights: tap (di,dj) -> (C_IN, C_FEAT)
    q["enc_taps"] = (p["enc_conv_w"]
                     .reshape(C_IN, KH, KW, C_FEAT)
                     .transpose(1, 2, 0, 3)
                     .reshape(KH * KW, C_IN, C_FEAT))
    q["enc_b"] = p["enc_conv_b"]
    # fused mu || log_sigma2 weight, grouped per channel (NCHW rows -> (c,s))
    ml_w = jnp.concatenate([p["mu_w"], p["ls_w"]], axis=1)       # (2048, 64)
    q["ml_w"] = ml_w.reshape(C_FEAT, HW, 2 * Z_DIM)
    q["ml_b"] = jnp.concatenate([p["mu_b"], p["ls_b"]], axis=1)  # (1, 64)
    # compose fc_decoder with the (linear) decoder conv; NCHW output columns.
    fc_imgs = p["fcdec_w"].reshape(Z_DIM, C_FEAT, H, W)
    m = im2col(fc_imgs) @ p["dec_conv_w"]                        # (Z_DIM*HW, C_IN)
    q["dec_w"] = (m.reshape(Z_DIM, HW, C_IN)
                   .transpose(0, 2, 1)
                   .reshape(Z_DIM, N_OUT))
    b_img = p["fcdec_b"].reshape(1, C_FEAT, H, W)
    b2 = im2col(b_img) @ p["dec_conv_w"] + p["dec_conv_b"]       # (HW, C_IN)
    q["dec_b"] = b2.reshape(1, HW, C_IN).transpose(0, 2, 1).reshape(1, N_OUT)
    return q


# ---------------------------------------------------------------------------
# Pure-JAX reference (== PyTorch VAE.forward with these synthetic features_*)
# ---------------------------------------------------------------------------
def vae_forward_ref(params, x, noise_key):
    b = x.shape[0]
    patches = im2col(x)
    h = jnp.maximum(patches @ params["enc_conv_w"] + params["enc_conv_b"], 0.0)
    h_flat = h.reshape(b, H, W, C_FEAT).transpose(0, 3, 1, 2).reshape(b, -1)
    u = jax.random.normal(noise_key, (b, Z_DIM), dtype=jnp.float32)
    mu = h_flat @ params["mu_w"] + params["mu_b"]
    ls = h_flat @ params["ls_w"] + params["ls_b"]
    z = mu + jnp.exp(ls * 0.5) * u
    hd = (z @ params["fcdec_w"] + params["fcdec_b"]).reshape(b, C_FEAT, H, W)
    xr = jnp.tanh(im2col(hd) @ params["dec_conv_w"] + params["dec_conv_b"])
    return xr.reshape(b, H, W, C_IN).transpose(0, 3, 1, 2), mu, ls


if __name__ == "__main__":
    root = jax.random.PRNGKey(0)
    k_x, k_noise, k_params = jax.random.split(root, 3)

    x = jax.random.normal(k_x, (B, C_IN, H, W), dtype=jnp.float32)
    params = init_params(k_params)
    packed = pack_params(params)

    fwd = jax.jit(vae_forward)
    x_rec, mu, log_sigma2 = fwd(packed, x, k_noise)
    jax.block_until_ready((x_rec, mu, log_sigma2))

    # sanity check vs pure-JAX reference
    xr_ref, mu_ref, ls_ref = vae_forward_ref(params, x, k_noise)
    assert x_rec.shape == x.shape
    assert mu.shape == (B, Z_DIM) and log_sigma2.shape == (B, Z_DIM)
    assert jnp.allclose(x_rec, xr_ref, atol=2e-3, rtol=2e-3)
    assert jnp.allclose(mu, mu_ref, atol=2e-3, rtol=2e-3)
    assert jnp.allclose(log_sigma2, ls_ref, atol=2e-3, rtol=2e-3)

    print("KERNEL_OK")
</pallas_src>

<mosaic_0001>
module attributes {stable_mosaic.version = 11 : i64} {
  func.func @_vae_fused_kernel(%arg0: i32, %arg1: memref<1x16x16x4xf32, #tpu.memory_space<vmem>>, %arg2: memref<9x4x8xf32, #tpu.memory_space<vmem>>, %arg3: memref<1x8xf32, #tpu.memory_space<vmem>>, %arg4: memref<8x256x64xf32, #tpu.memory_space<vmem>>, %arg5: memref<1x64xf32, #tpu.memory_space<vmem>>, %arg6: memref<1x1x32xf32, #tpu.memory_space<vmem>>, %arg7: memref<32x1024xf32, #tpu.memory_space<vmem>>, %arg8: memref<1x1024xf32, #tpu.memory_space<vmem>>, %arg9: memref<1x1x1024xf32, #tpu.memory_space<vmem>>, %arg10: memref<1x1x32xf32, #tpu.memory_space<vmem>>, %arg11: memref<1x1x32xf32, #tpu.memory_space<vmem>>, %arg12: memref<18x25x4xf32, #tpu.memory_space<vmem>>) attributes {dimension_semantics = [#tpu.dimension_semantics<parallel>], iteration_bounds = array<i64: 2>, scalar_prefetch = 0 : i64, scratch_operands = 1 : i64, tpu.core_type = #tpu.core_type<tc>, window_params = [{transform_indices = @transform_0, window_bounds = array<i64: 1, 16, 16, 4>}, {pipeline_mode = #tpu.pipeline_mode<synchronous>, transform_indices = @transform_1, window_bounds = array<i64: 9, 4, 8>}, {pipeline_mode = #tpu.pipeline_mode<synchronous>, transform_indices = @transform_2, window_bounds = array<i64: 1, 8>}, {pipeline_mode = #tpu.pipeline_mode<synchronous>, transform_indices = @transform_3, window_bounds = array<i64: 8, 256, 64>}, {pipeline_mode = #tpu.pipeline_mode<synchronous>, transform_indices = @transform_4, window_bounds = array<i64: 1, 64>}, {transform_indices = @transform_5, window_bounds = array<i64: 1, 1, 32>}, {pipeline_mode = #tpu.pipeline_mode<synchronous>, transform_indices = @transform_6, window_bounds = array<i64: 32, 1024>}, {pipeline_mode = #tpu.pipeline_mode<synchronous>, transform_indices = @transform_7, window_bounds = array<i64: 1, 1024>}, {transform_indices = @transform_8, window_bounds = array<i64: 1, 1, 1024>}, {transform_indices = @transform_9, window_bounds = array<i64: 1, 1, 32>}, {transform_indices = @transform_10, window_bounds = array<i64: 1, 1, 32>}]} {
    %cst = arith.constant 0.000000e+00 : f32
    %0 = vector.broadcast %cst : f32 to vector<18x25x4xf32>
    %c0 = arith.constant 0 : index
    %c0_0 = arith.constant 0 : index
    %c0_1 = arith.constant 0 : index
    %1 = vector.load %arg12[%c0, %c0_0, %c0_1] : memref<18x25x4xf32, #tpu.memory_space<vmem>>, vector<18x25x4xf32>
    tpu.vector_store %arg12[%c0, %c0_0, %c0_1], %0 {strides = array<i32>} : memref<18x25x4xf32, #tpu.memory_space<vmem>>, vector<18x25x4xf32>,
    %c0_2 = arith.constant 0 : index
    %c0_3 = arith.constant 0 : index
    %c0_4 = arith.constant 0 : index
    %c0_5 = arith.constant 0 : index
    %2 = vector.load %arg1[%c0_2, %c0_3, %c0_4, %c0_5] : memref<1x16x16x4xf32, #tpu.memory_space<vmem>>, vector<1x16x16x4xf32>
    %3 = vector.shape_cast %2 : vector<1x16x16x4xf32> to vector<16x16x4xf32>
    %c1 = arith.constant 1 : index
    %c8 = arith.constant 8 : index
    %c0_6 = arith.constant 0 : index
    %4 = vector.load %arg12[%c1, %c8, %c0_6] : memref<18x25x4xf32, #tpu.memory_space<vmem>>, vector<16x16x4xf32>
    tpu.vector_store %arg12[%c1, %c8, %c0_6], %3 {strides = array<i32>} : memref<18x25x4xf32, #tpu.memory_space<vmem>>, vector<16x16x4xf32>,
    %cst_7 = arith.constant 0.000000e+00 : f32
    %5 = vector.broadcast %cst_7 : f32 to vector<256x8xf32>
    %c0_8 = arith.constant 0 : index
    %c7 = arith.constant 7 : index
    %c0_9 = arith.constant 0 : index
    %6 = vector.load %arg12[%c0_8, %c7, %c0_9] : memref<18x25x4xf32, #tpu.memory_space<vmem>>, vector<16x16x4xf32>
    %7 = vector.shape_cast %6 : vector<16x16x4xf32> to vector<256x4xf32>
    %c0_10 = arith.constant 0 : index
    %c0_11 = arith.constant 0 : index
    %c0_12 = arith.constant 0 : index
    %8 = vector.load %arg2[%c0_10, %c0_11, %c0_12] : memref<9x4x8xf32, #tpu.memory_space<vmem>>, vector<1x4x8xf32>
    %9 = vector.shape_cast %8 : vector<1x4x8xf32> to vector<4x8xf32>
    %cst_13 = arith.constant dense<0.000000e+00> : vector<256x8xf32>
    %10 = tpu.matmul %7, %9, %cst_13 {dimension_numbers = #tpu.dot_dimension_numbers<[1], [0], [0], [1], [0, 0, 1, 1], [], []>} : vector<256x4xf32>, vector<4x8xf32>, vector<256x8xf32> -> vector<256x8xf32>
    %11 = arith.addf %5, %10 : vector<256x8xf32>
    %c0_14 = arith.constant 0 : index
    %c8_15 = arith.constant 8 : index
    %c0_16 = arith.constant 0 : index
    %12 = vector.load %arg12[%c0_14, %c8_15, %c0_16] : memref<18x25x4xf32, #tpu.memory_space<vmem>>, vector<16x16x4xf32>
    %13 = vector.shape_cast %12 : vector<16x16x4xf32> to vector<256x4xf32>
    %c1_17 = arith.constant 1 : index
    %c0_18 = arith.constant 0 : index
    %c0_19 = arith.constant 0 : index
    %14 = vector.load %arg2[%c1_17, %c0_18, %c0_19] : memref<9x4x8xf32, #tpu.memory_space<vmem>>, vector<1x4x8xf32>
    %15 = vector.shape_cast %14 : vector<1x4x8xf32> to vector<4x8xf32>
    %cst_20 = arith.constant dense<0.000000e+00> : vector<256x8xf32>
    %16 = tpu.matmul %13, %15, %cst_20 {dimension_numbers = #tpu.dot_dimension_numbers<[1], [0], [0], [1], [0, 0, 1, 1], [], []>} : vector<256x4xf32>, vector<4x8xf32>, vector<256x8xf32> -> vector<256x8xf32>
    %17 = arith.addf %11, %16 : vector<256x8xf32>
    %c0_21 = arith.constant 0 : index
    %c9 = arith.constant 9 : index
    %c0_22 = arith.constant 0 : index
    %18 = vector.load %arg12[%c0_21, %c9, %c0_22] : memref<18x25x4xf32, #tpu.memory_space<vmem>>, vector<16x16x4xf32>
    %19 = vector.shape_cast %18 : vector<16x16x4xf32> to vector<256x4xf32>
    %c2 = arith.constant 2 : index
    %c0_23 = arith.constant 0 : index
    %c0_24 = arith.constant 0 : index
    %20 = vector.load %arg2[%c2, %c0_23, %c0_24] : memref<9x4x8xf32, #tpu.memory_space<vmem>>, vector<1x4x8xf32>
    %21 = vector.shape_cast %20 : vector<1x4x8xf32> to vector<4x8xf32>
    %cst_25 = arith.constant dense<0.000000e+00> : vector<256x8xf32>
    %22 = tpu.matmul %19, %21, %cst_25 {dimension_numbers = #tpu.dot_dimension_numbers<[1], [0], [0], [1], [0, 0, 1, 1], [], []>} : vector<256x4xf32>, vector<4x8xf32>, vector<256x8xf32> -> vector<256x8xf32>
    %23 = arith.addf %17, %22 : vector<256x8xf32>
    %c1_26 = arith.constant 1 : index
    %c7_27 = arith.constant 7 : index
    %c0_28 = arith.constant 0 : index
    %24 = vector.load %arg12[%c1_26, %c7_27, %c0_28] : memref<18x25x4xf32, #tpu.memory_space<vmem>>, vector<16x16x4xf32>
    %25 = vector.shape_cast %24 : vector<16x16x4xf32> to vector<256x4xf32>
    %c3 = arith.constant 3 : index
    %c0_29 = arith.constant 0 : index
    %c0_30 = arith.constant 0 : index
    %26 = vector.load %arg2[%c3, %c0_29, %c0_30] : memref<9x4x8xf32, #tpu.memory_space<vmem>>, vector<1x4x8xf32>
    %27 = vector.shape_cast %26 : vector<1x4x8xf32> to vector<4x8xf32>
    %cst_31 = arith.constant dense<0.000000e+00> : vector<256x8xf32>
    %28 = tpu.matmul %25, %27, %cst_31 {dimension_numbers = #tpu.dot_dimension_numbers<[1], [0], [0], [1], [0, 0, 1, 1], [], []>} : vector<256x4xf32>, vector<4x8xf32>, vector<256x8xf32> -> vector<256x8xf32>
    %29 = arith.addf %23, %28 : vector<256x8xf32>
    %c1_32 = arith.constant 1 : index
    %c8_33 = arith.constant 8 : index
    %c0_34 = arith.constant 0 : index
    %30 = vector.load %arg12[%c1_32, %c8_33, %c0_34] : memref<18x25x4xf32, #tpu.memory_space<vmem>>, vector<16x16x4xf32>
    %31 = vector.shape_cast %30 : vector<16x16x4xf32> to vector<256x4xf32>
    %c4 = arith.constant 4 : index
    %c0_35 = arith.constant 0 : index
    %c0_36 = arith.constant 0 : index
    %32 = vector.load %arg2[%c4, %c0_35, %c0_36] : memref<9x4x8xf32, #tpu.memory_space<vmem>>, vector<1x4x8xf32>
    %33 = vector.shape_cast %32 : vector<1x4x8xf32> to vector<4x8xf32>
    %cst_37 = arith.constant dense<0.000000e+00> : vector<256x8xf32>
    %34 = tpu.matmul %31, %33, %cst_37 {dimension_numbers = #tpu.dot_dimension_numbers<[1], [0], [0], [1], [0, 0, 1, 1], [], []>} : vector<256x4xf32>, vector<4x8xf32>, vector<256x8xf32> -> vector<256x8xf32>
    %35 = arith.addf %29, %34 : vector<256x8xf32>
    %c1_38 = arith.constant 1 : index
    %c9_39 = arith.constant 9 : index
    %c0_40 = arith.constant 0 : index
    %36 = vector.load %arg12[%c1_38, %c9_39, %c0_40] : memref<18x25x4xf32, #tpu.memory_space<vmem>>, vector<16x16x4xf32>
    %37 = vector.shape_cast %36 : vector<16x16x4xf32> to vector<256x4xf32>
    %c5 = arith.constant 5 : index
    %c0_41 = arith.constant 0 : index
    %c0_42 = arith.constant 0 : index
    %38 = vector.load %arg2[%c5, %c0_41, %c0_42] : memref<9x4x8xf32, #tpu.memory_space<vmem>>, vector<1x4x8xf32>
    %39 = vector.shape_cast %38 : vector<1x4x8xf32> to vector<4x8xf32>
    %cst_43 = arith.constant dense<0.000000e+00> : vector<256x8xf32>
    %40 = tpu.matmul %37, %39, %cst_43 {dimension_numbers = #tpu.dot_dimension_numbers<[1], [0], [0], [1], [0, 0, 1, 1], [], []>} : vector<256x4xf32>, vector<4x8xf32>, vector<256x8xf32> -> vector<256x8xf32>
    %41 = arith.addf %35, %40 : vector<256x8xf32>
    %c2_44 = arith.constant 2 : index
    %c7_45 = arith.constant 7 : index
    %c0_46 = arith.constant 0 : index
    %42 = vector.load %arg12[%c2_44, %c7_45, %c0_46] : memref<18x25x4xf32, #tpu.memory_space<vmem>>, vector<16x16x4xf32>
    %43 = vector.shape_cast %42 : vector<16x16x4xf32> to vector<256x4xf32>
    %c6 = arith.constant 6 : index
    %c0_47 = arith.constant 0 : index
    %c0_48 = arith.constant 0 : index
    %44 = vector.load %arg2[%c6, %c0_47, %c0_48] : memref<9x4x8xf32, #tpu.memory_space<vmem>>, vector<1x4x8xf32>
    %45 = vector.shape_cast %44 : vector<1x4x8xf32> to vector<4x8xf32>
    %cst_49 = arith.constant dense<0.000000e+00> : vector<256x8xf32>
    %46 = tpu.matmul %43, %45, %cst_49 {dimension_numbers = #tpu.dot_dimension_numbers<[1], [0], [0], [1], [0, 0, 1, 1], [], []>} : vector<256x4xf32>, vector<4x8xf32>, vector<256x8xf32> -> vector<256x8xf32>
    %47 = arith.addf %41, %46 : vector<256x8xf32>
    %c2_50 = arith.constant 2 : index
    %c8_51 = arith.constant 8 : index
    %c0_52 = arith.constant 0 : index
    %48 = vector.load %arg12[%c2_50, %c8_51, %c0_52] : memref<18x25x4xf32, #tpu.memory_space<vmem>>, vector<16x16x4xf32>
    %49 = vector.shape_cast %48 : vector<16x16x4xf32> to vector<256x4xf32>
    %c7_53 = arith.constant 7 : index
    %c0_54 = arith.constant 0 : index
    %c0_55 = arith.constant 0 : index
    %50 = vector.load %arg2[%c7_53, %c0_54, %c0_55] : memref<9x4x8xf32, #tpu.memory_space<vmem>>, vector<1x4x8xf32>
    %51 = vector.shape_cast %50 : vector<1x4x8xf32> to vector<4x8xf32>
    %cst_56 = arith.constant dense<0.000000e+00> : vector<256x8xf32>
    %52 = tpu.matmul %49, %51, %cst_56 {dimension_numbers = #tpu.dot_dimension_numbers<[1], [0], [0], [1], [0, 0, 1, 1], [], []>} : vector<256x4xf32>, vector<4x8xf32>, vector<256x8xf32> -> vector<256x8xf32>
    %53 = arith.addf %47, %52 : vector<256x8xf32>
    %c2_57 = arith.constant 2 : index
    %c9_58 = arith.constant 9 : index
    %c0_59 = arith.constant 0 : index
    %54 = vector.load %arg12[%c2_57, %c9_58, %c0_59] : memref<18x25x4xf32, #tpu.memory_space<vmem>>, vector<16x16x4xf32>
    %55 = vector.shape_cast %54 : vector<16x16x4xf32> to vector<256x4xf32>
    %c8_60 = arith.constant 8 : index
    %c0_61 = arith.constant 0 : index
    %c0_62 = arith.constant 0 : index
    %56 = vector.load %arg2[%c8_60, %c0_61, %c0_62] : memref<9x4x8xf32, #tpu.memory_space<vmem>>, vector<1x4x8xf32>
    %57 = vector.shape_cast %56 : vector<1x4x8xf32> to vector<4x8xf32>
    %cst_63 = arith.constant dense<0.000000e+00> : vector<256x8xf32>
    %58 = tpu.matmul %55, %57, %cst_63 {dimension_numbers = #tpu.dot_dimension_numbers<[1], [0], [0], [1], [0, 0, 1, 1], [], []>} : vector<256x4xf32>, vector<4x8xf32>, vector<256x8xf32> -> vector<256x8xf32>
    %59 = arith.addf %53, %58 : vector<256x8xf32>
    %c0_64 = arith.constant 0 : index
    %c0_65 = arith.constant 0 : index
    %60 = vector.load %arg3[%c0_64, %c0_65] : memref<1x8xf32, #tpu.memory_space<vmem>>, vector<1x8xf32>
    %61 = vector.broadcast %60 : vector<1x8xf32> to vector<256x8xf32>
    %62 = arith.addf %59, %61 : vector<256x8xf32>
    %cst_66 = arith.constant 0.000000e+00 : f32
    %63 = vector.broadcast %cst_66 : f32 to vector<256x8xf32>
    %64 = arith.maximumf %62, %63 : vector<256x8xf32>
    %cst_67 = arith.constant 0.000000e+00 : f32
    %65 = vector.broadcast %cst_67 : f32 to vector<256x64xf32>
    %66 = vector.extract_strided_slice %64 {offsets = [0, 0], sizes = [256, 1], strides = [1, 1]} : vector<256x8xf32> to vector<256x1xf32>
    %c0_68 = arith.constant 0 : index
    %c0_69 = arith.constant 0 : index
    %c0_70 = arith.constant 0 : index
    %67 = vector.load %arg4[%c0_68, %c0_69, %c0_70] : memref<8x256x64xf32, #tpu.memory_space<vmem>>, vector<1x256x64xf32>
    %68 = vector.shape_cast %67 : vector<1x256x64xf32> to vector<256x64xf32>
    %69 = vector.broadcast %66 : vector<256x1xf32> to vector<256x64xf32>
    %70 = arith.mulf %69, %68 : vector<256x64xf32>
    %71 = arith.addf %65, %70 : vector<256x64xf32>
    %72 = vector.extract_strided_slice %64 {offsets = [0, 1], sizes = [256, 1], strides = [1, 1]} : vector<256x8xf32> to vector<256x1xf32>
    %c1_71 = arith.constant 1 : index
    %c0_72 = arith.constant 0 : index
    %c0_73 = arith.constant 0 : index
    %73 = vector.load %arg4[%c1_71, %c0_72, %c0_73] : memref<8x256x64xf32, #tpu.memory_space<vmem>>, vector<1x256x64xf32>
    %74 = vector.shape_cast %73 : vector<1x256x64xf32> to vector<256x64xf32>
    %75 = vector.broadcast %72 : vector<256x1xf32> to vector<256x64xf32>
    %76 = arith.mulf %75, %74 : vector<256x64xf32>
    %77 = arith.addf %71, %76 : vector<256x64xf32>
    %78 = vector.extract_strided_slice %64 {offsets = [0, 2], sizes = [256, 1], strides = [1, 1]} : vector<256x8xf32> to vector<256x1xf32>
    %c2_74 = arith.constant 2 : index
    %c0_75 = arith.constant 0 : index
    %c0_76 = arith.constant 0 : index
    %79 = vector.load %arg4[%c2_74, %c0_75, %c0_76] : memref<8x256x64xf32, #tpu.memory_space<vmem>>, vector<1x256x64xf32>
    %80 = vector.shape_cast %79 : vector<1x256x64xf32> to vector<256x64xf32>
    %81 = vector.broadcast %78 : vector<256x1xf32> to vector<256x64xf32>
    %82 = arith.mulf %81, %80 : vector<256x64xf32>
    %83 = arith.addf %77, %82 : vector<256x64xf32>
    %84 = vector.extract_strided_slice %64 {offsets = [0, 3], sizes = [256, 1], strides = [1, 1]} : vector<256x8xf32> to vector<256x1xf32>
    %c3_77 = arith.constant 3 : index
    %c0_78 = arith.constant 0 : index
    %c0_79 = arith.constant 0 : index
    %85 = vector.load %arg4[%c3_77, %c0_78, %c0_79] : memref<8x256x64xf32, #tpu.memory_space<vmem>>, vector<1x256x64xf32>
    %86 = vector.shape_cast %85 : vector<1x256x64xf32> to vector<256x64xf32>
    %87 = vector.broadcast %84 : vector<256x1xf32> to vector<256x64xf32>
    %88 = arith.mulf %87, %86 : vector<256x64xf32>
    %89 = arith.addf %83, %88 : vector<256x64xf32>
    %90 = vector.extract_strided_slice %64 {offsets = [0, 4], sizes = [256, 1], strides = [1, 1]} : vector<256x8xf32> to vector<256x1xf32>
    %c4_80 = arith.constant 4 : index
    %c0_81 = arith.constant 0 : index
    %c0_82 = arith.constant 0 : index
    %91 = vector.load %arg4[%c4_80, %c0_81, %c0_82] : memref<8x256x64xf32, #tpu.memory_space<vmem>>, vector<1x256x64xf32>
    %92 = vector.shape_cast %91 : vector<1x256x64xf32> to vector<256x64xf32>
    %93 = vector.broadcast %90 : vector<256x1xf32> to vector<256x64xf32>
    %94 = arith.mulf %93, %92 : vector<256x64xf32>
    %95 = arith.addf %89, %94 : vector<256x64xf32>
    %96 = vector.extract_strided_slice %64 {offsets = [0, 5], sizes = [256, 1], strides = [1, 1]} : vector<256x8xf32> to vector<256x1xf32>
    %c5_83 = arith.constant 5 : index
    %c0_84 = arith.constant 0 : index
    %c0_85 = arith.constant 0 : index
    %97 = vector.load %arg4[%c5_83, %c0_84, %c0_85] : memref<8x256x64xf32, #tpu.memory_space<vmem>>, vector<1x256x64xf32>
    %98 = vector.shape_cast %97 : vector<1x256x64xf32> to vector<256x64xf32>
    %99 = vector.broadcast %96 : vector<256x1xf32> to vector<256x64xf32>
    %100 = arith.mulf %99, %98 : vector<256x64xf32>
    %101 = arith.addf %95, %100 : vector<256x64xf32>
    %102 = vector.extract_strided_slice %64 {offsets = [0, 6], sizes = [256, 1], strides = [1, 1]} : vector<256x8xf32> to vector<256x1xf32>
    %c6_86 = arith.constant 6 : index
    %c0_87 = arith.constant 0 : index
    %c0_88 = arith.constant 0 : index
    %103 = vector.load %arg4[%c6_86, %c0_87, %c0_88] : memref<8x256x64xf32, #tpu.memory_space<vmem>>, vector<1x256x64xf32>
    %104 = vector.shape_cast %103 : vector<1x256x64xf32> to vector<256x64xf32>
    %105 = vector.broadcast %102 : vector<256x1xf32> to vector<256x64xf32>
    %106 = arith.mulf %105, %104 : vector<256x64xf32>
    %107 = arith.addf %101, %106 : vector<256x64xf32>
    %108 = vector.extract_strided_slice %64 {offsets = [0, 7], sizes = [256, 1], strides = [1, 1]} : vector<256x8xf32> to vector<256x1xf32>
    %c7_89 = arith.constant 7 : index
    %c0_90 = arith.constant 0 : index
    %c0_91 = arith.constant 0 : index
    %109 = vector.load %arg4[%c7_89, %c0_90, %c0_91] : memref<8x256x64xf32, #tpu.memory_space<vmem>>, vector<1x256x64xf32>
    %110 = vector.shape_cast %109 : vector<1x256x64xf32> to vector<256x64xf32>
    %111 = vector.broadcast %108 : vector<256x1xf32> to vector<256x64xf32>
    %112 = arith.mulf %111, %110 : vector<256x64xf32>
    %113 = arith.addf %107, %112 : vector<256x64xf32>
    %cst_92 = arith.constant dense<0.000000e+00> : vector<64xf32>
    %114 = vector.multi_reduction <add>, %113, %cst_92 [0] : vector<256x64xf32> to vector<64xf32>
    %115 = vector.shape_cast %114 : vector<64xf32> to vector<1x64xf32>
    %c0_93 = arith.constant 0 : index
    %c0_94 = arith.constant 0 : index
    %116 = vector.load %arg5[%c0_93, %c0_94] : memref<1x64xf32, #tpu.memory_space<vmem>>, vector<1x64xf32>
    %117 = arith.addf %115, %116 : vector<1x64xf32>
    %118 = vector.extract_strided_slice %117 {offsets = [0, 0], sizes = [1, 32], strides = [1, 1]} : vector<1x64xf32> to vector<1x32xf32>
    %119 = vector.extract_strided_slice %117 {offsets = [0, 32], sizes = [1, 32], strides = [1, 1]} : vector<1x64xf32> to vector<1x32xf32>
    %cst_95 = arith.constant 5.000000e-01 : f32
    %120 = vector.broadcast %cst_95 : f32 to vector<1x32xf32>
    %121 = arith.mulf %119, %120 : vector<1x32xf32>
    %122 = math.exp %121 : vector<1x32xf32>
    %c0_96 = arith.constant 0 : index
    %c0_97 = arith.constant 0 : index
    %c0_98 = arith.constant 0 : index
    %123 = vector.load %arg6[%c0_96, %c0_97, %c0_98] : memref<1x1x32xf32, #tpu.memory_space<vmem>>, vector<1x1x32xf32>
    %124 = vector.shape_cast %123 : vector<1x1x32xf32> to vector<1x32xf32>
    %125 = arith.mulf %122, %124 : vector<1x32xf32>
    %126 = arith.addf %118, %125 : vector<1x32xf32>
    %c0_99 = arith.constant 0 : index
    %c0_100 = arith.constant 0 : index
    %127 = vector.load %arg7[%c0_99, %c0_100] : memref<32x1024xf32, #tpu.memory_space<vmem>>, vector<32x1024xf32>
    %cst_101 = arith.constant dense<0.000000e+00> : vector<1x1024xf32>
    %128 = tpu.matmul %126, %127, %cst_101 {dimension_numbers = #tpu.dot_dimension_numbers<[1], [0], [0], [1], [0, 0, 1, 1], [], []>} : vector<1x32xf32>, vector<32x1024xf32>, vector<1x1024xf32> -> vector<1x1024xf32>
    %c0_102 = arith.constant 0 : index
    %c0_103 = arith.constant 0 : index
    %129 = vector.load %arg8[%c0_102, %c0_103] : memref<1x1024xf32, #tpu.memory_space<vmem>>, vector<1x1024xf32>
    %130 = arith.addf %128, %129 : vector<1x1024xf32>
    %131 = math.tanh %130 : vector<1x1024xf32>
    %c0_104 = arith.constant 0 : index
    %c0_105 = arith.constant 0 : index
    %c0_106 = arith.constant 0 : index
    %132 = vector.load %arg9[%c0_104, %c0_105, %c0_106] : memref<1x1x1024xf32, #tpu.memory_space<vmem>>, vector<1x1x1024xf32>
    %133 = vector.shape_cast %132 : vector<1x1x1024xf32> to vector<1x1024xf32>
    %134 = vector.shape_cast %131 : vector<1x1024xf32> to vector<1x1x1024xf32>
    tpu.vector_store %arg9[%c0_104, %c0_105, %c0_106], %134 {strides = array<i32>} : memref<1x1x1024xf32, #tpu.memory_space<vmem>>, vector<1x1x1024xf32>,
    %c0_107 = arith.constant 0 : index
    %c0_108 = arith.constant 0 : index
    %c0_109 = arith.constant 0 : index
    %135 = vector.load %arg10[%c0_107, %c0_108, %c0_109] : memref<1x1x32xf32, #tpu.memory_space<vmem>>, vector<1x1x32xf32>
    %136 = vector.shape_cast %135 : vector<1x1x32xf32> to vector<1x32xf32>
    %137 = vector.shape_cast %118 : vector<1x32xf32> to vector<1x1x32xf32>
    tpu.vector_store %arg10[%c0_107, %c0_108, %c0_109], %137 {strides = array<i32>} : memref<1x1x32xf32, #tpu.memory_space<vmem>>, vector<1x1x32xf32>,
    %c0_110 = arith.constant 0 : index
    %c0_111 = arith.constant 0 : index
    %c0_112 = arith.constant 0 : index
    %138 = vector.load %arg11[%c0_110, %c0_111, %c0_112] : memref<1x1x32xf32, #tpu.memory_space<vmem>>, vector<1x1x32xf32>
    %139 = vector.shape_cast %138 : vector<1x1x32xf32> to vector<1x32xf32>
    %140 = vector.shape_cast %119 : vector<1x32xf32> to vector<1x1x32xf32>
    tpu.vector_store %arg11[%c0_110, %c0_111, %c0_112], %140 {strides = array<i32>} : memref<1x1x32xf32, #tpu.memory_space<vmem>>, vector<1x1x32xf32>,
    return
  }
  func.func @transform_0(%arg0: i32) -> (i32, i32, i32, i32) {
    %c0_i32 = arith.constant 0 : i32
    %c0_i32_0 = arith.constant 0 : i32
    %c0_i32_1 = arith.constant 0 : i32
    %c0_i32_2 = arith.constant 0 : i32
    return %arg0, %c0_i32, %c0_i32_0, %c0_i32_1 : i32, i32, i32, i32
  }
  func.func @transform_1(%arg0: i32) -> (i32, i32, i32) {
    %c0_i32 = arith.constant 0 : i32
    %c0_i32_0 = arith.constant 0 : i32
    %c0_i32_1 = arith.constant 0 : i32
    %c0_i32_2 = arith.constant 0 : i32
    return %c0_i32, %c0_i32_0, %c0_i32_1 : i32, i32, i32
  }
  func.func @transform_2(%arg0: i32) -> (i32, i32) {
    %c0_i32 = arith.constant 0 : i32
    %c0_i32_0 = arith.constant 0 : i32
    %c0_i32_1 = arith.constant 0 : i32
    return %c0_i32, %c0_i32_0 : i32, i32
  }
  func.func @transform_3(%arg0: i32) -> (i32, i32, i32) {
    %c0_i32 = arith.constant 0 : i32
    %c0_i32_0 = arith.constant 0 : i32
    %c0_i32_1 = arith.constant 0 : i32
    %c0_i32_2 = arith.constant 0 : i32
    return %c0_i32, %c0_i32_0, %c0_i32_1 : i32, i32, i32
  }
  func.func @transform_4(%arg0: i32) -> (i32, i32) {
    %c0_i32 = arith.constant 0 : i32
    %c0_i32_0 = arith.constant 0 : i32
    %c0_i32_1 = arith.constant 0 : i32
    return %c0_i32, %c0_i32_0 : i32, i32
  }
  func.func @transform_5(%arg0: i32) -> (i32, i32, i32) {
    %c0_i32 = arith.constant 0 : i32
    %c0_i32_0 = arith.constant 0 : i32
    %c0_i32_1 = arith.constant 0 : i32
    return %arg0, %c0_i32, %c0_i32_0 : i32, i32, i32
  }
  func.func @transform_6(%arg0: i32) -> (i32, i32) {
    %c0_i32 = arith.constant 0 : i32
    %c0_i32_0 = arith.constant 0 : i32
    %c0_i32_1 = arith.constant 0 : i32
    return %c0_i32, %c0_i32_0 : i32, i32
  }
  func.func @transform_7(%arg0: i32) -> (i32, i32) {
    %c0_i32 = arith.constant 0 : i32
    %c0_i32_0 = arith.constant 0 : i32
    %c0_i32_1 = arith.constant 0 : i32
    return %c0_i32, %c0_i32_0 : i32, i32
  }
  func.func @transform_8(%arg0: i32) -> (i32, i32, i32) {
    %c0_i32 = arith.constant 0 : i32
    %c0_i32_0 = arith.constant 0 : i32
    %c0_i32_1 = arith.constant 0 : i32
    return %arg0, %c0_i32, %c0_i32_0 : i32, i32, i32
  }
  func.func @transform_9(%arg0: i32) -> (i32, i32, i32) {
    %c0_i32 = arith.constant 0 : i32
    %c0_i32_0 = arith.constant 0 : i32
    %c0_i32_1 = arith.constant 0 : i32
    return %arg0, %c0_i32, %c0_i32_0 : i32, i32, i32
  }
  func.func @transform_10(%arg0: i32) -> (i32, i32, i32) {
    %c0_i32 = arith.constant 0 : i32
    %c0_i32_0 = arith.constant 0 : i32
    %c0_i32_1 = arith.constant 0 : i32
    return %arg0, %c0_i32, %c0_i32_0 : i32, i32, i32
  }
}

</mosaic_0001>

<bundles_post_ra>
// kernel: vae_forward.1
= control target key start
LH: loop header
LB: loop body
LE: loop exit
PB: predicated region body
PF: predicated region fallthrough
CT: control target
= control target key end

     0   :  { %s9797_s0 = inlined_call_operand.vmem [shape: f32[2,16,16,4], index: 0, kind: input, shape index: {}]   ;;  %s9798_s1 = inlined_call_operand.vmem [shape: f32[9,4,8], index: 1, kind: input, shape index: {}]   ;;  %s9799_s2 = inlined_call_operand.vmem [shape: f32[1,8], index: 2, kind: input, shape index: {}]   ;;  %s9800_s3 = inlined_call_operand.vmem [shape: f32[8,256,64], index: 3, kind: input, shape index: {}]   ;;  %s9801_s4 = inlined_call_operand.vmem [shape: f32[1,64], index: 4, kind: input, shape index: {}]   ;;  %s9802_s5 = inlined_call_operand.vmem [shape: f32[2,1,32], index: 5, kind: input, shape index: {}]   ;;  %s9803_s6 = inlined_call_operand.vmem [shape: f32[32,1024], index: 6, kind: input, shape index: {}]   ;;  %s9804_s7 = inlined_call_operand.vmem [shape: f32[1,1024], index: 7, kind: input, shape index: {}]   ;;  %s9805_s8 = inlined_call_operand.vmem [shape: f32[2,1,1024], index: 8, kind: output, shape index: {0}]   ;;  %s9806_s9 = inlined_call_operand.hbm [shape: f32[2,1,32], index: 9, kind: output, shape index: {1}]   ;;  %s9807_s10 = inlined_call_operand.hbm [shape: f32[2,1,32], index: 10, kind: output, shape index: {2}]  }
   0x1   :  { %9854 = sst [smem:[#allocation120_spill]] %s9797_s0 }
   0x2   :  { %9855 = sst [smem:[#allocation121_spill]] %s9798_s1 }
   0x3   :  { %9856 = sst [smem:[#allocation122_spill]] %s9799_s2 }
   0x4   :  { %9857 = sst [smem:[#allocation123_spill]] %s9800_s3 }
   0x5   :  { %9858 = sst [smem:[#allocation124_spill]] %s9801_s4 }
   0x6   :  { %16 = vsyncpa [#allocation4], 0 }
   0x7   :  { %18 = vsyncpa [#allocation4 + $0x1], 0 }
   0x8   :  { %19 = vsyncpa [#allocation6], 0 }
   0x9   :  { %21 = vsyncpa [#allocation6 + $0x1], 0  ;;  %s6401_s13 = smov 0   ;;  %s6403_s14 = smov 0  }
   0xa   :  { %s6405_s15 = smov 0   ;;  %s6407_s16 = smov 0  }
   0xb LB: > { %s6422_s17 = sadd.s32 4294967295, %s6333_s16   ;;  %s5367_s18 = sadd.s32 4294967294, %s6333_s16   ;;  %s6333_s16 = sphi %s6407_s16, %s10209_s16   ;;  %s6329_s15 = sphi %s6405_s15, %s10208_s15   ;;  %s6325_s14 = sphi %s6403_s14, %s10207_s14   ;;  %s6321_s13 = sphi %s6401_s13, %s10206_s13  }
   0xc   : > { %s6426_s19 = sadd.s32 1, %s6333_s16   ;;  %s238_s20 = sadd.s32 1, %s6329_s15 }
   0xd   : > { %s235_s21 = ssub.s32 %s6333_s16, %s6426_s19  ;;  %p248_p0 = scmp.ne.s32.totalorder %s6329_s15, %s6325_s14 }
   0xe   : > { %p236_p1 = scmp.eq.s32.totalorder %s235_s21, 0  ;;  %p249_p2 = scmp.eq.s32.totalorder %s6422_s17, 1 }
   0xf   : > { %p254_p3 = scmp.ne.s32.totalorder %s6325_s14, %s6321_s13  ;;  %p255_p4 = scmp.eq.s32.totalorder %s5367_s18, 1 }
  0x10   : > { %s6437_s22 = scalar_select %p236_p1, %s6329_s15, %s238_s20  }
  0x11   : > { %p6439_p5 = por %p249_p2, %p248_p0  ;;  %p6443_p6 = por %p255_p4, %p254_p3 }
  0x12   : > { %p5370_p7 = scmp.ge.s32.totalorder %s6333_s16, 1  ;;  %p331_p8 = scmp.lt.s32.totalorder %s6333_s16, 3 }
  0x14   : > { %p332_p9 = pnand %p5370_p7, %p331_p8 }
  0x16   : > { %335 = sbr.rel (%p332_p9) target bundleno = 1762 (0x6e2), region = 52 }
  0x1b   : > { %s9861_s1 = sld [smem:[#allocation121_spill]]  ;;  %vm693_vm0 = vcmask 1043456   ;;  %vm391_vm1 = vcmask 31744   ;;  %v6335_v1 = vmov 0.0   ;;  %p379_p10 = scmp.lt.s32.totalorder %s6422_s17, 1  ;;  %vm395_vm2 = vcmask 24576  }
  0x1c   : > { %393 = vst.msk [vmem:[#allocation2 + $0x8] sm:$0xff] %vm391_vm1, %v6335_v1  ;;  %s9862_s0 = sld [smem:[#allocation120_spill]]  ;;  %vm4868_vm3 = vcmask 523264   ;;  %s6344_s27 = smov 32   ;;  %vm5207_vm4 = vcmask 253952   ;;  %vm5005_vm5 = vcmask 261120  }
  0x1d   : > { %392 = vst.msk [vmem:[#allocation2] sm:$0xff] %vm391_vm1, %v6335_v1  ;;  %s6558_s21 = scalar_select %p379_p10, %s6422_s17, 1 }
  0x1e   : > { %394 = vst.msk [vmem:[#allocation2 + $0x10] sm:$0xff] %vm391_vm1, %v6335_v1  ;;  %s9942_s2 = sld [smem:[#allocation122_spill]]  ;;  %s6345_s30 = smov 96  }
  0x1f   : > { %397 = vst.msk [vmem:[#allocation2 + $0x20] sm:$0xff] %vm391_vm1, %v6335_v1  ;;  %s5913_s25 = sshll.u32 %s6558_s21, 8  ;;  %s10072_s3 = sld [smem:[#allocation123_spill]] }
  0x20   : > { %398 = vst.msk [vmem:[#allocation2 + $0x28] sm:$0xff] %vm391_vm1, %v6335_v1  ;;  %s10205_s4 = sld [smem:[#allocation124_spill]] }
  0x21   : > { %v5374_v0 = vld [vmem:[%s9861_s1 + $0x4] sm:$0xf]  ;;  %399 = vst.msk [vmem:[#allocation2 + $0x30] sm:$0xff] %vm391_vm1, %v6335_v1  ;;  %v5509_v3 = vld [vmem:[%s9861_s1 + $0x10] sm:$0xf] }
  0x22   : > { %5375 = vmatpush.msk.msra.mxu0 %vm693_vm0, %v5374_v0  ;;  %5914 = vmatpush.msk.msra.mxu1 %vm693_vm0, %v5374_v0  ;;  %401 = vst.msk [vmem:[#allocation2 + $0x40] sm:$0xff] %vm391_vm1, %v6335_v1  ;;  %v5475_v5 = vld [vmem:[%s9861_s1 + $0xc] sm:$0xf]  ;;  %v5441_v6 = vld [vmem:[%s9861_s1 + $0x8] sm:$0xf]  ;;  %s6580_s28 = scalar_lea.vmem %s9862_s0, %s5913_s25  ;;  %s5234_s0 = scalar_lea.hbm %s9806_s9, %s6422_s17 }
  0x23   : > { %5915 = vmatpush.msk.msra.mxu2 %vm693_vm0, %v5374_v0  ;;  %5916 = vmatpush.msk.msra.mxu3 %vm693_vm0, %v5374_v0  ;;  %v563_v2 = vld [vmem:[#allocation2 + $0x8] sm:$0xff]  ;;  %402 = vst.msk [vmem:[#allocation2 + $0x48] sm:$0xff] %vm391_vm1, %v6335_v1  ;;  %v562_v7 = vld [vmem:[%s9861_s1] sm:$0xf]  ;;  %v480_v9 = vld [vmem:[%s6580_s28 + $0x78] sm:$0xff]  ;;  %s5238_s25 = sshll.u32 %s5234_s0, 4  ;;  %s5239_s25 = int_to_ptr.hbm [resolvable:$true] %s5238_s25 }
  0x24   : > { %5376 = vmatmul.msk.f32.vlgmr.msra.gmra.mxu0 %vm391_vm1, %v563_v2  ;;  %403 = vst.msk [vmem:[#allocation2 + $0x50] sm:$0xff] %vm391_vm1, %v6335_v1  ;;  %5408 = vmatpush.msk.msrb.mxu1 %vm693_vm0, %v562_v7  ;;  %v473_v8 = vld [vmem:[%s6580_s28 + $0x40] sm:$0xff]  ;;  %v487_v10 = vld [vmem:[%s6580_s28 + $0xb0] sm:$0xff]  ;;  %v474_v11 = vld [vmem:[%s6580_s28 + $0x48] sm:$0xff] }
  0x25   : > { %405 = vst.msk [vmem:[#allocation2 + $0x60] sm:$0xff] %vm391_vm1, %v6335_v1  ;;  %5510 = vmatpush.msk.msrb.mxu0 %vm693_vm0, %v5509_v3  ;;  %v564_v4 = vld [vmem:[#allocation2 + $0x10] sm:$0xff]  ;;  %5476 = vmatpush.msk.msrb.mxu3 %vm693_vm0, %v5475_v5  ;;  %v481_v12 = vld [vmem:[%s6580_s28 + $0x80] sm:$0xff]  ;;  %v488_v13 = vld [vmem:[%s6580_s28 + $0xb8] sm:$0xff] }
  0x26   : > { %406 = vst.msk [vmem:[#allocation2 + $0x68] sm:$0xff] %vm391_vm1, %v6335_v1  ;;  %5442 = vmatpush.msk.msrb.mxu2 %vm693_vm0, %v5441_v6  ;;  %v465_v14 = vld [vmem:[%s6580_s28] sm:$0xff]  ;;  %v475_v15 = vld [vmem:[%s6580_s28 + $0x50] sm:$0xff]  ;;  %v482_v16 = vld [vmem:[%s6580_s28 + $0x88] sm:$0xff] }
  0x27   : > { %407 = vst.msk [vmem:[#allocation2 + $0x70] sm:$0xff] %vm391_vm1, %v6335_v1  ;;  %v489_v17 = vld [vmem:[%s6580_s28 + $0xc0] sm:$0xff]  ;;  %v466_v19 = vld [vmem:[%s6580_s28 + $0x8] sm:$0xff]  ;;  %v476_v21 = vld [vmem:[%s6580_s28 + $0x58] sm:$0xff] }
  0x28   : > { %409 = vst.msk [vmem:[#allocation2 + $0x80] sm:$0xff] %vm391_vm1, %v6335_v1  ;;  %v483_v23 = vld [vmem:[%s6580_s28 + $0x90] sm:$0xff]  ;;  %v490_v24 = vld [vmem:[%s6580_s28 + $0xc8] sm:$0xff]  ;;  %v477_v26 = vld [vmem:[%s6580_s28 + $0x60] sm:$0xff] }
  0x29   : > { %410 = vst.msk [vmem:[#allocation2 + $0x88] sm:$0xff] %vm391_vm1, %v6335_v1  ;;  %v467_v25 = vld [vmem:[%s6580_s28 + $0x10] sm:$0xff]  ;;  %v484_v29 = vld [vmem:[%s6580_s28 + $0x98] sm:$0xff]  ;;  %v478_v34 = vld [vmem:[%s6580_s28 + $0x68] sm:$0xff] }
  0x2a   : > { %411 = vst.msk [vmem:[#allocation2 + $0x90] sm:$0xff] %vm391_vm1, %v6335_v1  ;;  %v491_v31 = vld [vmem:[%s6580_s28 + $0xd0] sm:$0xff]  ;;  %v468_v33 = vld [vmem:[%s6580_s28 + $0x18] sm:$0xff]  ;;  %v485_v35 = vld [vmem:[%s6580_s28 + $0xa0] sm:$0xff] }
  0x2b   : > { %413 = vst.msk [vmem:[#allocation2 + $0xa0] sm:$0xff] %vm391_vm1, %v6335_v1  ;;  %v492_v36 = vld [vmem:[%s6580_s28 + $0xd8] sm:$0xff]  ;;  %v469_v38 = vld [vmem:[%s6580_s28 + $0x20] sm:$0xff]  ;;  %v479_v39 = vld [vmem:[%s6580_s28 + $0x70] sm:$0xff] }
  0x2c   : > { %414 = vst.msk [vmem:[#allocation2 + $0xa8] sm:$0xff] %vm391_vm1, %v6335_v1  ;;  %5377 = vmatmul.msk.f32.gmra.mxu0 %vm391_vm1, %v564_v4  ;;  %v486_v41 = vld [vmem:[%s6580_s28 + $0xa8] sm:$0xff]  ;;  %v493_v43 = vld [vmem:[%s6580_s28 + $0xe0] sm:$0xff]  ;;  %v471_v48 = vld [vmem:[%s6580_s28 + $0x30] sm:$0xff] }
  0x2d   : > { %415 = vst.msk [vmem:[#allocation2 + $0xb0] sm:$0xff] %vm391_vm1, %v6335_v1  ;;  %v470_v45 = vld [vmem:[%s6580_s28 + $0x28] sm:$0xff]  ;;  %v5577_v56 = vld [vmem:[%s9861_s1 + $0x18] sm:$0xf]  ;;  %v5611_v57 = vld [vmem:[%s9861_s1 + $0x1c] sm:$0xf] }
  0x2e   : > { %417 = vst.msk [vmem:[#allocation2 + $0xc0] sm:$0xff] %vm391_vm1, %v6335_v1  ;;  %v494_v46 = vld [vmem:[%s6580_s28 + $0xe8] sm:$0xff]  ;;  %v5543_v59 = vld [vmem:[%s9861_s1 + $0x14] sm:$0xf]  ;;  %v472_v63 = vld [vmem:[%s6580_s28 + $0x38] sm:$0xff] }
  0x2f   : > { %418 = vst.msk [vmem:[#allocation2 + $0xc8] sm:$0xff] %vm391_vm1, %v6335_v1  ;;  %v5645_v0 = vld [vmem:[%s9861_s1 + $0x20] sm:$0xf]  ;;  %v530_v6 = vld [vmem:[#allocation2 + $0x7] sm:$0xff] }
  0x30   : > { %419 = vst.msk [vmem:[#allocation2 + $0xd0] sm:$0xff] %vm391_vm1, %v6335_v1  ;;  %5646 = vmatpush.msk.msra.mxu0 %vm693_vm0, %v5645_v0  ;;  %v1022_v7 = vld [vmem:[#allocation2 + $0x9] sm:$0xff] }
  0x31   : > { %421 = vst.msk [vmem:[#allocation2 + $0xe0] sm:$0xff] %vm391_vm1, %v6335_v1 }
  0x32   : > { %422 = vst.msk [vmem:[#allocation2 + $0xe8] sm:$0xff] %vm391_vm1, %v6335_v1 }
  0x33   : > { %423 = vst.msk [vmem:[#allocation2 + $0xf0] sm:$0xff] %vm391_vm1, %v6335_v1 }
  0x34   : > { %425 = vst.msk [vmem:[#allocation2 + $0x100] sm:$0xff] %vm391_vm1, %v6335_v1 }
  0x35   : > { %426 = vst.msk [vmem:[#allocation2 + $0x108] sm:$0xff] %vm391_vm1, %v6335_v1 }
  0x36   : > { %427 = vst.msk [vmem:[#allocation2 + $0x110] sm:$0xff] %vm391_vm1, %v6335_v1 }
  0x37   : > { %429 = vst.msk [vmem:[#allocation2 + $0x120] sm:$0xff] %vm391_vm1, %v6335_v1 }
  0x38   : > { %430 = vst.msk [vmem:[#allocation2 + $0x128] sm:$0xff] %vm391_vm1, %v6335_v1 }
  0x39   : > { %431 = vst.msk [vmem:[#allocation2 + $0x130] sm:$0xff] %vm391_vm1, %v6335_v1 }
  0x3a   : > { %433 = vst.msk [vmem:[#allocation2 + $0x140] sm:$0xff] %vm391_vm1, %v6335_v1 }
  0x3b   : > { %434 = vst.msk [vmem:[#allocation2 + $0x148] sm:$0xff] %vm391_vm1, %v6335_v1 }
  0x3c   : > { %435 = vst.msk [vmem:[#allocation2 + $0x150] sm:$0xff] %vm391_vm1, %v6335_v1 }
  0x3d   : > { %437 = vst.msk [vmem:[#allocation2 + $0x160] sm:$0xff] %vm391_vm1, %v6335_v1 }
  0x3e   : > { %438 = vst.msk [vmem:[#allocation2 + $0x168] sm:$0xff] %vm391_vm1, %v6335_v1 }
  0x3f   : > { %439 = vst.msk [vmem:[#allocation2 + $0x170] sm:$0xff] %vm391_vm1, %v6335_v1 }
  0x40   : > { %441 = vst.msk [vmem:[#allocation2 + $0x180] sm:$0xff] %vm391_vm1, %v6335_v1 }
  0x41   : > { %442 = vst.msk [vmem:[#allocation2 + $0x188] sm:$0xff] %vm391_vm1, %v6335_v1 }
  0x42   : > { %443 = vst.msk [vmem:[#allocation2 + $0x190] sm:$0xff] %vm391_vm1, %v6335_v1 }
  0x43   : > { %445 = vst.msk [vmem:[#allocation2 + $0x1a0] sm:$0xff] %vm391_vm1, %v6335_v1 }
  0x44   : > { %446 = vst.msk [vmem:[#allocation2 + $0x1a8] sm:$0xff] %vm391_vm1, %v6335_v1 }
  0x45   : > { %447 = vst.msk [vmem:[#allocation2 + $0x1b0] sm:$0xff] %vm391_vm1, %v6335_v1 }
  0x46   : > { %449 = vst.msk [vmem:[#allocation2 + $0x1c0] sm:$0xff] %vm391_vm1, %v6335_v1 }
  0x47   : > { %450 = vst.msk [vmem:[#allocation2 + $0x1c8] sm:$0xff] %vm391_vm1, %v6335_v1 }
  0x48   : > { %451 = vst.msk [vmem:[#allocation2 + $0x1d0] sm:$0xff] %vm391_vm1, %v6335_v1 }
  0x49   : > { %453 = vst.msk [vmem:[#allocation2 + $0x1e0] sm:$0xff] %vm391_vm1, %v6335_v1 }
  0x4a   : > { %454 = vst.msk [vmem:[#allocation2 + $0x1e8] sm:$0xff] %vm391_vm1, %v6335_v1 }
  0x4b   : > { %455 = vst.msk [vmem:[#allocation2 + $0x1f0] sm:$0xff] %vm391_vm1, %v6335_v1 }
  0x4c   : > { %457 = vst.msk [vmem:[#allocation2 + $0x200] sm:$0xff] %vm391_vm1, %v6335_v1 }
  0x4d   : > { %458 = vst.msk [vmem:[#allocation2 + $0x208] sm:$0xff] %vm391_vm1, %v6335_v1 }
  0x4e   : > { %459 = vst.msk [vmem:[#allocation2 + $0x210] sm:$0xff] %vm391_vm1, %v6335_v1 }
  0x4f   : > { %461 = vst.msk [vmem:[#allocation2 + $0x220] sm:$0xff] %vm391_vm1, %v6335_v1 }
  0x50   : > { %462 = vst.msk [vmem:[#allocation2 + $0x228] sm:$0xff] %vm391_vm1, %v6335_v1 }
  0x51   : > { %463 = vst.msk [vmem:[#allocation2 + $0x230] sm:$0xff] %vm391_vm1, %v6335_v1 }
  0x52   : > { %506 = vst.msk [vmem:[#allocation2 + $0xa8] sm:$0xff] %vm391_vm1, %v473_v8 }
  0x53   : > { %513 = vst.msk [vmem:[#allocation2 + $0x110] sm:$0xff] %vm391_vm1, %v480_v9 }
  0x54   : > { %520 = vst.msk [vmem:[#allocation2 + $0x188] sm:$0xff] %vm391_vm1, %v487_v10  ;;  %v531_v10 = vld [vmem:[#allocation2 + $0xf] sm:$0xff] }
  0x55   : > { %507 = vst.msk [vmem:[#allocation2 + $0xb0] sm:$0xff] %vm391_vm1, %v474_v11 }
  0x56   : > { %514 = vst.msk [vmem:[#allocation2 + $0x128] sm:$0xff] %vm391_vm1, %v481_v12 }
  0x57   : > { %521 = vst.msk [vmem:[#allocation2 + $0x190] sm:$0xff] %vm391_vm1, %v488_v13 }
  0x58   : > { %498 = vst.msk [vmem:[#allocation2 + $0x28] sm:$0xff] %vm391_vm1, %v465_v14 }
  0x59   : > { %v6609_v18 = vld [vmem:[#allocation2 + $0xa8] sm:$0xff]  ;;  %508 = vst.msk [vmem:[#allocation2 + $0xc8] sm:$0xff] %vm391_vm1, %v475_v15 }
  0x5a   : > { %5386 = vmatmul.msk.f32.vlgmr.msra.gmra.mxu1 %vm391_vm1, %v6609_v18  ;;  %v6615_v20 = vld [vmem:[#allocation2 + $0x110] sm:$0xff]  ;;  %515 = vst.msk [vmem:[#allocation2 + $0x130] sm:$0xff] %vm391_vm1, %v482_v16 }
  0x5b   : > { %5393 = vmatmul.msk.f32.vlgmr.msra.gmra.mxu2 %vm391_vm1, %v6615_v20  ;;  %v6621_v22 = vld [vmem:[#allocation2 + $0x188] sm:$0xff]  ;;  %522 = vst.msk [vmem:[#allocation2 + $0x1a8] sm:$0xff] %vm391_vm1, %v489_v17  ;;  %5544 = vmatpush.msk.msra.mxu1 %vm693_vm0, %v5543_v59 }
  0x5c   : > { %5400 = vmatmul.msk.f32.vlgmr.msra.gmra.mxu3 %vm391_vm1, %v6621_v22  ;;  %499 = vst.msk [vmem:[#allocation2 + $0x30] sm:$0xff] %vm391_vm1, %v466_v19  ;;  %v6633_v27 = vld [vmem:[#allocation2 + $0xb0] sm:$0xff]  ;;  %5578 = vmatpush.msk.msra.mxu2 %vm693_vm0, %v5577_v56 }
  0x5d   : > { %509 = vst.msk [vmem:[#allocation2 + $0xd0] sm:$0xff] %vm391_vm1, %v476_v21  ;;  %v6639_v30 = vld [vmem:[#allocation2 + $0x128] sm:$0xff]  ;;  %5612 = vmatpush.msk.msra.mxu3 %vm693_vm0, %v5611_v57 }
  0x5e   : > { %516 = vst.msk [vmem:[#allocation2 + $0x148] sm:$0xff] %vm391_vm1, %v483_v23  ;;  %v6645_v32 = vld [vmem:[#allocation2 + $0x190] sm:$0xff] }
  0x5f   : > { %v6635_v28 = vld [vmem:[#allocation2 + $0x28] sm:$0xff]  ;;  %523 = vst.msk [vmem:[#allocation2 + $0x1b0] sm:$0xff] %vm391_vm1, %v490_v24 }
  0x60   : > { %5378 = vmatmul.msk.f32.gmra.mxu0 %vm391_vm1, %v6635_v28  ;;  %500 = vst.msk [vmem:[#allocation2 + $0x48] sm:$0xff] %vm391_vm1, %v467_v25  ;;  %v6667_v40 = vld [vmem:[#allocation2 + $0xc8] sm:$0xff] }
  0x61   : > { %510 = vst.msk [vmem:[#allocation2 + $0xe8] sm:$0xff] %vm391_vm1, %v477_v26  ;;  %v6671_v42 = vld [vmem:[#allocation2 + $0x130] sm:$0xff]  ;;  %v1300_v12 = vld [vmem:[#allocation2 + $0x27] sm:$0xff] }
  0x62   : > { %5387 = vmatmul.msk.f32.gmra.mxu1 %vm391_vm1, %v6633_v27  ;;  %517 = vst.msk [vmem:[#allocation2 + $0x150] sm:$0xff] %vm391_vm1, %v484_v29  ;;  %v6677_v44 = vld [vmem:[#allocation2 + $0x1a8] sm:$0xff] }
  0x63   : > { %5394 = vmatmul.msk.f32.gmra.mxu2 %vm391_vm1, %v6639_v30  ;;  %524 = vst.msk [vmem:[#allocation2 + $0x1c8] sm:$0xff] %vm391_vm1, %v491_v31  ;;  %v6661_v37 = vld [vmem:[#allocation2 + $0x30] sm:$0xff]  ;;  %v6950_v57 = vld [vmem:[#allocation2 + $0xc7] sm:$0xff] }
  0x64   : > { %5401 = vmatmul.msk.f32.gmra.mxu3 %vm391_vm1, %v6645_v32  ;;  %501 = vst.msk [vmem:[#allocation2 + $0x50] sm:$0xff] %vm391_vm1, %v468_v33  ;;  %v6696_v49 = vld [vmem:[#allocation2 + $0xd0] sm:$0xff] }
  0x65   : > { %511 = vst.msk [vmem:[#allocation2 + $0xf0] sm:$0xff] %vm391_vm1, %v478_v34  ;;  %v6698_v50 = vld [vmem:[#allocation2 + $0x148] sm:$0xff] }
  0x66   : > { %518 = vst.msk [vmem:[#allocation2 + $0x168] sm:$0xff] %vm391_vm1, %v485_v35  ;;  %v6702_v51 = vld [vmem:[#allocation2 + $0x1b0] sm:$0xff] }
  0x67   : > { %525 = vst.msk [vmem:[#allocation2 + $0x1d0] sm:$0xff] %vm391_vm1, %v492_v36  ;;  %v6691_v47 = vld [vmem:[#allocation2 + $0x48] sm:$0xff] }
  0x68   : > { %5379 = vmatmul.msk.f32.gmra.mxu0 %vm391_vm1, %v6661_v37  ;;  %502 = vst.msk [vmem:[#allocation2 + $0x68] sm:$0xff] %vm391_vm1, %v469_v38  ;;  %v6718_v53 = vld [vmem:[#allocation2 + $0xe8] sm:$0xff] }
  0x69   : > { %512 = vst.msk [vmem:[#allocation2 + $0x108] sm:$0xff] %vm391_vm1, %v479_v39  ;;  %v6722_v54 = vld [vmem:[#allocation2 + $0x150] sm:$0xff]  ;;  %v6835_v16 = vld [vmem:[#allocation2 + $0x47] sm:$0xff] }
  0x6a   : > { %5388 = vmatmul.msk.f32.gmra.mxu1 %vm391_vm1, %v6667_v40  ;;  %519 = vst.msk [vmem:[#allocation2 + $0x170] sm:$0xff] %vm391_vm1, %v486_v41  ;;  %v6728_v55 = vld [vmem:[#allocation2 + $0x1c8] sm:$0xff] }
  0x6b   : > { %5395 = vmatmul.msk.f32.gmra.mxu2 %vm391_vm1, %v6671_v42  ;;  %526 = vst.msk [vmem:[#allocation2 + $0x1e8] sm:$0xff] %vm391_vm1, %v493_v43  ;;  %v6712_v52 = vld [vmem:[#allocation2 + $0x50] sm:$0xff] }
  0x6c   : > { %5402 = vmatmul.msk.f32.gmra.mxu3 %vm391_vm1, %v6677_v44  ;;  %503 = vst.msk [vmem:[#allocation2 + $0x70] sm:$0xff] %vm391_vm1, %v470_v45  ;;  %v6762_v60 = vld [vmem:[#allocation2 + $0xf0] sm:$0xff] }
  0x6d   : > { %527 = vst.msk [vmem:[#allocation2 + $0x1f0] sm:$0xff] %vm391_vm1, %v494_v46  ;;  %v6766_v61 = vld [vmem:[#allocation2 + $0x168] sm:$0xff] }
  0x6e   : > { %504 = vst.msk [vmem:[#allocation2 + $0x88] sm:$0xff] %vm391_vm1, %v471_v48  ;;  %v6772_v62 = vld [vmem:[#allocation2 + $0x1d0] sm:$0xff] }
  0x6f   : > { %396 = vst.msk [vmem:[#allocation2 + $0x18] sm:$0x1] %vm395_vm2, %v6335_v1  ;;  %v6750_v58 = vld [vmem:[#allocation2 + $0x68] sm:$0xff] }
  0x70   : > { %5380 = vmatmul.msk.f32.gmra.mxu0 %vm391_vm1, %v6691_v47  ;;  %400 = vst.msk [vmem:[#allocation2 + $0x38] sm:$0x1] %vm395_vm2, %v6335_v1  ;;  %v6796_v3 = vld [vmem:[#allocation2 + $0x108] sm:$0xff] }
  0x71   : > { %404 = vst.msk [vmem:[#allocation2 + $0x58] sm:$0x1] %vm395_vm2, %v6335_v1  ;;  %v6798_v4 = vld [vmem:[#allocation2 + $0x170] sm:$0xff]  ;;  %v6858_v23 = vld [vmem:[#allocation2 + $0x67] sm:$0xff] }
  0x72   : > { %5389 = vmatmul.msk.f32.gmra.mxu1 %vm391_vm1, %v6696_v49  ;;  %408 = vst.msk [vmem:[#allocation2 + $0x78] sm:$0x1] %vm395_vm2, %v6335_v1  ;;  %v6801_v5 = vld [vmem:[#allocation2 + $0x1e8] sm:$0xff] }
  0x73   : > { %5396 = vmatmul.msk.f32.gmra.mxu2 %vm391_vm1, %v6698_v50  ;;  %412 = vst.msk [vmem:[#allocation2 + $0x98] sm:$0x1] %vm395_vm2, %v6335_v1  ;;  %v570_v2 = vld [vmem:[#allocation2 + $0x70] sm:$0xff] }
  0x74   : > { %5403 = vmatmul.msk.f32.gmra.mxu3 %vm391_vm1, %v6702_v51  ;;  %416 = vst.msk [vmem:[#allocation2 + $0xb8] sm:$0x1] %vm395_vm2, %v6335_v1  ;;  %v6810_v8 = vld [vmem:[#allocation2 + $0x1f0] sm:$0xff] }
  0x75   : > { %420 = vst.msk [vmem:[#allocation2 + $0xd8] sm:$0x1] %vm395_vm2, %v6335_v1  ;;  %v6823_v13 = vld [vmem:[#allocation2 + $0x29] sm:$0xff] }
  0x76   : > { %424 = vst.msk [vmem:[#allocation2 + $0xf8] sm:$0x1] %vm395_vm2, %v6335_v1  ;;  %v1023_v11 = vld [vmem:[#allocation2 + $0x11] sm:$0xff]  ;;  %v6842_v17 = vld [vmem:[#allocation2 + $0x49] sm:$0xff] }
  0x77   : > { %428 = vst.msk [vmem:[#allocation2 + $0x118] sm:$0x1] %vm395_vm2, %v6335_v1  ;;  %v1301_v14 = vld [vmem:[#allocation2 + $0x2f] sm:$0xff] }
  0x78   : > { %5381 = vmatmul.msk.f32.gmra.mxu0 %vm391_vm1, %v6712_v52  ;;  %432 = vst.msk [vmem:[#allocation2 + $0x138] sm:$0x1] %vm395_vm2, %v6335_v1  ;;  %v6831_v15 = vld [vmem:[#allocation2 + $0x31] sm:$0xff]  ;;  %v6866_v24 = vld [vmem:[#allocation2 + $0x69] sm:$0xff] }
  0x79   : > { %436 = vst.msk [vmem:[#allocation2 + $0x158] sm:$0x1] %vm395_vm2, %v6335_v1  ;;  %v6846_v19 = vld [vmem:[#allocation2 + $0x4f] sm:$0xff] }
  0x7a   : > { %5390 = vmatmul.msk.f32.gmra.mxu1 %vm391_vm1, %v6718_v53  ;;  %440 = vst.msk [vmem:[#allocation2 + $0x178] sm:$0x1] %vm395_vm2, %v6335_v1  ;;  %v6854_v21 = vld [vmem:[#allocation2 + $0x51] sm:$0xff]  ;;  %v6926_v45 = vld [vmem:[#allocation2 + $0xa9] sm:$0xff] }
  0x7b   : > { %5397 = vmatmul.msk.f32.gmra.mxu2 %vm391_vm1, %v6722_v54  ;;  %444 = vst.msk [vmem:[#allocation2 + $0x198] sm:$0x1] %vm395_vm2, %v6335_v1  ;;  %v6870_v25 = vld [vmem:[#allocation2 + $0x6f] sm:$0xff] }
  0x7c   : > { %5404 = vmatmul.msk.f32.gmra.mxu3 %vm391_vm1, %v6728_v55  ;;  %448 = vst.msk [vmem:[#allocation2 + $0x1b8] sm:$0x1] %vm395_vm2, %v6335_v1  ;;  %v6878_v26 = vld [vmem:[#allocation2 + $0x71] sm:$0xff] }
  0x7d   : > { %452 = vst.msk [vmem:[#allocation2 + $0x1d8] sm:$0x1] %vm395_vm2, %v6335_v1  ;;  %v6930_v46 = vld [vmem:[#allocation2 + $0xaf] sm:$0xff] }
  0x7e   : > { %456 = vst.msk [vmem:[#allocation2 + $0x1f8] sm:$0x1] %vm395_vm2, %v6335_v1 }
  0x7f   : > { %460 = vst.msk [vmem:[#allocation2 + $0x218] sm:$0x1] %vm395_vm2, %v6335_v1 }
  0x80   : > { %5382 = vmatmul.msk.f32.gmra.mxu0 %vm391_vm1, %v6750_v58  ;;  %464 = vst.msk [vmem:[#allocation2 + $0x238] sm:$0x1] %vm395_vm2, %v6335_v1  ;;  %v571_v1 = vld [vmem:[#allocation2 + $0x88] sm:$0xff] }
  0x81   : > { %505 = vst.msk [vmem:[#allocation2 + $0x90] sm:$0xff] %vm391_vm1, %v472_v63 }
  0x82   : > { %5391 = vmatmul.msk.f32.gmra.mxu1 %vm391_vm1, %v6762_v60  ;;  %9867 = vst [vmem:[#allocation13_spill] sm:$0xff] %v6926_v45 }
  0x83   : > { %5398 = vmatmul.msk.f32.gmra.mxu2 %vm391_vm1, %v6766_v61  ;;  %9868 = vst [vmem:[#allocation14_spill] sm:$0xff] %v6930_v46 }
  0x84   : > { %5405 = vmatmul.msk.f32.gmra.mxu3 %vm391_vm1, %v6772_v62  ;;  %9871 = vst [vmem:[#allocation17_spill] sm:$0xff] %v6950_v57 }
  0x88   : > { %5383 = vmatmul.msk.f32.gmra.mxu0 %vm391_vm1, %v570_v2  ;;  %v6816_v9 = vld [vmem:[#allocation2 + $0x90] sm:$0xff] }
  0x89   : > { %9863 = vst [vmem:[#allocation9_spill] sm:$0xff] %v6816_v9  ;;  %v6891_v31 = vld [vmem:[#allocation2 + $0x89] sm:$0xff]  ;;  %v6906_v36 = vld [vmem:[#allocation2 + $0x91] sm:$0xff] }
  0x8a   : > { %5392 = vmatmul.msk.f32.gmra.mxu1 %vm391_vm1, %v6796_v3  ;;  %v6894_v33 = vld [vmem:[#allocation2 + $0x8f] sm:$0xff]  ;;  %9864 = vst [vmem:[#allocation10_spill] sm:$0xff] %v6906_v36 }
  0x8b   : > { %5399 = vmatmul.msk.f32.gmra.mxu2 %vm391_vm1, %v6798_v4 }
  0x8c   : > { %5406 = vmatmul.msk.f32.gmra.mxu3 %vm391_vm1, %v6801_v5 }
  0x90   : > { %5384 = vmatmul.msk.f32.gmra.mxu0 %vm391_vm1, %v571_v1 }
  0x92   : > { %5409 = vmatmul.msk.f32.vlgmr.msrb.gmra.mxu1 %vm391_vm1, %v530_v6 }
  0x93   : > { %5443 = vmatmul.msk.f32.vlgmr.msrb.gmra.mxu2 %vm391_vm1, %v1022_v7 }
  0x94   : > { %5407 = vmatmul.msk.f32.gmra.mxu3 %vm391_vm1, %v6810_v8 }
  0x98   : > { %5385 = vmatmul.msk.f32.gmra.mxu0 %vm391_vm1, %v6816_v9 }
  0x9a   : > { %5410 = vmatmul.msk.f32.gmra.mxu1 %vm391_vm1, %v531_v10 }
  0x9b   : > { %5444 = vmatmul.msk.f32.gmra.mxu2 %vm391_vm1, %v1023_v11  ;;  %v6990_v11 = vld [vmem:[#allocation2 + $0xe7] sm:$0xff] }
  0x9c   : > { %5477 = vmatmul.msk.f32.vlgmr.msrb.gmra.mxu3 %vm391_vm1, %v1300_v12  ;;  %9877 = vst [vmem:[#allocation23_spill] sm:$0xff] %v6990_v11 }
  0xa0   : > { %5511 = vmatmul.msk.f32.vlgmr.msrb.gmra.mxu0 %vm391_vm1, %v6635_v28  ;;  %v6881_v28 = vld [vmem:[#allocation2 + $0x87] sm:$0xff] }
  0xa1   : > { %v6883_v29 = vpop.f32.mrf.mxu0 }
  0xa2   : > { %5411 = vmatmul.msk.f32.gmra.mxu1 %vm391_vm1, %v1300_v12 }
  0xa3   : > { %5445 = vmatmul.msk.f32.gmra.mxu2 %vm391_vm1, %v6823_v13 }
  0xa4   : > { %5478 = vmatmul.msk.f32.gmra.mxu3 %vm391_vm1, %v1301_v14 }
  0xa8   : > { %5512 = vmatmul.msk.f32.gmra.mxu0 %vm391_vm1, %v6661_v37  ;;  %v6910_v37 = vld [vmem:[#allocation2 + $0xa7] sm:$0xff] }
  0xa9   : > { %v6900_v34 = vpop.f32.mrf.mxu0  ;;  %9865 = vst [vmem:[#allocation11_spill] sm:$0xff] %v6910_v37 }
  0xaa   : > { %5412 = vmatmul.msk.f32.gmra.mxu1 %vm391_vm1, %v1301_v14 }
  0xab   : > { %5446 = vmatmul.msk.f32.gmra.mxu2 %vm391_vm1, %v6831_v15 }
  0xac   : > { %5479 = vmatmul.msk.f32.gmra.mxu3 %vm391_vm1, %v6835_v16 }
  0xb0   : > { %5513 = vmatmul.msk.f32.gmra.mxu0 %vm391_vm1, %v6691_v47 }
  0xb2   : > { %5413 = vmatmul.msk.f32.gmra.mxu1 %vm391_vm1, %v6835_v16 }
  0xb3   : > { %5447 = vmatmul.msk.f32.gmra.mxu2 %vm391_vm1, %v6842_v17 }
  0xb4   : > { %5480 = vmatmul.msk.f32.gmra.mxu3 %vm391_vm1, %v6846_v19 }
  0xb8   : > { %5514 = vmatmul.msk.f32.gmra.mxu0 %vm391_vm1, %v6712_v52 }
  0xba   : > { %5414 = vmatmul.msk.f32.gmra.mxu1 %vm391_vm1, %v6846_v19 }
  0xbb   : > { %5448 = vmatmul.msk.f32.gmra.mxu2 %vm391_vm1, %v6854_v21 }
  0xbc   : > { %5481 = vmatmul.msk.f32.gmra.mxu3 %vm391_vm1, %v6858_v23 }
  0xc0   : > { %5515 = vmatmul.msk.f32.gmra.mxu0 %vm391_vm1, %v6750_v58 }
  0xc2   : > { %5415 = vmatmul.msk.f32.gmra.mxu1 %vm391_vm1, %v6858_v23 }
  0xc3   : > { %5449 = vmatmul.msk.f32.gmra.mxu2 %vm391_vm1, %v6866_v24 }
  0xc4   : > { %5482 = vmatmul.msk.f32.gmra.mxu3 %vm391_vm1, %v6870_v25 }
  0xc8   : > { %5516 = vmatmul.msk.f32.gmra.mxu0 %vm391_vm1, %v570_v2  ;;  %v6970_v2 = vld [vmem:[#allocation2 + $0xcf] sm:$0xff] }
  0xc9   : > { %9874 = vst [vmem:[#allocation20_spill] sm:$0xff] %v6970_v2 }
  0xca   : > { %5416 = vmatmul.msk.f32.gmra.mxu1 %vm391_vm1, %v6870_v25 }
  0xcb   : > { %5450 = vmatmul.msk.f32.gmra.mxu2 %vm391_vm1, %v6878_v26 }
  0xcc   : > { %5483 = vmatmul.msk.f32.gmra.mxu3 %vm391_vm1, %v6881_v28 }
  0xd0   : > { %5517 = vmatmul.msk.f32.gmra.mxu0 %vm391_vm1, %v571_v1 }
  0xd2   : > { %5417 = vmatmul.msk.f32.gmra.mxu1 %vm391_vm1, %v6881_v28 }
  0xd3   : > { %5451 = vmatmul.msk.f32.gmra.mxu2 %vm391_vm1, %v6891_v31 }
  0xd4   : > { %5484 = vmatmul.msk.f32.gmra.mxu3 %vm391_vm1, %v6894_v33 }
  0xd7   : > { %v6904_v35 = vpop.f32.mrf.mxu1 }
  0xd8   : > { %5518 = vmatmul.msk.f32.gmra.mxu0 %vm391_vm1, %v6816_v9 }
  0xda   : > { %5418 = vmatmul.msk.f32.gmra.mxu1 %vm391_vm1, %v6894_v33 }
  0xdb   : > { %5452 = vmatmul.msk.f32.gmra.mxu2 %vm391_vm1, %v6906_v36 }
  0xdc   : > { %5485 = vmatmul.msk.f32.gmra.mxu3 %vm391_vm1, %v6910_v37 }
  0xdd   : > { %v6918_v38 = vpop.f32.mrf.mxu0 }
  0xde   : > { %v6920_v39 = vpop.f32.mrf.mxu2 }
  0xdf   : > { %v6922_v41 = vpop.f32.mrf.mxu3  ;;  %v6924_v43 = vpop.f32.mrf.mxu1 }
  0xe0   : > { %9866 = vst [vmem:[#allocation12_spill] sm:$0xff] %v6922_v41  ;;  %5519 = vmatmul.msk.f32.gmra.mxu0 %vm391_vm1, %v6609_v18  ;;  %v6946_v18 = vld [vmem:[#allocation2 + $0xb1] sm:$0xff] }
  0xe1   : > { %9870 = vst [vmem:[#allocation16_spill] sm:$0xff] %v6946_v18 }
  0xe2   : > { %5419 = vmatmul.msk.f32.gmra.mxu1 %vm391_vm1, %v6910_v37  ;;  %v7074_v37 = vld [vmem:[#allocation2 + $0x129] sm:$0xff] }
  0xe3   : > { %5453 = vmatmul.msk.f32.gmra.mxu2 %vm391_vm1, %v6926_v45  ;;  %v7060_v45 = vld [vmem:[#allocation2 + $0x111] sm:$0xff] }
  0xe4   : > { %5486 = vmatmul.msk.f32.gmra.mxu3 %vm391_vm1, %v6930_v46  ;;  %9890 = vst [vmem:[#allocation36_spill] sm:$0xff] %v7060_v45 }
  0xe5   : > { %v6938_v47 = vpop.f32.mrf.mxu0 }
  0xe6   : > { %v6940_v48 = vpop.f32.mrf.mxu2 }
  0xe7   : > { %v6942_v52 = vpop.f32.mrf.mxu3  ;;  %v6944_v56 = vpop.f32.mrf.mxu1 }
  0xe8   : > { %9869 = vst [vmem:[#allocation15_spill] sm:$0xff] %v6942_v52  ;;  %5520 = vmatmul.msk.f32.gmra.mxu0 %vm391_vm1, %v6633_v27  ;;  %v6966_v27 = vld [vmem:[#allocation2 + $0xc9] sm:$0xff] }
  0xe9   : > { %9873 = vst [vmem:[#allocation19_spill] sm:$0xff] %v6966_v27  ;;  %v7010_v52 = vld [vmem:[#allocation2 + $0xef] sm:$0xff] }
  0xea   : > { %5420 = vmatmul.msk.f32.gmra.mxu1 %vm391_vm1, %v6930_v46  ;;  %9881 = vst [vmem:[#allocation27_spill] sm:$0xff] %v7010_v52 }
  0xeb   : > { %5454 = vmatmul.msk.f32.gmra.mxu2 %vm391_vm1, %v6946_v18 }
  0xec   : > { %5487 = vmatmul.msk.f32.gmra.mxu3 %vm391_vm1, %v6950_v57 }
  0xed   : > { %v6958_v58 = vpop.f32.mrf.mxu0 }
  0xee   : > { %v6960_v59 = vpop.f32.mrf.mxu2 }
  0xef   : > { %v6962_v63 = vpop.f32.mrf.mxu3  ;;  %v6964_v0 = vpop.f32.mrf.mxu1 }
  0xf0   : > { %9872 = vst [vmem:[#allocation18_spill] sm:$0xff] %v6962_v63  ;;  %5521 = vmatmul.msk.f32.gmra.mxu0 %vm391_vm1, %v6667_v40  ;;  %v6986_v40 = vld [vmem:[#allocation2 + $0xd1] sm:$0xff] }
  0xf1   : > { %9876 = vst [vmem:[#allocation22_spill] sm:$0xff] %v6986_v40 }
  0xf2   : > { %5421 = vmatmul.msk.f32.gmra.mxu1 %vm391_vm1, %v6950_v57  ;;  %v7044_v57 = vld [vmem:[#allocation2 + $0x109] sm:$0xff] }
  0xf3   : > { %5455 = vmatmul.msk.f32.gmra.mxu2 %vm391_vm1, %v6966_v27  ;;  %9888 = vst [vmem:[#allocation34_spill] sm:$0xff] %v7044_v57 }
  0xf4   : > { %5488 = vmatmul.msk.f32.gmra.mxu3 %vm391_vm1, %v6970_v2 }
  0xf5   : > { %v6978_v1 = vpop.f32.mrf.mxu0 }
  0xf6   : > { %v6980_v6 = vpop.f32.mrf.mxu2 }
  0xf7   : > { %v6982_v7 = vpop.f32.mrf.mxu3  ;;  %v6984_v10 = vpop.f32.mrf.mxu1 }
  0xf8   : > { %9875 = vst [vmem:[#allocation21_spill] sm:$0xff] %v6982_v7  ;;  %5522 = vmatmul.msk.f32.gmra.mxu0 %vm391_vm1, %v6696_v49  ;;  %v7006_v49 = vld [vmem:[#allocation2 + $0xe9] sm:$0xff] }
  0xf9   : > { %9880 = vst [vmem:[#allocation26_spill] sm:$0xff] %v7006_v49 }
  0xfa   : > { %5422 = vmatmul.msk.f32.gmra.mxu1 %vm391_vm1, %v6970_v2 }
  0xfb   : > { %5456 = vmatmul.msk.f32.gmra.mxu2 %vm391_vm1, %v6986_v40 }
  0xfc   : > { %5489 = vmatmul.msk.f32.gmra.mxu3 %vm391_vm1, %v6990_v11 }
  0xfd   : > { %v6998_v12 = vpop.f32.mrf.mxu0 }
  0xfe   : > { %v7000_v14 = vpop.f32.mrf.mxu2 }
  0xff   : > { %9878 = vst [vmem:[#allocation24_spill] sm:$0xff] %v7000_v14  ;;  %v7002_v7 = vpop.f32.mrf.mxu3  ;;  %v7004_v63 = vpop.f32.mrf.mxu1 }
 0x100   : > { %9879 = vst [vmem:[#allocation25_spill] sm:$0xff] %v7002_v7  ;;  %5523 = vmatmul.msk.f32.gmra.mxu0 %vm391_vm1, %v6718_v53  ;;  %v7026_v53 = vld [vmem:[#allocation2 + $0xf1] sm:$0xff] }
 0x101   : > { %9884 = vst [vmem:[#allocation30_spill] sm:$0xff] %v7026_v53 }
 0x102   : > { %5423 = vmatmul.msk.f32.gmra.mxu1 %vm391_vm1, %v6990_v11  ;;  %v7030_v11 = vld [vmem:[#allocation2 + $0x107] sm:$0xff] }
 0x103   : > { %5457 = vmatmul.msk.f32.gmra.mxu2 %vm391_vm1, %v7006_v49  ;;  %9885 = vst [vmem:[#allocation31_spill] sm:$0xff] %v7030_v11 }
 0x104   : > { %5490 = vmatmul.msk.f32.gmra.mxu3 %vm391_vm1, %v7010_v52 }
 0x105   : > { %v7018_v40 = vpop.f32.mrf.mxu0 }
 0x106   : > { %v7020_v7 = vpop.f32.mrf.mxu2 }
 0x107   : > { %9882 = vst [vmem:[#allocation28_spill] sm:$0xff] %v7020_v7  ;;  %v7022_v27 = vpop.f32.mrf.mxu3  ;;  %v7024_v41 = vpop.f32.mrf.mxu1 }
 0x108   : > { %9883 = vst [vmem:[#allocation29_spill] sm:$0xff] %v7022_v27  ;;  %5524 = vmatmul.msk.f32.gmra.mxu0 %vm391_vm1, %v6762_v60  ;;  %v7048_v60 = vld [vmem:[#allocation2 + $0x10f] sm:$0xff] }
 0x10a   : > { %5424 = vmatmul.msk.f32.gmra.mxu1 %vm391_vm1, %v7010_v52 }
 0x10b   : > { %5458 = vmatmul.msk.f32.gmra.mxu2 %vm391_vm1, %v7026_v53 }
 0x10c   : > { %5491 = vmatmul.msk.f32.gmra.mxu3 %vm391_vm1, %v7030_v11 }
 0x10d   : > { %v7038_v49 = vpop.f32.mrf.mxu0 }
 0x10e   : > { %v7040_v27 = vpop.f32.mrf.mxu2 }
 0x10f   : > { %9886 = vst [vmem:[#allocation32_spill] sm:$0xff] %v7040_v27  ;;  %v7042_v2 = vpop.f32.mrf.mxu3  ;;  %v926_v18 = vpop.f32.mrf.mxu1 }
 0x110   : > { %9887 = vst [vmem:[#allocation33_spill] sm:$0xff] %v7042_v2  ;;  %5525 = vmatmul.msk.f32.gmra.mxu0 %vm391_vm1, %v6796_v3  ;;  %v7064_v3 = vld [vmem:[#allocation2 + $0x127] sm:$0xff] }
 0x112   : > { %5425 = vmatmul.msk.f32.gmra.mxu1 %vm391_vm1, %v7030_v11 }
 0x113   : > { %5459 = vmatmul.msk.f32.gmra.mxu2 %vm391_vm1, %v7044_v57  ;;  %v927_v57 = vadd.f32 %v926_v18, %v6883_v29 }
 0x114   : > { %5492 = vmatmul.msk.f32.gmra.mxu3 %vm391_vm1, %v7048_v60 }
 0x115   : > { %v7056_v53 = vpop.f32.mrf.mxu0 }
 0x116   : > { %v1172_v2 = vpop.f32.mrf.mxu2 }
 0x117   : > { %v7058_v52 = vpop.f32.mrf.mxu3  ;;  %v929_v27 = vpop.f32.mrf.mxu1  ;;  %v1268_v7 = vadd.f32 %v1172_v2, %v927_v57  ;;  %v7089_v2 = vld [vmem:[#allocation2 + $0x131] sm:$0xff] }
 0x118   : > { %9889 = vst [vmem:[#allocation35_spill] sm:$0xff] %v7058_v52  ;;  %5526 = vmatmul.msk.f32.gmra.mxu0 %vm391_vm1, %v6615_v20  ;;  %v930_v52 = vadd.f32 %v929_v27, %v6900_v34 }
 0x11a   : > { %5426 = vmatmul.msk.f32.gmra.mxu1 %vm391_vm1, %v7048_v60 }
 0x11b   : > { %5460 = vmatmul.msk.f32.gmra.mxu2 %vm391_vm1, %v7060_v45  ;;  %v7078_v45 = vld [vmem:[#allocation2 + $0x12f] sm:$0xff] }
 0x11c   : > { %5493 = vmatmul.msk.f32.gmra.mxu3 %vm391_vm1, %v7064_v3 }
 0x11d   : > { %v1728_v11 = vpop.f32.mrf.mxu0 }
 0x11e   : > { %v1175_v46 = vpop.f32.mrf.mxu2 }
 0x11f   : > { %v1269_v36 = vadd.f32 %v1175_v46, %v930_v52  ;;  %v1450_v20 = vpop.f32.mrf.mxu3  ;;  %v932_v9 = vpop.f32.mrf.mxu1 }
 0x120   : > { %v1546_v14 = vadd.f32 %v1450_v20, %v1268_v7  ;;  %5527 = vmatmul.msk.f32.gmra.mxu0 %vm391_vm1, %v6639_v30  ;;  %v933_v34 = vadd.f32 %v932_v9, %v6918_v38  ;;  %v7093_v7 = vld [vmem:[#allocation2 + $0x147] sm:$0xff] }
 0x122   : > { %v7080_v29 = vadd.f32 %v1728_v11, %v1546_v14  ;;  %5427 = vmatmul.msk.f32.gmra.mxu1 %vm391_vm1, %v7064_v3 }
 0x123   : > { %5461 = vmatmul.msk.f32.gmra.mxu2 %vm391_vm1, %v7074_v37 }
 0x124   : > { %5494 = vmatmul.msk.f32.gmra.mxu3 %vm391_vm1, %v7078_v45 }
 0x125   : > { %v1731_v46 = vpop.f32.mrf.mxu0 }
 0x126   : > { %v1178_v52 = vpop.f32.mrf.mxu2 }
 0x127   : > { %v1270_v18 = vadd.f32 %v1178_v52, %v933_v34  ;;  %v1453_v57 = vpop.f32.mrf.mxu3  ;;  %v935_v30 = vpop.f32.mrf.mxu1  ;;  %v7104_v52 = vld [vmem:[#allocation2 + $0x149] sm:$0xff] }
 0x128   : > { %v1547_v27 = vadd.f32 %v1453_v57, %v1269_v36  ;;  %5528 = vmatmul.msk.f32.gmra.mxu0 %vm391_vm1, %v6671_v42  ;;  %v936_v9 = vadd.f32 %v935_v30, %v6938_v47 }
 0x12a   : > { %v7095_v11 = vadd.f32 %v1731_v46, %v1547_v27  ;;  %5428 = vmatmul.msk.f32.gmra.mxu1 %vm391_vm1, %v7078_v45  ;;  %v7108_v46 = vld [vmem:[#allocation2 + $0x14f] sm:$0xff] }
 0x12b   : > { %5462 = vmatmul.msk.f32.gmra.mxu2 %vm391_vm1, %v7089_v2 }
 0x12c   : > { %5495 = vmatmul.msk.f32.gmra.mxu3 %vm391_vm1, %v7093_v7 }
 0x12d   : > { %v1734_v36 = vpop.f32.mrf.mxu0 }
 0x12e   : > { %v1181_v38 = vpop.f32.mrf.mxu2 }
 0x12f   : > { %v1271_v14 = vadd.f32 %v1181_v38, %v936_v9  ;;  %v1456_v20 = vpop.f32.mrf.mxu3  ;;  %v938_v42 = vpop.f32.mrf.mxu1 }
 0x130   : > { %v1548_v34 = vadd.f32 %v1456_v20, %v1270_v18  ;;  %5529 = vmatmul.msk.f32.gmra.mxu0 %vm391_vm1, %v6698_v50  ;;  %v939_v47 = vadd.f32 %v938_v42, %v6958_v58  ;;  %v7119_v20 = vld [vmem:[#allocation2 + $0x151] sm:$0xff] }
 0x132   : > { %v7110_v57 = vadd.f32 %v1734_v36, %v1548_v34  ;;  %5429 = vmatmul.msk.f32.gmra.mxu1 %vm391_vm1, %v7093_v7  ;;  %v7123_v36 = vld [vmem:[#allocation2 + $0x167] sm:$0xff] }
 0x133   : > { %5463 = vmatmul.msk.f32.gmra.mxu2 %vm391_vm1, %v7104_v52 }
 0x134   : > { %9891 = vst [vmem:[#allocation37_spill] sm:$0xff] %v7110_v57  ;;  %5496 = vmatmul.msk.f32.gmra.mxu3 %vm391_vm1, %v7108_v46  ;;  %v7134_v57 = vld [vmem:[#allocation2 + $0x169] sm:$0xff] }
 0x135   : > { %v1737_v18 = vpop.f32.mrf.mxu0 }
 0x136   : > { %v1184_v30 = vpop.f32.mrf.mxu2 }
 0x137   : > { %v1272_v27 = vadd.f32 %v1184_v30, %v939_v47  ;;  %v1459_v9 = vpop.f32.mrf.mxu3  ;;  %v941_v50 = vpop.f32.mrf.mxu1 }
 0x138   : > { %v1549_v38 = vadd.f32 %v1459_v9, %v1271_v14  ;;  %5530 = vmatmul.msk.f32.gmra.mxu0 %vm391_vm1, %v6722_v54  ;;  %v942_v58 = vadd.f32 %v941_v50, %v6978_v1 }
 0x13a   : > { %v7125_v34 = vadd.f32 %v1737_v18, %v1549_v38  ;;  %5430 = vmatmul.msk.f32.gmra.mxu1 %vm391_vm1, %v7108_v46  ;;  %v7138_v18 = vld [vmem:[#allocation2 + $0x16f] sm:$0xff] }
 0x13b   : > { %5464 = vmatmul.msk.f32.gmra.mxu2 %vm391_vm1, %v7119_v20 }
 0x13c   : > { %9892 = vst [vmem:[#allocation38_spill] sm:$0xff] %v7125_v34  ;;  %5497 = vmatmul.msk.f32.gmra.mxu3 %vm391_vm1, %v7123_v36  ;;  %v7149_v34 = vld [vmem:[#allocation2 + $0x171] sm:$0xff] }
 0x13d   : > { %v1740_v14 = vpop.f32.mrf.mxu0  ;;  %9894 = vst [vmem:[#allocation40_spill] sm:$0xff] %v7149_v34 }
 0x13e   : > { %v1187_v42 = vpop.f32.mrf.mxu2 }
 0x13f   : > { %v1273_v47 = vadd.f32 %v1187_v42, %v942_v58  ;;  %v1462_v30 = vpop.f32.mrf.mxu3  ;;  %v944_v54 = vpop.f32.mrf.mxu1 }
 0x140   : > { %v1550_v9 = vadd.f32 %v1462_v30, %v1272_v27  ;;  %5531 = vmatmul.msk.f32.gmra.mxu0 %vm391_vm1, %v6766_v61  ;;  %v945_v1 = vadd.f32 %v944_v54, %v6998_v12 }
 0x142   : > { %v7140_v38 = vadd.f32 %v1740_v14, %v1550_v9  ;;  %5431 = vmatmul.msk.f32.gmra.mxu1 %vm391_vm1, %v7123_v36  ;;  %v7153_v14 = vld [vmem:[#allocation2 + $0x187] sm:$0xff] }
 0x143   : > { %5465 = vmatmul.msk.f32.gmra.mxu2 %vm391_vm1, %v7134_v57 }
 0x144   : > { %9893 = vst [vmem:[#allocation39_spill] sm:$0xff] %v7140_v38  ;;  %5498 = vmatmul.msk.f32.gmra.mxu3 %vm391_vm1, %v7138_v18  ;;  %v1046_v38 = vld [vmem:[#allocation2 + $0x189] sm:$0xff] }
 0x145   : > { %v1743_v27 = vpop.f32.mrf.mxu0 }
 0x146   : > { %v1190_v50 = vpop.f32.mrf.mxu2 }
 0x147   : > { %v1274_v58 = vadd.f32 %v1190_v50, %v945_v1  ;;  %v1465_v42 = vpop.f32.mrf.mxu3  ;;  %v947_v61 = vpop.f32.mrf.mxu1 }
 0x148   : > { %v1551_v30 = vadd.f32 %v1465_v42, %v1273_v47  ;;  %5532 = vmatmul.msk.f32.gmra.mxu0 %vm391_vm1, %v6798_v4  ;;  %v948_v12 = vadd.f32 %v947_v61, %v7018_v40 }
 0x14a   : > { %v7155_v9 = vadd.f32 %v1743_v27, %v1551_v30  ;;  %5432 = vmatmul.msk.f32.gmra.mxu1 %vm391_vm1, %v7138_v18  ;;  %v7166_v27 = vld [vmem:[#allocation2 + $0x18f] sm:$0xff] }
 0x14b   : > { %5466 = vmatmul.msk.f32.gmra.mxu2 %vm391_vm1, %v7149_v34  ;;  %v1047_v34 = vld [vmem:[#allocation2 + $0x191] sm:$0xff] }
 0x14c   : > { %5499 = vmatmul.msk.f32.gmra.mxu3 %vm391_vm1, %v7153_v14 }
 0x14d   : > { %v1746_v47 = vpop.f32.mrf.mxu0 }
 0x14e   : > { %v1193_v54 = vpop.f32.mrf.mxu2 }
 0x14f   : > { %v1275_v1 = vadd.f32 %v1193_v54, %v948_v12  ;;  %v1468_v50 = vpop.f32.mrf.mxu3  ;;  %v950_v4 = vpop.f32.mrf.mxu1 }
 0x150   : > { %v1552_v42 = vadd.f32 %v1468_v50, %v1274_v58  ;;  %5533 = vmatmul.msk.f32.gmra.mxu0 %vm391_vm1, %v6621_v22  ;;  %v951_v40 = vadd.f32 %v950_v4, %v7038_v49 }
 0x152   : > { %v7168_v30 = vadd.f32 %v1746_v47, %v1552_v42  ;;  %5433 = vmatmul.msk.f32.gmra.mxu1 %vm391_vm1, %v7153_v14  ;;  %v7178_v47 = vld [vmem:[#allocation2 + $0x1a7] sm:$0xff] }
 0x153   : > { %5467 = vmatmul.msk.f32.gmra.mxu2 %vm391_vm1, %v1046_v38 }
 0x154   : > { %5500 = vmatmul.msk.f32.gmra.mxu3 %vm391_vm1, %v7166_v27 }
 0x155   : > { %v1749_v61 = vpop.f32.mrf.mxu0 }
 0x156   : > { %v1196_v58 = vpop.f32.mrf.mxu2 }
 0x157   : > { %v1276_v12 = vadd.f32 %v1196_v58, %v951_v40  ;;  %v1471_v54 = vpop.f32.mrf.mxu3  ;;  %v953_v50 = vpop.f32.mrf.mxu1 }
 0x158   : > { %v1553_v22 = vadd.f32 %v1471_v54, %v1275_v1  ;;  %5534 = vmatmul.msk.f32.gmra.mxu0 %vm391_vm1, %v6645_v32  ;;  %v954_v49 = vadd.f32 %v953_v50, %v7056_v53  ;;  %v1048_v54 = vld [vmem:[#allocation2 + $0x1a9] sm:$0xff] }
 0x159   : > { %v495_v53 = vld [vmem:[%s6580_s28 + $0xf0] sm:$0xff] }
 0x15a   : > { %v7180_v42 = vadd.f32 %v1749_v61, %v1553_v22  ;;  %5434 = vmatmul.msk.f32.gmra.mxu1 %vm391_vm1, %v7166_v27  ;;  %v7190_v61 = vld [vmem:[#allocation2 + $0x1af] sm:$0xff]  ;;  %528 = vst.msk [vmem:[#allocation2 + $0x208] sm:$0xff] %vm391_vm1, %v495_v53 }
 0x15b   : > { %5468 = vmatmul.msk.f32.gmra.mxu2 %vm391_vm1, %v1047_v34 }
 0x15c   : > { %9895 = vst [vmem:[#allocation41_spill] sm:$0xff] %v7180_v42  ;;  %5501 = vmatmul.msk.f32.gmra.mxu3 %vm391_vm1, %v7178_v47 }
 0x15d   : > { %v1752_v38 = vpop.f32.mrf.mxu0 }
 0x15e   : > { %v1199_v1 = vpop.f32.mrf.mxu2 }
 0x15f   : > { %v1277_v4 = vadd.f32 %v1199_v1, %v954_v49  ;;  %v1474_v40 = vpop.f32.mrf.mxu3  ;;  %v956_v32 = vpop.f32.mrf.mxu1  ;;  %v1049_v1 = vld [vmem:[#allocation2 + $0x1b1] sm:$0xff] }
 0x160   : > { %v1554_v58 = vadd.f32 %v1474_v40, %v1276_v12  ;;  %5535 = vmatmul.msk.f32.gmra.mxu0 %vm391_vm1, %v6677_v44 }
 0x162   : > { %v7192_v22 = vadd.f32 %v1752_v38, %v1554_v58  ;;  %5435 = vmatmul.msk.f32.gmra.mxu1 %vm391_vm1, %v7178_v47  ;;  %v1326_v38 = vld [vmem:[#allocation2 + $0x1c7] sm:$0xff]  ;;  %v496_v58 = vld [vmem:[%s6580_s28 + $0xf8] sm:$0xff]  ;;  %s10204_s28 = scalar_lea.vmem %s9802_s5, %s6558_s21 }
 0x163   : > { %5469 = vmatmul.msk.f32.gmra.mxu2 %vm391_vm1, %v1048_v54  ;;  %v957_v54 = vadd.f32 %v956_v32, %v6904_v35  ;;  %529 = vst.msk [vmem:[#allocation2 + $0x210] sm:$0xff] %vm391_vm1, %v496_v58 }
 0x164   : > { %9896 = vst [vmem:[#allocation42_spill] sm:$0xff] %v7192_v22  ;;  %5502 = vmatmul.msk.f32.gmra.mxu3 %vm391_vm1, %v7190_v61 }
 0x165   : > { %v1755_v34 = vpop.f32.mrf.mxu0 }
 0x166   : > { %v1202_v12 = vpop.f32.mrf.mxu2 }
 0x167   : > { %v1477_v50 = vpop.f32.mrf.mxu3  ;;  %v959_v44 = vpop.f32.mrf.mxu1  ;;  %v1278_v53 = vadd.f32 %v1202_v12, %v957_v54 }
 0x168   : > { %v1555_v49 = vadd.f32 %v1477_v50, %v1277_v4  ;;  %5536 = vmatmul.msk.f32.gmra.mxu0 %vm391_vm1, %v6702_v51  ;;  %v960_v35 = vadd.f32 %v959_v44, %v6924_v43 }
 0x16a   : > { %v7203_v40 = vadd.f32 %v1755_v34, %v1555_v49  ;;  %5436 = vmatmul.msk.f32.gmra.mxu1 %vm391_vm1, %v7190_v61  ;;  %v1050_v34 = vld [vmem:[#allocation2 + $0x1c9] sm:$0xff] }
 0x16b   : > { %5470 = vmatmul.msk.f32.gmra.mxu2 %vm391_vm1, %v1049_v1  ;;  %v1327_v49 = vld [vmem:[#allocation2 + $0x1cf] sm:$0xff] }
 0x16c   : > { %9897 = vst [vmem:[#allocation43_spill] sm:$0xff] %v7203_v40  ;;  %5503 = vmatmul.msk.f32.gmra.mxu3 %vm391_vm1, %v1326_v38 }
 0x16d   : > { %v1758_v4 = vpop.f32.mrf.mxu0 }
 0x16e   : > { %v1205_v50 = vpop.f32.mrf.mxu2 }
 0x16f   : > { %v1480_v22 = vpop.f32.mrf.mxu3  ;;  %v962_v51 = vpop.f32.mrf.mxu1  ;;  %v1279_v12 = vadd.f32 %v1205_v50, %v960_v35 }
 0x170   : > { %v1556_v42 = vadd.f32 %v1480_v22, %v1278_v53  ;;  %5537 = vmatmul.msk.f32.gmra.mxu0 %vm391_vm1, %v6728_v55  ;;  %v1051_v53 = vld [vmem:[#allocation2 + $0x1d1] sm:$0xff]  ;;  %v1328_v55 = vld [vmem:[#allocation2 + $0x1e7] sm:$0xff]  ;;  %v963_v43 = vadd.f32 %v962_v51, %v6944_v56 }
 0x172   : > { %v7214_v40 = vadd.f32 %v1758_v4, %v1556_v42  ;;  %5437 = vmatmul.msk.f32.gmra.mxu1 %vm391_vm1, %v1326_v38 }
 0x173   : > { %5471 = vmatmul.msk.f32.gmra.mxu2 %vm391_vm1, %v1050_v34 }
 0x174   : > { %5504 = vmatmul.msk.f32.gmra.mxu3 %vm391_vm1, %v1327_v49 }
 0x175   : > { %v1761_v32 = vpop.f32.mrf.mxu0 }
 0x176   : > { %v1208_v1 = vpop.f32.mrf.mxu2 }
 0x177   : > { %v1483_v58 = vpop.f32.mrf.mxu3  ;;  %v965_v22 = vpop.f32.mrf.mxu1  ;;  %v1280_v38 = vadd.f32 %v1208_v1, %v963_v43  ;;  %v1053_v43 = vld [vmem:[#allocation2 + $0x1f1] sm:$0xff] }
 0x178   : > { %v1557_v54 = vadd.f32 %v1483_v58, %v1279_v12  ;;  %5538 = vmatmul.msk.f32.gmra.mxu0 %vm391_vm1, %v6772_v62  ;;  %v1052_v12 = vld [vmem:[#allocation2 + $0x1e9] sm:$0xff]  ;;  %v966_v56 = vadd.f32 %v965_v22, %v6964_v0 }
 0x179   : > { %v1329_v62 = vld [vmem:[#allocation2 + $0x1ef] sm:$0xff] }
 0x17a   : > { %v7222_v42 = vadd.f32 %v1761_v32, %v1557_v54  ;;  %5438 = vmatmul.msk.f32.gmra.mxu1 %vm391_vm1, %v1327_v49 }
 0x17b   : > { %5472 = vmatmul.msk.f32.gmra.mxu2 %vm391_vm1, %v1051_v53 }
 0x17c   : > { %5505 = vmatmul.msk.f32.gmra.mxu3 %vm391_vm1, %v1328_v55 }
 0x17d   : > { %v1764_v44 = vpop.f32.mrf.mxu0 }
 0x17e   : > { %v1211_v4 = vpop.f32.mrf.mxu2 }
 0x17f   : > { %v1486_v50 = vpop.f32.mrf.mxu3  ;;  %v968_v34 = vpop.f32.mrf.mxu1  ;;  %v1281_v49 = vadd.f32 %v1211_v4, %v966_v56 }
 0x180   : > { %v1558_v35 = vadd.f32 %v1486_v50, %v1280_v38  ;;  %5539 = vmatmul.msk.f32.gmra.mxu0 %vm391_vm1, %v6801_v5  ;;  %v1330_v5 = vld [vmem:[#allocation2 + $0x207] sm:$0xff]  ;;  %v969_v0 = vadd.f32 %v968_v34, %v6984_v10 }
 0x182   : > { %v7230_v32 = vadd.f32 %v1764_v44, %v1558_v35  ;;  %5439 = vmatmul.msk.f32.gmra.mxu1 %vm391_vm1, %v1328_v55  ;;  %v1608_v55 = vld [vmem:[#allocation2 + $0x208] sm:$0xff] }
 0x183   : > { %5473 = vmatmul.msk.f32.gmra.mxu2 %vm391_vm1, %v1052_v12 }
 0x184   : > { %5506 = vmatmul.msk.f32.gmra.mxu3 %vm391_vm1, %v1329_v62 }
 0x185   : > { %v1767_v51 = vpop.f32.mrf.mxu0 }
 0x186   : > { %v1214_v1 = vpop.f32.mrf.mxu2 }
 0x187   : > { %v1489_v58 = vpop.f32.mrf.mxu3  ;;  %v971_v54 = vpop.f32.mrf.mxu1  ;;  %v1282_v38 = vadd.f32 %v1214_v1, %v969_v0 }
 0x188   : > { %v1559_v53 = vadd.f32 %v1489_v58, %v1281_v49  ;;  %5540 = vmatmul.msk.f32.gmra.mxu0 %vm391_vm1, %v6810_v8  ;;  %v1331_v8 = vld [vmem:[#allocation2 + $0x20f] sm:$0xff]  ;;  %v972_v10 = vadd.f32 %v971_v54, %v7004_v63 }
 0x18a   : > { %v7238_v44 = vadd.f32 %v1767_v51, %v1559_v53  ;;  %5440 = vmatmul.msk.f32.gmra.mxu1 %vm391_vm1, %v1329_v62  ;;  %v1609_v62 = vld [vmem:[#allocation2 + $0x210] sm:$0xff] }
 0x18b   : > { %5474 = vmatmul.msk.f32.gmra.mxu2 %vm391_vm1, %v1053_v43  ;;  %v2413_v43 = vld [vmem:[#allocation2 + $0x48] sm:$0xff] }
 0x18c   : > { %5507 = vmatmul.msk.f32.gmra.mxu3 %vm391_vm1, %v1330_v5 }
 0x18d   : > { %v1770_v22 = vpop.f32.mrf.mxu0 }
 0x18e   : > { %v1217_v4 = vpop.f32.mrf.mxu2 }
 0x18f   : > { %v1492_v50 = vpop.f32.mrf.mxu3  ;;  %v974_v35 = vpop.f32.mrf.mxu1  ;;  %v1283_v51 = vadd.f32 %v1217_v4, %v972_v10  ;;  %v2415_v10 = vld [vmem:[#allocation2 + $0x68] sm:$0xff] }
 0x190   : > { %v1560_v12 = vadd.f32 %v1492_v50, %v1282_v38  ;;  %5541 = vmatmul.msk.f32.gmra.mxu0 %vm391_vm1, %v1608_v55  ;;  %v2414_v38 = vld [vmem:[#allocation2 + $0x50] sm:$0xff] }
 0x192   : > { %v7245_v56 = vadd.f32 %v1770_v22, %v1560_v12  ;;  %5545 = vmatmul.msk.f32.vlgmr.msra.gmra.mxu1 %vm391_vm1, %v6823_v13  ;;  %v975_v13 = vadd.f32 %v974_v35, %v7024_v41 }
 0x193   : > { %5579 = vmatmul.msk.f32.vlgmr.msra.gmra.mxu2 %vm391_vm1, %v6835_v16 }
 0x194   : > { %5508 = vmatmul.msk.f32.gmra.mxu3 %vm391_vm1, %v1331_v8 }
 0x195   : > { %v1773_v34 = vpop.f32.mrf.mxu0 }
 0x196   : > { %v1220_v49 = vpop.f32.mrf.mxu2 }
 0x197   : > { %v1495_v1 = vpop.f32.mrf.mxu3  ;;  %v977_v58 = vpop.f32.mrf.mxu1  ;;  %v1284_v63 = vadd.f32 %v1220_v49, %v975_v13 }
 0x198   : > { %v1561_v53 = vadd.f32 %v1495_v1, %v1283_v51  ;;  %5542 = vmatmul.msk.f32.gmra.mxu0 %vm391_vm1, %v1609_v62 }
 0x19a   : > { %v7254_v5 = vadd.f32 %v1773_v34, %v1561_v53  ;;  %5546 = vmatmul.msk.f32.gmra.mxu1 %vm391_vm1, %v6831_v15  ;;  %v978_v15 = vadd.f32 %v977_v58, %v6920_v39  ;;  %v2416_v58 = vld [vmem:[#allocation2 + $0x70] sm:$0xff] }
 0x19b   : > { %5580 = vmatmul.msk.f32.gmra.mxu2 %vm391_vm1, %v6846_v19 }
 0x19c   : > { %5613 = vmatmul.msk.f32.vlgmr.msra.gmra.mxu3 %vm391_vm1, %v2413_v43 }
 0x19d   : > { %v1776_v16 = vpop.f32.mrf.mxu0 }
 0x19e   : > { %v1223_v54 = vpop.f32.mrf.mxu2 }
 0x19f   : > { %v1498_v0 = vpop.f32.mrf.mxu3  ;;  %v980_v22 = vpop.f32.mrf.mxu1  ;;  %v1285_v41 = vadd.f32 %v1223_v54, %v978_v15  ;;  %v2417_v54 = vld [vmem:[#allocation2 + $0x88] sm:$0xff] }
 0x1a0   : > { %v1562_v55 = vadd.f32 %v1498_v0, %v1284_v63  ;;  %5647 = vmatmul.msk.f32.vlgmr.msra.gmra.mxu0 %vm391_vm1, %v6842_v17 }
 0x1a2   : > { %v7264_v4 = vadd.f32 %v1776_v16, %v1562_v55  ;;  %5547 = vmatmul.msk.f32.gmra.mxu1 %vm391_vm1, %v6842_v17  ;;  %v981_v17 = vadd.f32 %v980_v22, %v6940_v48 }
 0x1a3   : > { %5581 = vmatmul.msk.f32.gmra.mxu2 %vm391_vm1, %v6858_v23 }
 0x1a4   : > { %9898 = vst [vmem:[#allocation44_spill] sm:$0xff] %v7264_v4  ;;  %5614 = vmatmul.msk.f32.gmra.mxu3 %vm391_vm1, %v2414_v38 }
 0x1a5   : > { %v1779_v19 = vpop.f32.mrf.mxu0 }
 0x1a6   : > { %v1226_v50 = vpop.f32.mrf.mxu2 }
 0x1a7   : > { %v1501_v35 = vpop.f32.mrf.mxu3  ;;  %v983_v12 = vpop.f32.mrf.mxu1  ;;  %v1286_v39 = vadd.f32 %v1226_v50, %v981_v17 }
 0x1a8   : > { %v1563_v8 = vadd.f32 %v1501_v35, %v1285_v41  ;;  %5648 = vmatmul.msk.f32.gmra.mxu0 %vm391_vm1, %v6854_v21  ;;  %v9903_v41 = vld [vmem:[#allocation9_spill] sm:$0xff] }
 0x1aa   : > { %v7274_v34 = vadd.f32 %v1779_v19, %v1563_v8  ;;  %5548 = vmatmul.msk.f32.gmra.mxu1 %vm391_vm1, %v6854_v21  ;;  %v984_v21 = vadd.f32 %v983_v12, %v6960_v59 }
 0x1ab   : > { %5582 = vmatmul.msk.f32.gmra.mxu2 %vm391_vm1, %v6870_v25 }
 0x1ac   : > { %5615 = vmatmul.msk.f32.gmra.mxu3 %vm391_vm1, %v2415_v10 }
 0x1ad   : > { %v1782_v23 = vpop.f32.mrf.mxu0 }
 0x1ae   : > { %v1229_v62 = vpop.f32.mrf.mxu2 }
 0x1af   : > { %v1504_v51 = vpop.f32.mrf.mxu3  ;;  %v986_v49 = vpop.f32.mrf.mxu1  ;;  %v1287_v48 = vadd.f32 %v1229_v62, %v984_v21 }
 0x1b0   : > { %v1564_v1 = vadd.f32 %v1504_v51, %v1286_v39  ;;  %5649 = vmatmul.msk.f32.gmra.mxu0 %vm391_vm1, %v6866_v24  ;;  %v2419_v39 = vld [vmem:[#allocation2 + $0xa8] sm:$0xff]  ;;  %v9907_v51 = vld [vmem:[#allocation28_spill] sm:$0xff] }
 0x1b2   : > { %v7284_v53 = vadd.f32 %v1782_v23, %v1564_v1  ;;  %5549 = vmatmul.msk.f32.gmra.mxu1 %vm391_vm1, %v6866_v24  ;;  %v987_v24 = vadd.f32 %v986_v49, %v6980_v6  ;;  %v9904_v23 = vld [vmem:[#allocation10_spill] sm:$0xff] }
 0x1b3   : > { %5583 = vmatmul.msk.f32.gmra.mxu2 %vm391_vm1, %v6881_v28 }
 0x1b4   : > { %9899 = vst [vmem:[#allocation45_spill] sm:$0xff] %v7284_v53  ;;  %5616 = vmatmul.msk.f32.gmra.mxu3 %vm391_vm1, %v2416_v58 }
 0x1b5   : > { %v1785_v25 = vpop.f32.mrf.mxu0 }
 0x1b6   : > { %v1232_v43 = vpop.f32.mrf.mxu2 }
 0x1b7   : > { %v1507_v13 = vpop.f32.mrf.mxu3  ;;  %v989_v16 = vpop.f32.mrf.mxu1  ;;  %v1288_v59 = vadd.f32 %v1232_v43, %v987_v24  ;;  %v9911_v24 = vld [vmem:[#allocation32_spill] sm:$0xff] }
 0x1b8   : > { %v1565_v63 = vadd.f32 %v1507_v13, %v1287_v48  ;;  %5650 = vmatmul.msk.f32.gmra.mxu0 %vm391_vm1, %v6878_v26  ;;  %v9908_v13 = vld [vmem:[#allocation13_spill] sm:$0xff] }
 0x1ba   : > { %v7294_v0 = vadd.f32 %v1785_v25, %v1565_v63  ;;  %5550 = vmatmul.msk.f32.gmra.mxu1 %vm391_vm1, %v6878_v26  ;;  %v9901_v26 = vld [vmem:[#allocation11_spill] sm:$0xff] }
 0x1bb   : > { %5584 = vmatmul.msk.f32.gmra.mxu2 %vm391_vm1, %v6894_v33  ;;  %v9902_v33 = vld [vmem:[#allocation24_spill] sm:$0xff] }
 0x1bc   : > { %9900 = vst [vmem:[#allocation46_spill] sm:$0xff] %v7294_v0  ;;  %5617 = vmatmul.msk.f32.gmra.mxu3 %vm391_vm1, %v2417_v54  ;;  %v990_v6 = vadd.f32 %v989_v16, %v9902_v33  ;;  %v2420_v16 = vld [vmem:[#allocation2 + $0xb0] sm:$0xff]  ;;  %v9910_v54 = vld [vmem:[#allocation17_spill] sm:$0xff]  ;;  %v9912_v33 = vld [vmem:[#allocation16_spill] sm:$0xff] }
 0x1bd   : > { %v1788_v28 = vpop.f32.mrf.mxu0 }
 0x1be   : > { %v1235_v22 = vpop.f32.mrf.mxu2 }
 0x1bf   : > { %v1510_v55 = vpop.f32.mrf.mxu3  ;;  %v992_v38 = vpop.f32.mrf.mxu1  ;;  %v1289_v35 = vadd.f32 %v1235_v22, %v990_v6  ;;  %v2421_v6 = vld [vmem:[#allocation2 + $0xc8] sm:$0xff] }
 0x1c0   : > { %v1566_v15 = vadd.f32 %v1510_v55, %v1288_v59  ;;  %5651 = vmatmul.msk.f32.gmra.mxu0 %vm391_vm1, %v6891_v31  ;;  %v993_v49 = vadd.f32 %v992_v38, %v9907_v51  ;;  %v9916_v51 = vld [vmem:[#allocation19_spill] sm:$0xff] }
 0x1c2   : > { %v7304_v19 = vadd.f32 %v1788_v28, %v1566_v15  ;;  %5551 = vmatmul.msk.f32.gmra.mxu1 %vm391_vm1, %v6891_v31  ;;  %v9906_v31 = vld [vmem:[#allocation14_spill] sm:$0xff] }
 0x1c3   : > { %5585 = vmatmul.msk.f32.gmra.mxu2 %vm391_vm1, %v9901_v26 }
 0x1c4   : > { %5618 = vmatmul.msk.f32.gmra.mxu3 %vm391_vm1, %v9903_v41 }
 0x1c5   : > { %v1791_v50 = vpop.f32.mrf.mxu0 }
 0x1c6   : > { %v1238_v12 = vpop.f32.mrf.mxu2 }
 0x1c7   : > { %v1513_v8 = vpop.f32.mrf.mxu3  ;;  %v995_v10 = vpop.f32.mrf.mxu1  ;;  %v1290_v58 = vadd.f32 %v1238_v12, %v993_v49  ;;  %v2422_v49 = vld [vmem:[#allocation2 + $0xd0] sm:$0xff] }
 0x1c8   : > { %v1567_v17 = vadd.f32 %v1513_v8, %v1289_v35  ;;  %5652 = vmatmul.msk.f32.gmra.mxu0 %vm391_vm1, %v9904_v23  ;;  %v996_v28 = vadd.f32 %v995_v10, %v9911_v24  ;;  %v9915_v35 = vld [vmem:[#allocation12_spill] sm:$0xff] }
 0x1ca   : > { %v7315_v62 = vadd.f32 %v1791_v50, %v1567_v17  ;;  %5552 = vmatmul.msk.f32.gmra.mxu1 %vm391_vm1, %v9904_v23  ;;  %v9914_v50 = vld [vmem:[#allocation20_spill] sm:$0xff] }
 0x1cb   : > { %5586 = vmatmul.msk.f32.gmra.mxu2 %vm391_vm1, %v9906_v31 }
 0x1cc   : > { %9905 = vst [vmem:[#allocation11_spill] sm:$0xff] %v7315_v62  ;;  %5619 = vmatmul.msk.f32.gmra.mxu3 %vm391_vm1, %v2419_v39 }
 0x1cd   : > { %v1794_v1 = vpop.f32.mrf.mxu0 }
 0x1ce   : > { %v1241_v21 = vpop.f32.mrf.mxu2 }
 0x1cf   : > { %v1516_v25 = vpop.f32.mrf.mxu3  ;;  %v998_v48 = vpop.f32.mrf.mxu1  ;;  %v1291_v22 = vadd.f32 %v1241_v21, %v996_v28  ;;  %v9919_v21 = vld [vmem:[#allocation15_spill] sm:$0xff]  ;;  %v9920_v28 = vld [vmem:[#allocation22_spill] sm:$0xff] }
 0x1d0   : > { %v1568_v43 = vadd.f32 %v1516_v25, %v1290_v58  ;;  %5653 = vmatmul.msk.f32.gmra.mxu0 %vm391_vm1, %v9908_v13  ;;  %v999_v12 = vadd.f32 %v998_v48, %v9915_v35  ;;  %v9918_v58 = vld [vmem:[#allocation23_spill] sm:$0xff] }
 0x1d2   : > { %v7325_v63 = vadd.f32 %v1794_v1, %v1568_v43  ;;  %5553 = vmatmul.msk.f32.gmra.mxu1 %vm391_vm1, %v9908_v13 }
 0x1d3   : > { %5587 = vmatmul.msk.f32.gmra.mxu2 %vm391_vm1, %v9910_v54 }
 0x1d4   : > { %9909 = vst [vmem:[#allocation24_spill] sm:$0xff] %v7325_v63  ;;  %5620 = vmatmul.msk.f32.gmra.mxu3 %vm391_vm1, %v2420_v16 }
 0x1d5   : > { %v1797_v59 = vpop.f32.mrf.mxu0 }
 0x1d6   : > { %v1244_v55 = vpop.f32.mrf.mxu2 }
 0x1d7   : > { %v1519_v38 = vpop.f32.mrf.mxu3  ;;  %v1001_v15 = vpop.f32.mrf.mxu1  ;;  %v1292_v10 = vadd.f32 %v1244_v55, %v999_v12  ;;  %v9922_v55 = vld [vmem:[#allocation27_spill] sm:$0xff] }
 0x1d8   : > { %v1569_v26 = vadd.f32 %v1519_v38, %v1291_v22  ;;  %5654 = vmatmul.msk.f32.gmra.mxu0 %vm391_vm1, %v9912_v33  ;;  %v1002_v25 = vadd.f32 %v1001_v15, %v9919_v21  ;;  %v9923_v38 = vld [vmem:[#allocation18_spill] sm:$0xff] }
 0x1da   : > { %v7335_v41 = vadd.f32 %v1797_v59, %v1569_v26  ;;  %5554 = vmatmul.msk.f32.gmra.mxu1 %vm391_vm1, %v9912_v33  ;;  %v2423_v59 = vld [vmem:[#allocation2 + $0xe8] sm:$0xff] }
 0x1db   : > { %5588 = vmatmul.msk.f32.gmra.mxu2 %vm391_vm1, %v9914_v50 }
 0x1dc   : > { %9913 = vst [vmem:[#allocation9_spill] sm:$0xff] %v7335_v41  ;;  %5621 = vmatmul.msk.f32.gmra.mxu3 %vm391_vm1, %v2421_v6 }
 0x1dd   : > { %v1800_v8 = vpop.f32.mrf.mxu0 }
 0x1de   : > { %v1247_v17 = vpop.f32.mrf.mxu2 }
 0x1df   : > { %v1522_v23 = vpop.f32.mrf.mxu3  ;;  %v1004_v39 = vpop.f32.mrf.mxu1  ;;  %v1293_v43 = vadd.f32 %v1247_v17, %v1002_v25 }
 0x1e0   : > { %v1570_v31 = vadd.f32 %v1522_v23, %v1292_v10  ;;  %5655 = vmatmul.msk.f32.gmra.mxu0 %vm391_vm1, %v9916_v51  ;;  %v1005_v15 = vadd.f32 %v1004_v39, %v9923_v38  ;;  %v2424_v10 = vld [vmem:[#allocation2 + $0xf0] sm:$0xff]  ;;  %v9926_v39 = vld [vmem:[#allocation21_spill] sm:$0xff] }
 0x1e1   : > { %v9925_v23 = vld [vmem:[#allocation31_spill] sm:$0xff] }
 0x1e2   : > { %v7345_v1 = vadd.f32 %v1800_v8, %v1570_v31  ;;  %5555 = vmatmul.msk.f32.gmra.mxu1 %vm391_vm1, %v9916_v51  ;;  %v9924_v8 = vld [vmem:[#allocation26_spill] sm:$0xff] }
 0x1e3   : > { %5589 = vmatmul.msk.f32.gmra.mxu2 %vm391_vm1, %v9918_v58 }
 0x1e4   : > { %9917 = vst [vmem:[#allocation10_spill] sm:$0xff] %v7345_v1  ;;  %5622 = vmatmul.msk.f32.gmra.mxu3 %vm391_vm1, %v2422_v49 }
 0x1e5   : > { %v1803_v48 = vpop.f32.mrf.mxu0 }
 0x1e6   : > { %v1250_v13 = vpop.f32.mrf.mxu2 }
 0x1e7   : > { %v1525_v16 = vpop.f32.mrf.mxu3  ;;  %v1007_v54 = vpop.f32.mrf.mxu1  ;;  %v1294_v33 = vadd.f32 %v1250_v13, %v1005_v15  ;;  %v2425_v13 = vld [vmem:[#allocation2 + $0x108] sm:$0xff] }
 0x1e8   : > { %v1571_v24 = vadd.f32 %v1525_v16, %v1293_v43  ;;  %5656 = vmatmul.msk.f32.gmra.mxu0 %vm391_vm1, %v9920_v28  ;;  %v1008_v31 = vadd.f32 %v1007_v54, %v9926_v39  ;;  %v9929_v43 = vld [vmem:[#allocation30_spill] sm:$0xff]  ;;  %v9930_v16 = vld [vmem:[#allocation25_spill] sm:$0xff]  ;;  %v9935_v39 = vld [vmem:[#allocation36_spill] sm:$0xff] }
 0x1ea   : > { %v7355_v22 = vadd.f32 %v1803_v48, %v1571_v24  ;;  %5556 = vmatmul.msk.f32.gmra.mxu1 %vm391_vm1, %v9920_v28 }
 0x1eb   : > { %5590 = vmatmul.msk.f32.gmra.mxu2 %vm391_vm1, %v9922_v55 }
 0x1ec   : > { %9921 = vst [vmem:[#allocation14_spill] sm:$0xff] %v7355_v22  ;;  %5623 = vmatmul.msk.f32.gmra.mxu3 %vm391_vm1, %v2423_v59  ;;  %v2443_v22 = vld [vmem:[#allocation2 + $0x228] sm:$0xff] }
 0x1ed   : > { %v1806_v26 = vpop.f32.mrf.mxu0 }
 0x1ee   : > { %v1253_v6 = vpop.f32.mrf.mxu2 }
 0x1ef   : > { %v1528_v50 = vpop.f32.mrf.mxu3  ;;  %v1010_v35 = vpop.f32.mrf.mxu1  ;;  %v1295_v49 = vadd.f32 %v1253_v6, %v1008_v31  ;;  %v2427_v31 = vld [vmem:[#allocation2 + $0x128] sm:$0xff] }
 0x1f0   : > { %v1572_v12 = vadd.f32 %v1528_v50, %v1294_v33  ;;  %5657 = vmatmul.msk.f32.gmra.mxu0 %vm391_vm1, %v9924_v8  ;;  %v1011_v54 = vadd.f32 %v1010_v35, %v9930_v16  ;;  %v2426_v33 = vld [vmem:[#allocation2 + $0x110] sm:$0xff] }
 0x1f2   : > { %v7365_v17 = vadd.f32 %v1806_v26, %v1572_v12  ;;  %5557 = vmatmul.msk.f32.gmra.mxu1 %vm391_vm1, %v9924_v8  ;;  %v9933_v26 = vld [vmem:[#allocation34_spill] sm:$0xff] }
 0x1f3   : > { %5591 = vmatmul.msk.f32.gmra.mxu2 %vm391_vm1, %v9925_v23 }
 0x1f4   : > { %5624 = vmatmul.msk.f32.gmra.mxu3 %vm391_vm1, %v2424_v10 }
 0x1f5   : > { %v7373_v51 = vpop.f32.mrf.mxu0 }
 0x1f6   : > { %9927 = vst [vmem:[#allocation28_spill] sm:$0xff] %v7373_v51  ;;  %v1256_v58 = vpop.f32.mrf.mxu2 }
 0x1f7   : > { %v1531_v21 = vpop.f32.mrf.mxu3  ;;  %v1013_v25 = vpop.f32.mrf.mxu1  ;;  %v1296_v28 = vadd.f32 %v1256_v58, %v1011_v54  ;;  %v9837_v58 = vmov 0  }
 0x1f8   : > { %v7375_v48 = vadd.f32 %v1531_v21, %v1295_v49  ;;  %5658 = vmatmul.msk.f32.gmra.mxu0 %vm391_vm1, %v9929_v43  ;;  %v9843_v49 = vmov 7   ;;  %5972 = vset.pattern.permute.xlu0 %v9837_v58  ;;  %v9936_v21 = vld [vmem:[#allocation33_spill] sm:$0xff] }
 0x1f9   : > { %5979 = vset.pattern.permute.xlu1 %v9843_v49 }
 0x1fa   : > { %9928 = vst [vmem:[#allocation13_spill] sm:$0xff] %v7375_v48  ;;  %5558 = vmatmul.msk.f32.gmra.mxu1 %vm391_vm1, %v9929_v43 }
 0x1fb   : > { %5592 = vmatmul.msk.f32.gmra.mxu2 %vm391_vm1, %v7048_v60  ;;  %v9934_v60 = vld [vmem:[#allocation29_spill] sm:$0xff] }
 0x1fc   : > { %5625 = vmatmul.msk.f32.gmra.mxu3 %vm391_vm1, %v2425_v13  ;;  %v1014_v6 = vadd.f32 %v1013_v25, %v9934_v60 }
 0x1fd   : > { %v7385_v24 = vpop.f32.mrf.mxu0 }
 0x1fe   : > { %9931 = vst [vmem:[#allocation17_spill] sm:$0xff] %v7385_v24  ;;  %v1259_v59 = vpop.f32.mrf.mxu2 }
 0x1ff   : > { %v1534_v55 = vpop.f32.mrf.mxu3  ;;  %v1016_v38 = vpop.f32.mrf.mxu1  ;;  %v1297_v35 = vadd.f32 %v1259_v59, %v1014_v6 }
 0x200   : > { %v7387_v15 = vadd.f32 %v1534_v55, %v1296_v28  ;;  %5659 = vmatmul.msk.f32.gmra.mxu0 %vm391_vm1, %v9933_v26  ;;  %v1017_v25 = vadd.f32 %v1016_v38, %v9936_v21  ;;  %v2428_v55 = vld [vmem:[#allocation2 + $0x130] sm:$0xff] }
 0x202   : > { %9932 = vst [vmem:[#allocation32_spill] sm:$0xff] %v7387_v15  ;;  %5559 = vmatmul.msk.f32.gmra.mxu1 %vm391_vm1, %v9933_v26 }
 0x203   : > { %5593 = vmatmul.msk.f32.gmra.mxu2 %vm391_vm1, %v7064_v3  ;;  %v9847_v3 = vmov 1  }
 0x204   : > { %5626 = vmatmul.msk.f32.gmra.mxu3 %vm391_vm1, %v2426_v33  ;;  %5973 = vset.pattern.permute.xlu2 %v9847_v3 }
 0x205   : > { %v7397_v50 = vpop.f32.mrf.mxu0 }
 0x206   : > { %v1262_v12 = vpop.f32.mrf.mxu2 }
 0x207   : > { %v1537_v8 = vpop.f32.mrf.mxu3  ;;  %v1019_v10 = vpop.f32.mrf.mxu1  ;;  %v1298_v13 = vadd.f32 %v1262_v12, %v1017_v25 }
 0x208   : > { %v7399_v23 = vadd.f32 %v1537_v8, %v1297_v35  ;;  %5660 = vmatmul.msk.f32.gmra.mxu0 %vm391_vm1, %v9935_v39  ;;  %v2429_v8 = vld [vmem:[#allocation2 + $0x148] sm:$0xff] }
 0x20a   : > { %5560 = vmatmul.msk.f32.gmra.mxu1 %vm391_vm1, %v9935_v39 }
 0x20b   : > { %5594 = vmatmul.msk.f32.gmra.mxu2 %vm391_vm1, %v7078_v45  ;;  %v9939_v45 = vld [vmem:[#allocation35_spill] sm:$0xff] }
 0x20c   : > { %5627 = vmatmul.msk.f32.gmra.mxu3 %vm391_vm1, %v2427_v31  ;;  %v1020_v38 = vadd.f32 %v1019_v10, %v9939_v45 }
 0x20d   : > { %v7412_v43 = vpop.f32.mrf.mxu0 }
 0x20e   : > { %9937 = vst [vmem:[#allocation16_spill] sm:$0xff] %v7412_v43  ;;  %v1265_v16 = vpop.f32.mrf.mxu2 }
 0x20f   : > { %v1540_v54 = vpop.f32.mrf.mxu3  ;;  %v2006_v28 = vpop.f32.mrf.mxu1  ;;  %v1299_v33 = vadd.f32 %v1265_v16, %v1020_v38 }
 0x210   : > { %v7414_v59 = vadd.f32 %v1540_v54, %v1298_v13  ;;  %5661 = vmatmul.msk.f32.gmra.mxu0 %vm391_vm1, %v7074_v37  ;;  %v7439_v13 = vld [vmem:[%s9942_s2] ss:$0 sm:$0xff] }
 0x212   : > { %9938 = vst [vmem:[#allocation20_spill] sm:$0xff] %v7414_v59  ;;  %5561 = vmatmul.msk.f32.gmra.mxu1 %vm391_vm1, %v7074_v37  ;;  %v2102_v37 = vadd.f32 %v2006_v28, %v7080_v29  ;;  %v2441_v59 = vld [vmem:[#allocation2 + $0x208] sm:$0xff] }
 0x213   : > { %5595 = vmatmul.msk.f32.gmra.mxu2 %vm391_vm1, %v7093_v7 }
 0x214   : > { %5628 = vmatmul.msk.f32.gmra.mxu3 %vm391_vm1, %v2428_v55 }
 0x215   : > { %v7424_v26 = vpop.f32.mrf.mxu0 }
 0x216   : > { %9940 = vst [vmem:[#allocation12_spill] sm:$0xff] %v7424_v26  ;;  %v2285_v60 = vpop.f32.mrf.mxu2 }
 0x217   : > { %v1543_v6 = vpop.f32.mrf.mxu3  ;;  %v2009_v35 = vpop.f32.mrf.mxu1  ;;  %v2381_v10 = vadd.f32 %v2285_v60, %v2102_v37 }
 0x218   : > { %v7426_v12 = vadd.f32 %v1543_v6, %v1299_v33  ;;  %5662 = vmatmul.msk.f32.gmra.mxu0 %vm391_vm1, %v7089_v2  ;;  %v2103_v29 = vadd.f32 %v2009_v35, %v7095_v11  ;;  %v2431_v11 = vld [vmem:[#allocation2 + $0x168] sm:$0xff] }
 0x21a   : > { %9941 = vst [vmem:[#allocation19_spill] sm:$0xff] %v7426_v12  ;;  %5562 = vmatmul.msk.f32.gmra.mxu1 %vm391_vm1, %v7089_v2  ;;  %v2430_v2 = vld [vmem:[#allocation2 + $0x150] sm:$0xff] }
 0x21b   : > { %5596 = vmatmul.msk.f32.gmra.mxu2 %vm391_vm1, %v7108_v46 }
 0x21c   : > { %5629 = vmatmul.msk.f32.gmra.mxu3 %vm391_vm1, %v2429_v8 }
 0x21d   : > { %v2841_v7 = vpop.f32.mrf.mxu0 }
 0x21e   : > { %v2288_v39 = vpop.f32.mrf.mxu2 }
 0x21f   : > { %v2563_v31 = vpop.f32.mrf.mxu3  ;;  %v2012_v21 = vpop.f32.mrf.mxu1  ;;  %v2382_v28 = vadd.f32 %v2288_v39, %v2103_v29 }
 0x220   : > { %v2659_v25 = vadd.f32 %v2563_v31, %v2381_v10  ;;  %5663 = vmatmul.msk.f32.gmra.mxu0 %vm391_vm1, %v7104_v52 }
 0x222   : > { %v2937_v46 = vadd.f32 %v2841_v7, %v2659_v25  ;;  %5563 = vmatmul.msk.f32.gmra.mxu1 %vm391_vm1, %v7104_v52 }
 0x223   : > { %5597 = vmatmul.msk.f32.gmra.mxu2 %vm391_vm1, %v7123_v36  ;;  %v9943_v36 = vld [vmem:[#allocation37_spill] sm:$0xff] }
 0x224   : > { %v2973_v16 = vadd.f32 %v7439_v13, %v2937_v46  ;;  %5630 = vmatmul.msk.f32.gmra.mxu3 %vm391_vm1, %v2430_v2  ;;  %v2104_v6 = vadd.f32 %v2012_v21, %v9943_v36 }
 0x225   : > { %v2844_v54 = vpop.f32.mrf.mxu0 }
 0x226   : > { %v7450_v55 = vmax.f32 %v2973_v16, 0.0  ;;  %v2291_v45 = vpop.f32.mrf.mxu2 }
 0x227   : > { %v2566_v38 = vpop.f32.mrf.mxu3  ;;  %v7452_v33 = vpop.f32.mrf.mxu1  ;;  %v2383_v37 = vadd.f32 %v2291_v45, %v2104_v6 }
 0x228   : > { %v2660_v60 = vadd.f32 %v2566_v38, %v2382_v28  ;;  %4677 = vperm.xlu1 %5979, %v7450_v55   ;;  %3327 = vperm.xlu2 %5973, %v7450_v55   ;;  %v2710_v38 = vld [vmem:[#allocation2 + $0x171] sm:$0xff] }
 0x229   : > { %3071 = vperm.xlu0 %5972, %v7450_v55   ;;  %5664 = vmatmul.msk.f32.gmra.mxu0 %vm391_vm1, %v7119_v20 }
 0x22a   : > { %v2938_v52 = vadd.f32 %v2844_v54, %v2660_v60  ;;  %5564 = vmatmul.msk.f32.gmra.mxu1 %vm391_vm1, %v7119_v20  ;;  %v9839_v20 = vmov 2   ;;  %v9944_v60 = vld [vmem:[#allocation40_spill] sm:$0xff] }
 0x22b   : > { %5598 = vmatmul.msk.f32.gmra.mxu2 %vm391_vm1, %v7138_v18  ;;  %v2432_v18 = vld [vmem:[#allocation2 + $0x170] sm:$0xff] }
 0x22c   : > { %v2974_v35 = vadd.f32 %v7439_v13, %v2938_v52  ;;  %5631 = vmatmul.msk.f32.gmra.mxu3 %vm391_vm1, %v2431_v11 }
 0x22d   : > { %v2847_v8 = vpop.f32.mrf.mxu0 }
 0x22e   : > { %v7466_v7 = vmax.f32 %v2974_v35, 0.0  ;;  %v7468_v10 = vpop.f32.mrf.mxu2  ;;  %v1878_v35 = vld [vmem:[#allocation2 + $0x189] sm:$0xff] }
 0x22f   : > { %v2569_v39 = vpop.f32.mrf.mxu3  ;;  %v7470_v31 = vpop.f32.mrf.mxu1 }
 0x230   : > { %v2661_v25 = vadd.f32 %v2569_v39, %v2383_v37  ;;  %5974 = vset.pattern.permute.xlu2 %v9839_v20  ;;  %5987 = vset.pattern.permute.xlu1 %v9837_v58  ;;  %v2437_v58 = vld [vmem:[#allocation2 + $0x1c8] sm:$0xff] }
 0x231   : > { %3076 = vperm.xlu0 %5972, %v7466_v7   ;;  %3552 = vperm.xlu2 %5974, %v7450_v55  }
 0x232   : > { %v2939_v21 = vadd.f32 %v2847_v8, %v2661_v25  ;;  %5565 = vmatmul.msk.f32.gmra.mxu1 %vm391_vm1, %v7134_v57  ;;  %5665 = vmatmul.msk.f32.gmra.mxu0 %vm391_vm1, %v7134_v57  ;;  %v9835_v57 = vmov 3   ;;  %v9841_v8 = vmov 4  }
 0x233   : > { %5599 = vmatmul.msk.f32.gmra.mxu2 %vm391_vm1, %v7153_v14  ;;  %v2433_v14 = vld [vmem:[#allocation2 + $0x188] sm:$0xff] }
 0x234   : > { %v2975_v2 = vadd.f32 %v7439_v13, %v2939_v21  ;;  %5632 = vmatmul.msk.f32.gmra.mxu3 %vm391_vm1, %v2432_v18  ;;  %v1879_v21 = vld [vmem:[#allocation2 + $0x191] sm:$0xff] }
 0x235   : > { %v7484_v46 = vpop.f32.mrf.mxu0 }
 0x236   : > { %v7486_v29 = vmax.f32 %v2975_v2, 0.0  ;;  %v7488_v16 = vpop.f32.mrf.mxu2 }
 0x237   : > { %v7490_v54 = vpop.f32.mrf.mxu3  ;;  %v2021_v28 = vpop.f32.mrf.mxu1 }
 0x238   : > { %v2107_v45 = vadd.f32 %v2021_v28, %v7155_v9  ;;  %3081 = vperm.xlu1 %5987, %v7486_v29  }
 0x239   : > { %5980 = vset.pattern.permute.xlu0 %v9847_v3  ;;  %5975 = vset.pattern.permute.xlu2 %v9835_v57 }
 0x23a   : > { %3331 = vperm.xlu0 %5980, %v7466_v7   ;;  %5566 = vmatmul.msk.f32.gmra.mxu1 %vm391_vm1, %v9944_v60 }
 0x23b   : > { %5600 = vmatmul.msk.f32.gmra.mxu2 %vm391_vm1, %v7166_v27  ;;  %3777 = vperm.xlu2 %5975, %v7450_v55   ;;  %v2434_v27 = vld [vmem:[#allocation2 + $0x190] sm:$0xff] }
 0x23c   : > { %5633 = vmatmul.msk.f32.gmra.mxu3 %vm391_vm1, %v2433_v14  ;;  %5666 = vmatmul.msk.f32.gmra.mxu0 %vm391_vm1, %v2710_v38 }
 0x23d   : > { %v7504_v9 = vpop.f32.mrf.mxu0 }
 0x23e   : > { %v2300_v11 = vpop.f32.mrf.mxu2 }
 0x23f   : > { %v2386_v52 = vadd.f32 %v2300_v11, %v2107_v45  ;;  %v7506_v36 = vpop.f32.mrf.mxu3  ;;  %v7508_v6 = vpop.f32.mrf.mxu1  ;;  %v9845_v45 = vmov 5   ;;  %v1880_v11 = vld [vmem:[#allocation2 + $0x1a9] sm:$0xff] }
 0x240   : > { %5988 = vset.pattern.permute.xlu1 %v9847_v3 }
 0x241   : > { %3335 = vperm.xlu1 %5988, %v7486_v29  }
 0x242   : > { %5981 = vset.pattern.permute.xlu0 %v9839_v20  ;;  %5567 = vmatmul.msk.f32.gmra.mxu1 %vm391_vm1, %v1878_v35 }
 0x243   : > { %5601 = vmatmul.msk.f32.gmra.mxu2 %vm391_vm1, %v7178_v47  ;;  %5976 = vset.pattern.permute.xlu2 %v9841_v8  ;;  %v2435_v47 = vld [vmem:[#allocation2 + $0x1a8] sm:$0xff] }
 0x244   : > { %5634 = vmatmul.msk.f32.gmra.mxu3 %vm391_vm1, %v2434_v27  ;;  %3556 = vperm.xlu0 %5981, %v7466_v7  }
 0x245   : > { %4002 = vperm.xlu2 %5976, %v7450_v55   ;;  %5667 = vmatmul.msk.f32.gmra.mxu0 %vm391_vm1, %v1878_v35  ;;  %v2856_v37 = vpop.f32.mrf.mxu0  ;;  %v2436_v35 = vld [vmem:[#allocation2 + $0x1b0] sm:$0xff] }
 0x246   : > { %v7521_v39 = vpop.f32.mrf.mxu2 }
 0x247   : > { %v2578_v25 = vpop.f32.mrf.mxu3  ;;  %v7523_v18 = vpop.f32.mrf.mxu1 }
 0x248   : > { %v2664_v2 = vadd.f32 %v2578_v25, %v2386_v52  ;;  %v2159_v52 = vld [vmem:[#allocation2 + $0x1c7] sm:$0xff] }
 0x249   : > { %5989 = vset.pattern.permute.xlu1 %v9839_v20 }
 0x24a   : > { %v7526_v28 = vadd.f32 %v2856_v37, %v2664_v2  ;;  %5568 = vmatmul.msk.f32.gmra.mxu1 %vm391_vm1, %v1879_v21  ;;  %3560 = vperm.xlu1 %5989, %v7486_v29   ;;  %v9849_v37 = vmov 6  }
 0x24b   : > { %5602 = vmatmul.msk.f32.gmra.mxu2 %vm391_vm1, %v7190_v61 }
 0x24c   : > { %5635 = vmatmul.msk.f32.gmra.mxu3 %vm391_vm1, %v2435_v47  ;;  %5982 = vset.pattern.permute.xlu0 %v9835_v57  ;;  %v1881_v47 = vld [vmem:[#allocation2 + $0x1b1] sm:$0xff] }
 0x24d   : > { %5977 = vset.pattern.permute.xlu2 %v9845_v45  ;;  %3781 = vperm.xlu0 %5982, %v7466_v7   ;;  %v7536_v14 = vpop.f32.mrf.mxu0 }
 0x24e   : > { %5668 = vmatmul.msk.f32.gmra.mxu0 %vm391_vm1, %v1879_v21  ;;  %4227 = vperm.xlu2 %5977, %v7450_v55   ;;  %v7540_v38 = vpop.f32.mrf.mxu2 }
 0x24f   : > { %v7542_v60 = vpop.f32.mrf.mxu3  ;;  %v7544_v61 = vpop.f32.mrf.mxu1 }
 0x252   : > { %5569 = vmatmul.msk.f32.gmra.mxu1 %vm391_vm1, %v1880_v11  ;;  %5990 = vset.pattern.permute.xlu1 %v9835_v57 }
 0x253   : > { %5603 = vmatmul.msk.f32.gmra.mxu2 %vm391_vm1, %v2159_v52  ;;  %3785 = vperm.xlu1 %5990, %v7486_v29   ;;  %v2160_v52 = vld [vmem:[#allocation2 + $0x1cf] sm:$0xff] }
 0x254   : > { %5636 = vmatmul.msk.f32.gmra.mxu3 %vm391_vm1, %v2436_v35  ;;  %v9945_v35 = vld [vmem:[#allocation38_spill] sm:$0xff] }
 0x255   : > { %5983 = vset.pattern.permute.xlu0 %v9841_v8  ;;  %v7552_v27 = vpop.f32.mrf.mxu0  ;;  %v2105_v57 = vadd.f32 %v7452_v33, %v9945_v35 }
 0x256   : > { %5669 = vmatmul.msk.f32.gmra.mxu0 %vm391_vm1, %v1880_v11  ;;  %5978 = vset.pattern.permute.xlu2 %v9849_v37  ;;  %v7556_v25 = vpop.f32.mrf.mxu2 }
 0x257   : > { %4006 = vperm.xlu0 %5983, %v7466_v7   ;;  %v7559_v21 = vpop.f32.mrf.mxu3  ;;  %4452 = vperm.xlu2 %5978, %v7450_v55   ;;  %v7562_v2 = vpop.f32.mrf.mxu1  ;;  %v2384_v11 = vadd.f32 %v7468_v10, %v2105_v57 }
 0x259   : > { %v2662_v55 = vadd.f32 %v7490_v54, %v2384_v11  ;;  %v2161_v54 = vld [vmem:[#allocation2 + $0x1e7] sm:$0xff] }
 0x25a   : > { %5570 = vmatmul.msk.f32.gmra.mxu1 %vm391_vm1, %v1881_v47 }
 0x25b   : > { %5604 = vmatmul.msk.f32.gmra.mxu2 %vm391_vm1, %v2160_v52  ;;  %5991 = vset.pattern.permute.xlu1 %v9841_v8  ;;  %v2940_v35 = vadd.f32 %v7484_v46, %v2662_v55  ;;  %v2438_v52 = vld [vmem:[#allocation2 + $0x1d0] sm:$0xff] }
 0x25c   : > { %5637 = vmatmul.msk.f32.gmra.mxu3 %vm391_vm1, %v2437_v58  ;;  %4010 = vperm.xlu1 %5991, %v7486_v29   ;;  %v1882_v58 = vld [vmem:[#allocation2 + $0x1c9] sm:$0xff] }
 0x25d   : > { %v7573_v20 = vpop.f32.mrf.mxu0 }
 0x25e   : > { %5670 = vmatmul.msk.f32.gmra.mxu0 %vm391_vm1, %v1881_v47  ;;  %v7576_v33 = vpop.f32.mrf.mxu2  ;;  %v2976_v47 = vadd.f32 %v7439_v13, %v2940_v35  ;;  %v1883_v35 = vld [vmem:[#allocation2 + $0x1d1] sm:$0xff] }
 0x25f   : > { %5984 = vset.pattern.permute.xlu0 %v9845_v45  ;;  %v7580_v10 = vpop.f32.mrf.mxu3  ;;  %5986 = vset.pattern.permute.xlu2 %v9843_v49  ;;  %v7583_v57 = vpop.f32.mrf.mxu1 }
 0x260   : > { %4231 = vperm.xlu0 %5984, %v7466_v7   ;;  %4681 = vperm.xlu2 %5986, %v7466_v7   ;;  %v7598_v55 = vmax.f32 %v2976_v47, 0.0  ;;  %v2108_v47 = vadd.f32 %v7508_v6, %v7168_v30  ;;  %v1884_v6 = vld [vmem:[#allocation2 + $0x1e9] sm:$0xff] }
 0x262   : > { %5571 = vmatmul.msk.f32.gmra.mxu1 %vm391_vm1, %v1882_v58 }
 0x263   : > { %5605 = vmatmul.msk.f32.gmra.mxu2 %vm391_vm1, %v2161_v54 }
 0x264   : > { %5638 = vmatmul.msk.f32.gmra.mxu3 %vm391_vm1, %v2438_v52  ;;  %5992 = vset.pattern.permute.xlu1 %v9845_v45  ;;  %v2162_v52 = vld [vmem:[#allocation2 + $0x1ef] sm:$0xff]  ;;  %v2387_v45 = vadd.f32 %v7521_v39, %v2108_v47  ;;  %v9947_v47 = vmov 2  }
 0x265   : > { %4235 = vperm.xlu1 %5992, %v7486_v29   ;;  %v7593_v46 = vpop.f32.mrf.mxu0 }
 0x266   : > { %5671 = vmatmul.msk.f32.gmra.mxu0 %vm391_vm1, %v1882_v58  ;;  %v7596_v11 = vpop.f32.mrf.mxu2  ;;  %v2439_v58 = vld [vmem:[#allocation2 + $0x1e8] sm:$0xff] }
 0x267   : > { %v7600_v8 = vpop.f32.mrf.mxu3  ;;  %v2039_v49 = vpop.f32.mrf.mxu1 }
 0x268   : > { %5985 = vset.pattern.permute.xlu0 %v9849_v37  ;;  %5996 = vset.pattern.permute.xlu2 %v9847_v3  ;;  %v2113_v54 = vadd.f32 %v2039_v49, %v7222_v42 }
 0x269   : > { %4456 = vperm.xlu0 %5985, %v7466_v7   ;;  %3339 = vperm.xlu2 %5996, %v7598_v55   ;;  %v2665_v7 = vadd.f32 %v7542_v60, %v2387_v45 }
 0x26a   : > { %5572 = vmatmul.msk.f32.gmra.mxu1 %vm391_vm1, %v1883_v35 }
 0x26b   : > { %5606 = vmatmul.msk.f32.gmra.mxu2 %vm391_vm1, %v2162_v52  ;;  %v2163_v52 = vld [vmem:[#allocation2 + $0x207] sm:$0xff]  ;;  %v2943_v39 = vadd.f32 %v7536_v14, %v2665_v7  ;;  %v9949_v7 = vld [vmem:[#allocation39_spill] sm:$0xff] }
 0x26c   : > { %5639 = vmatmul.msk.f32.gmra.mxu3 %vm391_vm1, %v2439_v58  ;;  %v9946_v58 = vmov 7  }
 0x26d   : > { %5993 = vset.pattern.permute.xlu1 %v9849_v37  ;;  %v7614_v42 = vpop.f32.mrf.mxu0  ;;  %v2440_v37 = vld [vmem:[#allocation2 + $0x1f0] sm:$0xff]  ;;  %v2979_v45 = vadd.f32 %v7439_v13, %v2943_v39 }
 0x26e   : > { %5672 = vmatmul.msk.f32.gmra.mxu0 %vm391_vm1, %v1883_v35  ;;  %v2318_v49 = vpop.f32.mrf.mxu2  ;;  %4460 = vperm.xlu1 %5993, %v7486_v29   ;;  %v9948_v35 = vmov 0   ;;  %v2164_v39 = vld [vmem:[#allocation2 + $0x20f] sm:$0xff] }
 0x26f   : > { %v2392_v3 = vadd.f32 %v2318_v49, %v2113_v54  ;;  %v7619_v26 = vpop.f32.mrf.mxu3  ;;  %v7621_v30 = vpop.f32.mrf.mxu1  ;;  %v7641_v12 = vmax.f32 %v2979_v45, 0.0 }
 0x271   : > { %5994 = vset.pattern.permute.xlu0 %v9946_v58  ;;  %5997 = vset.pattern.permute.xlu2 %v9947_v47 }
 0x272   : > { %4685 = vperm.xlu0 %5994, %v7486_v29   ;;  %3564 = vperm.xlu2 %5997, %v7598_v55  }
 0x273   : > { %5573 = vmatmul.msk.f32.gmra.mxu1 %vm391_vm1, %v1884_v6  ;;  %5607 = vmatmul.msk.f32.gmra.mxu2 %vm391_vm1, %v2163_v52  ;;  %v2106_v52 = vadd.f32 %v7470_v31, %v9949_v7 }
 0x274   : > { %5640 = vmatmul.msk.f32.gmra.mxu3 %vm391_vm1, %v2440_v37  ;;  %v1885_v37 = vld [vmem:[#allocation2 + $0x1f1] sm:$0xff] }
 0x275   : > { %v2874_v60 = vpop.f32.mrf.mxu0  ;;  %v2385_v24 = vadd.f32 %v7488_v16, %v2106_v52  ;;  %v9952_v52 = vmov 1  }
 0x276   : > { %5673 = vmatmul.msk.f32.gmra.mxu0 %vm391_vm1, %v1884_v6  ;;  %v7633_v14 = vpop.f32.mrf.mxu2  ;;  %5995 = vset.pattern.permute.xlu1 %v9948_v35  ;;  %v9950_v6 = vmov 3  }
 0x277   : > { %v2596_v54 = vpop.f32.mrf.mxu3  ;;  %v7636_v49 = vpop.f32.mrf.mxu1  ;;  %3086 = vperm.xlu1 %5995, %v7598_v55  }
 0x278   : > { %v2670_v29 = vadd.f32 %v2596_v54, %v2392_v3  ;;  %v2663_v3 = vadd.f32 %v7506_v36, %v2385_v24  ;;  %v2442_v24 = vld [vmem:[#allocation2 + $0x210] sm:$0xff] }
 0x27a   : > { %6019 = vset.pattern.permute.xlu0 %v9948_v35  ;;  %5998 = vset.pattern.permute.xlu2 %v9950_v6  ;;  %v7645_v43 = vadd.f32 %v2874_v60, %v2670_v29  ;;  %v2941_v16 = vadd.f32 %v7504_v9, %v2663_v3  ;;  %v2165_v29 = vld [vmem:[#allocation2 + $0x227] sm:$0xff] }
 0x27b   : > { %3101 = vperm.xlu0 %6019, %v7641_v12   ;;  %3789 = vperm.xlu2 %5998, %v7598_v55  }
 0x27c   : > { %5574 = vmatmul.msk.f32.gmra.mxu1 %vm391_vm1, %v1885_v37  ;;  %5608 = vmatmul.msk.f32.gmra.mxu2 %vm391_vm1, %v2164_v39  ;;  %v2977_v7 = vadd.f32 %v7439_v13, %v2941_v16 }
 0x27d   : > { %5641 = vmatmul.msk.f32.gmra.mxu3 %vm391_vm1, %v2441_v59  ;;  %v7654_v31 = vpop.f32.mrf.mxu0  ;;  %v1886_v59 = vld [vmem:[#allocation2 + $0x209] sm:$0xff] }
 0x27e   : > { %5674 = vmatmul.msk.f32.gmra.mxu0 %vm391_vm1, %v1885_v37  ;;  %v7657_v45 = vpop.f32.mrf.mxu2  ;;  %v9953_v37 = vmov 4   ;;  %v7681_v3 = vmax.f32 %v2977_v7, 0.0  ;;  %v9956_v7 = vmov 5  }
 0x27f   : > { %v7660_v60 = vpop.f32.mrf.mxu3  ;;  %v7662_v54 = vpop.f32.mrf.mxu1  ;;  %6002 = vset.pattern.permute.xlu1 %v9946_v58 }
 0x280   : > { %4689 = vperm.xlu1 %6002, %v7598_v55  }
 0x282   : > { %v7666_v36 = vpop.permute.xlu2 %3327 }
 0x283   : > { %9951 = vst [vmem:[#allocation23_spill] sm:$0xff] %v7666_v36  ;;  %6020 = vset.pattern.permute.xlu0 %v9952_v52  ;;  %5999 = vset.pattern.permute.xlu2 %v9953_v37 }
 0x284   : > { %3351 = vperm.xlu0 %6020, %v7641_v12   ;;  %5609 = vmatmul.msk.f32.gmra.mxu2 %vm391_vm1, %v2165_v29  ;;  %v2166_v29 = vld [vmem:[#allocation2 + $0x22f] sm:$0xff] }
 0x285   : > { %5642 = vmatmul.msk.f32.gmra.mxu3 %vm391_vm1, %v2442_v24  ;;  %5575 = vmatmul.msk.f32.gmra.mxu1 %vm391_vm1, %v1886_v59  ;;  %v7675_v9 = vpop.f32.mrf.mxu0  ;;  %v1887_v24 = vld [vmem:[#allocation2 + $0x211] sm:$0xff] }
 0x286   : > { %4014 = vperm.xlu2 %5999, %v7598_v55   ;;  %5675 = vmatmul.msk.f32.gmra.mxu0 %vm391_vm1, %v1886_v59  ;;  %v7679_v39 = vpop.f32.mrf.mxu2 }
 0x287   : > { %v7683_v16 = vpop.f32.mrf.mxu3  ;;  %v7685_v15 = vpop.f32.mrf.mxu1 }
 0x288   : > { %6004 = vset.pattern.permute.xlu1 %v9952_v52 }
 0x289   : > { %3343 = vperm.xlu1 %6004, %v7681_v3  }
 0x28b   : > { %v7689_v51 = vpop.permute.xlu2 %3552 }
 0x28c   : > { %9954 = vst [vmem:[#allocation15_spill] sm:$0xff] %v7689_v51  ;;  %6021 = vset.pattern.permute.xlu0 %v9947_v47  ;;  %5610 = vmatmul.msk.f32.gmra.mxu2 %vm391_vm1, %v2166_v29  ;;  %v2444_v29 = vld [vmem:[#allocation2 + $0x230] sm:$0xff] }
 0x28d   : > { %5576 = vmatmul.msk.f32.gmra.mxu1 %vm391_vm1, %v1887_v24  ;;  %5643 = vmatmul.msk.f32.gmra.mxu3 %vm391_vm1, %v2443_v22  ;;  %v7695_v59 = vpop.f32.mrf.mxu0  ;;  %v2721_v22 = vld [vmem:[#allocation2 + $0x229] sm:$0xff] }
 0x28e   : > { %9955 = vst [vmem:[#allocation22_spill] sm:$0xff] %v7695_v59  ;;  %6000 = vset.pattern.permute.xlu2 %v9956_v7  ;;  %3576 = vperm.xlu0 %6021, %v7641_v12   ;;  %v7699_v48 = vpop.f32.mrf.mxu2 }
 0x28f   : > { %4239 = vperm.xlu2 %6000, %v7598_v55   ;;  %5676 = vmatmul.msk.f32.gmra.mxu0 %vm391_vm1, %v1887_v24  ;;  %v7703_v1 = vpop.f32.mrf.mxu3  ;;  %v7705_v41 = vpop.f32.mrf.mxu1  ;;  %v9961_v24 = vmov 6  }
 0x290   : > { %9957 = vst [vmem:[#allocation27_spill] sm:$0xff] %v7703_v1 }
 0x291   : > { %9958 = vst [vmem:[#allocation18_spill] sm:$0xff] %v7705_v41  ;;  %6005 = vset.pattern.permute.xlu1 %v9947_v47 }
 0x292   : > { %3568 = vperm.xlu1 %6005, %v7681_v3  }
 0x295   : > { %5644 = vmatmul.msk.f32.gmra.mxu3 %vm391_vm1, %v2444_v29  ;;  %v7710_v63 = vpop.permute.xlu2 %3777  ;;  %v7712_v0 = vpop.f32.mrf.mxu0 }
 0x296   : > { %9959 = vst [vmem:[#allocation26_spill] sm:$0xff] %v7710_v63  ;;  %6022 = vset.pattern.permute.xlu0 %v9950_v6  ;;  %v7715_v62 = vpop.f32.mrf.mxu2  ;;  %v2722_v63 = vld [vmem:[#allocation2 + $0x231] sm:$0xff] }
 0x297   : > { %9960 = vst [vmem:[#allocation31_spill] sm:$0xff] %v7715_v62  ;;  %6001 = vset.pattern.permute.xlu2 %v9961_v24  ;;  %3801 = vperm.xlu0 %6022, %v7641_v12   ;;  %v7719_v51 = vpop.f32.mrf.mxu3  ;;  %v7721_v36 = vpop.f32.mrf.mxu1 }
 0x298   : > { %5677 = vmatmul.msk.f32.gmra.mxu0 %vm391_vm1, %v2721_v22  ;;  %4464 = vperm.xlu2 %6001, %v7598_v55  }
 0x29a   : > { %6006 = vset.pattern.permute.xlu1 %v9950_v6  ;;  %v7744_v22 = vpop.permute.xlu1 %4677 }
 0x29b   : > { %v7726_v29 = vpop.permute.xlu0 %3071  ;;  %3793 = vperm.xlu1 %6006, %v7681_v3   ;;  %9968 = vst [vmem:[#allocation33_spill] sm:$0xff] %v7744_v22 }
 0x29c   : > { %9962 = vst [vmem:[#allocation21_spill] sm:$0xff] %v7726_v29 }
 0x29d   : > { %v7729_v62 = vpop.f32.mrf.mxu0 }
 0x29e   : > { %9963 = vst [vmem:[#allocation30_spill] sm:$0xff] %v7729_v62  ;;  %v7731_v41 = vpop.f32.mrf.mxu2 }
 0x29f   : > { %9964 = vst [vmem:[#allocation25_spill] sm:$0xff] %v7731_v41  ;;  %6023 = vset.pattern.permute.xlu0 %v9953_v37  ;;  %v7734_v4 = vpop.f32.mrf.mxu3  ;;  %v7736_v53 = vpop.permute.xlu2 %4002 }
 0x2a0   : > { %9965 = vst [vmem:[#allocation34_spill] sm:$0xff] %v7734_v4  ;;  %5678 = vmatmul.msk.f32.gmra.mxu0 %vm391_vm1, %v2722_v63  ;;  %6003 = vset.pattern.permute.xlu2 %v9948_v35  ;;  %v7740_v55 = vpop.f32.mrf.mxu1 }
 0x2a1   : > { %9966 = vst [vmem:[#allocation29_spill] sm:$0xff] %v7736_v53  ;;  %4026 = vperm.xlu0 %6023, %v7641_v12   ;;  %3091 = vperm.xlu2 %6003, %v7681_v3  }
 0x2a2   : > { %9967 = vst [vmem:[#allocation36_spill] sm:$0xff] %v7740_v55 }
 0x2a3   : > { %v7746_v29 = vpop.permute.xlu0 %3076  ;;  %6007 = vset.pattern.permute.xlu1 %v9953_v37 }
 0x2a4   : > { %9969 = vst [vmem:[#allocation35_spill] sm:$0xff] %v7746_v29  ;;  %4018 = vperm.xlu1 %6007, %v7681_v3   ;;  %v9976_v29 = vld [vmem:[#allocation41_spill] sm:$0xff] }
 0x2a6   : > { %v7750_v62 = vpop.f32.mrf.mxu2  ;;  %v7752_v53 = vpop.f32.mrf.mxu0 }
 0x2a7   : > { %9970 = vst [vmem:[#allocation37_spill] sm:$0xff] %v7750_v62  ;;  %v7754_v63 = vpop.f32.mrf.mxu3  ;;  %v2109_v62 = vadd.f32 %v7523_v18, %v9976_v29 }
 0x2a8   : > { %9971 = vst [vmem:[#allocation40_spill] sm:$0xff] %v7752_v53  ;;  %v7756_v4 = vpop.permute.xlu2 %4227  ;;  %v7758_v55 = vpop.f32.mrf.mxu1 }
 0x2a9   : > { %9972 = vst [vmem:[#allocation38_spill] sm:$0xff] %v7754_v63  ;;  %6024 = vset.pattern.permute.xlu0 %v9956_v7  ;;  %6010 = vset.pattern.permute.xlu2 %v9946_v58 }
 0x2aa   : > { %9973 = vst [vmem:[#allocation39_spill] sm:$0xff] %v7756_v4  ;;  %4251 = vperm.xlu0 %6024, %v7641_v12   ;;  %4693 = vperm.xlu2 %6010, %v7681_v3   ;;  %v7764_v22 = vpop.permute.xlu1 %3081  ;;  %v2388_v4 = vadd.f32 %v7540_v38, %v2109_v62 }
 0x2ab   : > { %9974 = vst [vmem:[#allocation47_spill] sm:$0xff] %v7758_v55  ;;  %v2978_v55 = vadd.f32 %v7439_v13, %v7526_v28 }
 0x2ac   : > { %9975 = vst [vmem:[#allocation48_spill] sm:$0xff] %v7764_v22  ;;  %v7768_v53 = vpop.permute.xlu0 %3331  ;;  %6008 = vset.pattern.permute.xlu1 %v9956_v7  ;;  %v2666_v22 = vadd.f32 %v7559_v21, %v2388_v4  ;;  %v9981_v4 = vld [vmem:[#allocation43_spill] sm:$0xff] }
 0x2ad   : > { %9977 = vst [vmem:[#allocation41_spill] sm:$0xff] %v7768_v53  ;;  %4243 = vperm.xlu1 %6008, %v7681_v3   ;;  %v7782_v29 = vmax.f32 %v2978_v55, 0.0  ;;  %v2111_v38 = vadd.f32 %v7562_v2, %v9981_v4 }
 0x2ae   : > { %v7775_v59 = vpop.f32.mrf.mxu2  ;;  %v2944_v28 = vadd.f32 %v7552_v27, %v2666_v22 }
 0x2af   : > { %9978 = vst [vmem:[#allocation49_spill] sm:$0xff] %v7775_v59  ;;  %v7777_v63 = vpop.f32.mrf.mxu3  ;;  %v7779_v1 = vpop.f32.mrf.mxu0  ;;  %v2390_v55 = vadd.f32 %v7576_v33, %v2111_v38 }
 0x2b0   : > { %v2066_v18 = vpop.f32.mrf.mxu1  ;;  %v2980_v21 = vadd.f32 %v7439_v13, %v2944_v28 }
 0x2b1   : > { %v7784_v53 = vpop.permute.xlu2 %4452  ;;  %v2122_v41 = vadd.f32 %v2066_v18, %v7304_v19 }
 0x2b2   : > { %9979 = vst [vmem:[#allocation50_spill] sm:$0xff] %v7784_v53  ;;  %6025 = vset.pattern.permute.xlu0 %v9961_v24  ;;  %6011 = vset.pattern.permute.xlu2 %v9948_v35  ;;  %v7809_v2 = vmax.f32 %v2980_v21, 0.0 }
 0x2b3   : > { %4476 = vperm.xlu0 %6025, %v7641_v12   ;;  %3096 = vperm.xlu2 %6011, %v7782_v29   ;;  %v7792_v62 = vpop.permute.xlu1 %3335 }
 0x2b4   : > { %9980 = vst [vmem:[#allocation51_spill] sm:$0xff] %v7792_v62  ;;  %v2668_v62 = vadd.f32 %v7600_v8, %v2390_v55 }
 0x2b5   : > { %6009 = vset.pattern.permute.xlu1 %v9961_v24 }
 0x2b6   : > { %v7798_v19 = vpop.permute.xlu0 %3556  ;;  %v2345_v27 = vpop.f32.mrf.mxu2  ;;  %4468 = vperm.xlu1 %6009, %v7681_v3   ;;  %v2946_v28 = vadd.f32 %v7593_v46, %v2668_v62 }
 0x2b7   : > { %v2401_v22 = vadd.f32 %v2345_v27, %v2122_v41  ;;  %v7802_v18 = vpop.f32.mrf.mxu3 }
 0x2b8   : > { %9982 = vst [vmem:[#allocation43_spill] sm:$0xff] %v7802_v18  ;;  %v7804_v59 = vpop.f32.mrf.mxu1  ;;  %v2982_v8 = vadd.f32 %v7439_v13, %v2946_v28 }
 0x2b9   : > { %v7807_v53 = vpop.f32.mrf.mxu0 }
 0x2ba   : > { %9983 = vst [vmem:[#allocation52_spill] sm:$0xff] %v7807_v53  ;;  %v7811_v4 = vpop.permute.xlu2 %4681  ;;  %v7829_v27 = vmax.f32 %v2982_v8, 0.0 }
 0x2bb   : > { %9984 = vst [vmem:[#allocation53_spill] sm:$0xff] %v7811_v4  ;;  %6034 = vset.pattern.permute.xlu0 %v9946_v58  ;;  %6012 = vset.pattern.permute.xlu2 %v9952_v52 }
 0x2bc   : > { %4705 = vperm.xlu0 %6034, %v7809_v2   ;;  %3347 = vperm.xlu2 %6012, %v7782_v29   ;;  %v7818_v41 = vpop.permute.xlu1 %3560 }
 0x2bd   : > { %9985 = vst [vmem:[#allocation54_spill] sm:$0xff] %v7818_v41 }
 0x2be   : > { %v7820_v33 = vpop.f32.mrf.mxu2  ;;  %6018 = vset.pattern.permute.xlu1 %v9946_v58 }
 0x2bf   : > { %v2623_v3 = vpop.f32.mrf.mxu3  ;;  %v7824_v38 = vpop.permute.xlu0 %3781  ;;  %4697 = vperm.xlu1 %6018, %v7782_v29  }
 0x2c0   : > { %v2679_v46 = vadd.f32 %v2623_v3, %v2401_v22  ;;  %v7827_v62 = vpop.f32.mrf.mxu1 }
 0x2c1   : > { %9986 = vst [vmem:[#allocation55_spill] sm:$0xff] %v7827_v62 }
 0x2c2   : > { %v2901_v21 = vpop.f32.mrf.mxu0 }
 0x2c3   : > { %v7831_v55 = vadd.f32 %v2901_v21, %v2679_v46  ;;  %v7833_v4 = vpop.permute.xlu2 %3339 }
 0x2c4   : > { %6043 = vset.pattern.permute.xlu0 %v9948_v35  ;;  %6013 = vset.pattern.permute.xlu2 %v9947_v47 }
 0x2c5   : > { %9987 = vst [vmem:[#allocation56_spill] sm:$0xff] %v7831_v55  ;;  %3116 = vperm.xlu0 %6043, %v7829_v27   ;;  %3572 = vperm.xlu2 %6013, %v7782_v29   ;;  %v7839_v28 = vpop.permute.xlu1 %3785 }
 0x2c6   : > { %9988 = vst [vmem:[#allocation57_spill] sm:$0xff] %v7839_v28  ;;  %v7841_v22 = vpop.f32.mrf.mxu2 }
 0x2c7   : > { %9989 = vst [vmem:[#allocation58_spill] sm:$0xff] %v7841_v22  ;;  %v7843_v3 = vpop.f32.mrf.mxu3  ;;  %6027 = vset.pattern.permute.xlu1 %v9948_v35 }
 0x2c8   : > { %9990 = vst [vmem:[#allocation59_spill] sm:$0xff] %v7843_v3  ;;  %v7846_v8 = vpop.f32.mrf.mxu1  ;;  %3106 = vperm.xlu1 %6027, %v7809_v2  }
 0x2c9   : > { %9991 = vst [vmem:[#allocation60_spill] sm:$0xff] %v7846_v8  ;;  %v7849_v46 = vpop.permute.xlu0 %4006 }
 0x2cb   : > { %v7851_v21 = vpop.f32.mrf.mxu0 }
 0x2cc   : > { %9992 = vst [vmem:[#allocation61_spill] sm:$0xff] %v7851_v21  ;;  %v7853_v55 = vpop.permute.xlu2 %3564 }
 0x2cd   : > { %9993 = vst [vmem:[#allocation62_spill] sm:$0xff] %v7853_v55  ;;  %6044 = vset.pattern.permute.xlu0 %v9952_v52  ;;  %6014 = vset.pattern.permute.xlu2 %v9950_v6 }
 0x2ce   : > { %3363 = vperm.xlu0 %6044, %v7829_v27   ;;  %3797 = vperm.xlu2 %6014, %v7782_v29   ;;  %v7859_v22 = vpop.f32.mrf.mxu2  ;;  %v7861_v62 = vpop.permute.xlu1 %4010 }
 0x2cf   : > { %9994 = vst [vmem:[#allocation63_spill] sm:$0xff] %v7859_v22  ;;  %v7863_v8 = vpop.f32.mrf.mxu3 }
 0x2d0   : > { %9995 = vst [vmem:[#allocation64_spill] sm:$0xff] %v7861_v62  ;;  %v7865_v53 = vpop.f32.mrf.mxu1  ;;  %6028 = vset.pattern.permute.xlu1 %v9952_v52 }
 0x2d1   : > { %9996 = vst [vmem:[#allocation65_spill] sm:$0xff] %v7863_v8  ;;  %3355 = vperm.xlu1 %6028, %v7809_v2  }
 0x2d2   : > { %9997 = vst [vmem:[#allocation66_spill] sm:$0xff] %v7865_v53  ;;  %v7869_v18 = vpop.permute.xlu0 %4231 }
 0x2d3   : > { %9998 = vst [vmem:[#allocation67_spill] sm:$0xff] %v7869_v18  ;;  %v7871_v28 = vpop.f32.mrf.mxu0 }
 0x2d4   : > { %9999 = vst [vmem:[#allocation68_spill] sm:$0xff] %v7871_v28 }
 0x2d5   : > { %v7875_v21 = vpop.permute.xlu2 %3789 }
 0x2d6   : > { %6045 = vset.pattern.permute.xlu0 %v9947_v47  ;;  %6015 = vset.pattern.permute.xlu2 %v9953_v37  ;;  %10000 = vst [vmem:[#allocation69_spill] sm:$0xff] %v7875_v21  ;;  %v7877_v22 = vpop.f32.mrf.mxu2 }
 0x2d7   : > { %10001 = vst [vmem:[#allocation70_spill] sm:$0xff] %v7877_v22  ;;  %3588 = vperm.xlu0 %6045, %v7829_v27   ;;  %4022 = vperm.xlu2 %6015, %v7782_v29   ;;  %v7881_v53 = vpop.f32.mrf.mxu3  ;;  %v7883_v8 = vpop.permute.xlu1 %4235 }
 0x2d8   : > { %10002 = vst [vmem:[#allocation71_spill] sm:$0xff] %v7881_v53  ;;  %v7885_v62 = vpop.f32.mrf.mxu1 }
 0x2d9   : > { %10003 = vst [vmem:[#allocation72_spill] sm:$0xff] %v7883_v8  ;;  %6029 = vset.pattern.permute.xlu1 %v9947_v47 }
 0x2da   : > { %10004 = vst [vmem:[#allocation73_spill] sm:$0xff] %v7885_v62  ;;  %3580 = vperm.xlu1 %6029, %v7809_v2  }
 0x2db   : > { %v7889_v28 = vpop.permute.xlu0 %4456  ;;  %v7891_v18 = vpop.f32.mrf.mxu0 }
 0x2dc   : > { %10005 = vst [vmem:[#allocation74_spill] sm:$0xff] %v7889_v28 }
 0x2dd   : > { %10006 = vst [vmem:[#allocation75_spill] sm:$0xff] %v7891_v18 }
 0x2de   : > { %v7893_v21 = vpop.f32.mrf.mxu2 }
 0x2df   : > { %10007 = vst [vmem:[#allocation76_spill] sm:$0xff] %v7893_v21  ;;  %6046 = vset.pattern.permute.xlu0 %v9950_v6  ;;  %6016 = vset.pattern.permute.xlu2 %v9956_v7  ;;  %v7897_v22 = vpop.f32.mrf.mxu3 }
 0x2e0   : > { %10008 = vst [vmem:[#allocation77_spill] sm:$0xff] %v7897_v22  ;;  %3813 = vperm.xlu0 %6046, %v7829_v27   ;;  %4247 = vperm.xlu2 %6016, %v7782_v29   ;;  %v7901_v62 = vpop.permute.xlu2 %4014  ;;  %v2084_v53 = vpop.f32.mrf.mxu1 }
 0x2e1   : > { %10009 = vst [vmem:[#allocation78_spill] sm:$0xff] %v7901_v62  ;;  %v2128_v8 = vadd.f32 %v2084_v53, %v7365_v17  ;;  %v7904_v28 = vpop.permute.xlu1 %4460 }
 0x2e2   : > { %10010 = vst [vmem:[#allocation79_spill] sm:$0xff] %v7904_v28  ;;  %6030 = vset.pattern.permute.xlu1 %v9950_v6 }
 0x2e3   : > { %v7907_v21 = vpop.f32.mrf.mxu0  ;;  %3805 = vperm.xlu1 %6030, %v7809_v2  }
 0x2e4   : > { %10011 = vst [vmem:[#allocation80_spill] sm:$0xff] %v7907_v21  ;;  %v7910_v18 = vpop.permute.xlu0 %4685  ;;  %v10016_v21 = vld [vmem:[#allocation42_spill] sm:$0xff] }
 0x2e5   : > { %10012 = vst [vmem:[#allocation81_spill] sm:$0xff] %v7910_v18  ;;  %v2110_v18 = vadd.f32 %v7544_v61, %v10016_v21 }
 0x2e6   : > { %v2363_v22 = vpop.f32.mrf.mxu2 }
 0x2e7   : > { %v2407_v41 = vadd.f32 %v2363_v22, %v2128_v8  ;;  %v7912_v3 = vpop.f32.mrf.mxu3  ;;  %v2389_v8 = vadd.f32 %v7556_v25, %v2110_v18 }
 0x2e8   : > { %10013 = vst [vmem:[#allocation82_spill] sm:$0xff] %v7912_v3  ;;  %6047 = vset.pattern.permute.xlu0 %v9953_v37  ;;  %6017 = vset.pattern.permute.xlu2 %v9961_v24  ;;  %v7916_v62 = vpop.f32.mrf.mxu1 }
 0x2e9   : > { %10014 = vst [vmem:[#allocation83_spill] sm:$0xff] %v7916_v62  ;;  %4038 = vperm.xlu0 %6047, %v7829_v27   ;;  %4472 = vperm.xlu2 %6017, %v7782_v29   ;;  %v7920_v53 = vpop.permute.xlu2 %4239  ;;  %v7922_v17 = vpop.permute.xlu1 %3086  ;;  %v2667_v29 = vadd.f32 %v7580_v10, %v2389_v8 }
 0x2ea   : > { %10015 = vst [vmem:[#allocation84_spill] sm:$0xff] %v7920_v53 }
 0x2eb   : > { %v7926_v22 = vpop.f32.mrf.mxu0  ;;  %6031 = vset.pattern.permute.xlu1 %v9953_v37  ;;  %v2945_v61 = vadd.f32 %v7573_v20, %v2667_v29 }
 0x2ec   : > { %10017 = vst [vmem:[#allocation42_spill] sm:$0xff] %v7926_v22  ;;  %4030 = vperm.xlu1 %6031, %v7809_v2  }
 0x2ed   : > { %v7931_v3 = vpop.permute.xlu0 %3101 }
 0x2ee   : > { %v7933_v62 = vpop.f32.mrf.mxu2 }
 0x2ef   : > { %10018 = vst [vmem:[#allocation85_spill] sm:$0xff] %v7933_v62  ;;  %v2641_v53 = vpop.f32.mrf.mxu3 }
 0x2f0   : > { %v2685_v28 = vadd.f32 %v2641_v53, %v2407_v41  ;;  %v7936_v55 = vpop.f32.mrf.mxu1  ;;  %v2981_v41 = vadd.f32 %v7439_v13, %v2945_v61 }
 0x2f1   : > { %10019 = vst [vmem:[#allocation86_spill] sm:$0xff] %v7936_v55  ;;  %6048 = vset.pattern.permute.xlu0 %v9956_v7  ;;  %6026 = vset.pattern.permute.xlu2 %v9946_v58 }
 0x2f2   : > { %4263 = vperm.xlu0 %6048, %v7829_v27   ;;  %4701 = vperm.xlu2 %6026, %v7641_v12   ;;  %v7943_v25 = vpop.permute.xlu2 %4464  ;;  %v7945_v18 = vpop.permute.xlu1 %4689  ;;  %v1853_v12 = vadd.f32 %v7397_v50, %v7399_v23  ;;  %v7960_v29 = vmax.f32 %v2981_v41, 0.0  ;;  %v2114_v50 = vadd.f32 %v7621_v30, %v7230_v32  ;;  %v2112_v41 = vadd.f32 %v7583_v57, %v7214_v40 }
 0x2f3   : > { %v2919_v21 = vpop.f32.mrf.mxu0 }
 0x2f4   : > { %v7947_v10 = vadd.f32 %v2919_v21, %v2685_v28  ;;  %6032 = vset.pattern.permute.xlu1 %v9956_v7  ;;  %v2393_v23 = vadd.f32 %v7633_v14, %v2114_v50 }
 0x2f5   : > { %4255 = vperm.xlu1 %6032, %v7809_v2  }
 0x2f6   : > { %10020 = vst [vmem:[#allocation87_spill] sm:$0xff] %v7947_v10  ;;  %v7952_v20 = vpop.permute.xlu0 %3351  ;;  %v7954_v53 = vpop.f32.mrf.mxu2 }
 0x2f7   : > { %10021 = vst [vmem:[#allocation88_spill] sm:$0xff] %v7954_v53  ;;  %v7956_v8 = vpop.f32.mrf.mxu3 }
 0x2f8   : > { %10022 = vst [vmem:[#allocation89_spill] sm:$0xff] %v7956_v8  ;;  %v2391_v8 = vadd.f32 %v7596_v11, %v2112_v41 }
 0x2f9   : > { %v2093_v55 = vpop.f32.mrf.mxu1 }
 0x2fa   : > { %6049 = vset.pattern.permute.xlu0 %v9961_v24  ;;  %6035 = vset.pattern.permute.xlu2 %v9948_v35  ;;  %v2131_v28 = vadd.f32 %v2093_v55, %v1853_v12  ;;  %v2669_v14 = vadd.f32 %v7619_v26, %v2391_v8 }
 0x2fb   : > { %4488 = vperm.xlu0 %6049, %v7829_v27   ;;  %3111 = vperm.xlu2 %6035, %v7960_v29   ;;  %v7966_v61 = vpop.permute.xlu2 %3091  ;;  %v7968_v21 = vpop.f32.mrf.mxu0 }
 0x2fc   : > { %10023 = vst [vmem:[#allocation90_spill] sm:$0xff] %v7968_v21  ;;  %v7970_v10 = vpop.permute.xlu1 %3343  ;;  %v2671_v21 = vadd.f32 %v7660_v60, %v2393_v23  ;;  %v2947_v11 = vadd.f32 %v7614_v42, %v2669_v14 }
 0x2fd   : > { %6033 = vset.pattern.permute.xlu1 %v9961_v24 }
 0x2fe   : > { %4480 = vperm.xlu1 %6033, %v7809_v2   ;;  %v2949_v32 = vadd.f32 %v7654_v31, %v2671_v21  ;;  %v2983_v26 = vadd.f32 %v7439_v13, %v2947_v11 }
 0x2ff   : > { %v2372_v55 = vpop.f32.mrf.mxu2 }
 0x300   : > { %v7979_v12 = vpop.permute.xlu0 %3576  ;;  %v2410_v53 = vadd.f32 %v2372_v55, %v2131_v28  ;;  %v7981_v22 = vpop.f32.mrf.mxu3  ;;  %v2985_v31 = vadd.f32 %v7439_v13, %v2949_v32  ;;  %v3015_v50 = vmax.f32 %v2983_v26, 0.0 }
 0x301   : > { %10024 = vst [vmem:[#allocation91_spill] sm:$0xff] %v7981_v22 }
 0x303   : > { %6050 = vset.pattern.permute.xlu0 %v9946_v58  ;;  %6036 = vset.pattern.permute.xlu2 %v9952_v52  ;;  %v7988_v30 = vpop.f32.mrf.mxu0 }
 0x304   : > { %10025 = vst [vmem:[#allocation92_spill] sm:$0xff] %v7988_v30  ;;  %4713 = vperm.xlu0 %6050, %v7829_v27   ;;  %3359 = vperm.xlu2 %6036, %v7960_v29   ;;  %v7993_v40 = vpop.permute.xlu2 %4693  ;;  %v7995_v57 = vpop.permute.xlu1 %3568  ;;  %v8004_v27 = vmax.f32 %v2985_v31, 0.0 }
 0x305   : > { %10026 = vst [vmem:[#allocation93_spill] sm:$0xff] %v7993_v40 }
 0x306   : > { %6042 = vset.pattern.permute.xlu1 %v9946_v58 }
 0x307   : > { %4709 = vperm.xlu1 %6042, %v7960_v29  }
 0x308   : > { %v2650_v60 = vpop.f32.mrf.mxu3 }
 0x309   : > { %v2688_v2 = vadd.f32 %v2650_v60, %v2410_v53  ;;  %v8001_v28 = vpop.permute.xlu0 %3801 }
 0x30c   : > { %6066 = vset.pattern.permute.xlu0 %v9948_v35  ;;  %6037 = vset.pattern.permute.xlu2 %v9947_v47  ;;  %v2928_v8 = vpop.f32.mrf.mxu0 }
 0x30d   : > { %3131 = vperm.xlu0 %6066, %v8004_v27   ;;  %v8009_v42 = vadd.f32 %v2928_v8, %v2688_v2  ;;  %3584 = vperm.xlu2 %6037, %v7960_v29   ;;  %v8012_v21 = vpop.permute.xlu2 %3096  ;;  %v8014_v53 = vpop.permute.xlu1 %3793 }
 0x30f   : > { %10027 = vst [vmem:[#allocation94_spill] sm:$0xff] %v8009_v42  ;;  %6051 = vset.pattern.permute.xlu1 %v9948_v35 }
 0x310   : > { %3121 = vperm.xlu1 %6051, %v3015_v50  }
 0x313   : > { %v8017_v13 = vpop.permute.xlu0 %4026 }
 0x315   : > { %6067 = vset.pattern.permute.xlu0 %v9952_v52  ;;  %6038 = vset.pattern.permute.xlu2 %v9950_v6 }
 0x316   : > { %3375 = vperm.xlu0 %6067, %v8004_v27   ;;  %3809 = vperm.xlu2 %6038, %v7960_v29   ;;  %v8023_v23 = vpop.permute.xlu2 %3347  ;;  %v8025_v55 = vpop.permute.xlu1 %4018 }
 0x318   : > { %6052 = vset.pattern.permute.xlu1 %v9952_v52 }
 0x319   : > { %3367 = vperm.xlu1 %6052, %v3015_v50  }
 0x31c   : > { %v8028_v41 = vpop.permute.xlu0 %4251 }
 0x31e   : > { %6068 = vset.pattern.permute.xlu0 %v9947_v47  ;;  %6039 = vset.pattern.permute.xlu2 %v9953_v37 }
 0x31f   : > { %3600 = vperm.xlu0 %6068, %v8004_v27   ;;  %4034 = vperm.xlu2 %6039, %v7960_v29   ;;  %v8034_v32 = vpop.permute.xlu2 %3572  ;;  %v8036_v14 = vpop.permute.xlu1 %4243 }
 0x321   : > { %6053 = vset.pattern.permute.xlu1 %v9947_v47 }
 0x322   : > { %3592 = vperm.xlu1 %6053, %v3015_v50  }
 0x325   : > { %v8039_v11 = vpop.permute.xlu0 %4476 }
 0x327   : > { %6069 = vset.pattern.permute.xlu0 %v9950_v6  ;;  %6040 = vset.pattern.permute.xlu2 %v9956_v7 }
 0x328   : > { %3825 = vperm.xlu0 %6069, %v8004_v27   ;;  %4259 = vperm.xlu2 %6040, %v7960_v29   ;;  %v8045_v31 = vpop.permute.xlu2 %3797  ;;  %v8047_v60 = vpop.permute.xlu1 %4468 }
 0x32a   : > { %6054 = vset.pattern.permute.xlu1 %v9950_v6 }
 0x32b   : > { %3817 = vperm.xlu1 %6054, %v3015_v50  }
 0x32e   : > { %v8050_v2 = vpop.permute.xlu0 %4705 }
 0x32f   : > { %10028 = vst [vmem:[#allocation95_spill] sm:$0xff] %v8050_v2  ;;  %v8076_v2 = vld [vmem:[%s9942_s2] ss:$0 sm:$0xff] }
 0x330   : > { %6070 = vset.pattern.permute.xlu0 %v9953_v37  ;;  %6041 = vset.pattern.permute.xlu2 %v9961_v24 }
 0x331   : > { %4050 = vperm.xlu0 %6070, %v8004_v27   ;;  %4484 = vperm.xlu2 %6041, %v7960_v29   ;;  %v8056_v26 = vpop.permute.xlu2 %4022  ;;  %v8058_v8 = vpop.permute.xlu1 %4697  ;;  %v2115_v29 = vadd.f32 %v7636_v49, %v7238_v44 }
 0x332   : > { %10029 = vst [vmem:[#allocation96_spill] sm:$0xff] %v8058_v8 }
 0x333   : > { %6055 = vset.pattern.permute.xlu1 %v9953_v37  ;;  %v2394_v62 = vadd.f32 %v7657_v45, %v2115_v29 }
 0x334   : > { %4042 = vperm.xlu1 %6055, %v3015_v50  }
 0x335   : > { %v2672_v8 = vadd.f32 %v7683_v16, %v2394_v62 }
 0x337   : > { %v8061_v42 = vpop.permute.xlu0 %3116  ;;  %v2950_v44 = vadd.f32 %v7675_v9, %v2672_v8 }
 0x338   : > { %10030 = vst [vmem:[#allocation97_spill] sm:$0xff] %v8061_v42  ;;  %v2984_v42 = vadd.f32 %v8076_v2, %v7645_v43  ;;  %v2117_v43 = vadd.f32 %v7685_v15, %v7254_v5 }
 0x339   : > { %6071 = vset.pattern.permute.xlu0 %v9956_v7  ;;  %4492 = vperm.xlu2 %6041, %v3015_v50   ;;  %v2986_v16 = vadd.f32 %v8076_v2, %v2950_v44 }
 0x33a   : > { %4275 = vperm.xlu0 %6071, %v8004_v27   ;;  %v8065_v30 = vpop.permute.xlu2 %4247  ;;  %v8067_v22 = vpop.permute.xlu1 %3106  ;;  %v3016_v29 = vmax.f32 %v2984_v42, 0.0  ;;  %v2396_v9 = vadd.f32 %v7699_v48, %v2117_v43 }
 0x33b   : > { %10031 = vst [vmem:[#allocation98_spill] sm:$0xff] %v8067_v22  ;;  %v8099_v8 = vmax.f32 %v2986_v16, 0.0 }
 0x33c   : > { %6056 = vset.pattern.permute.xlu1 %v9956_v7  ;;  %v2674_v62 = vadd.f32 %v7719_v51, %v2396_v9 }
 0x33d   : > { %4267 = vperm.xlu1 %6056, %v3015_v50  }
 0x33e   : > { %v2952_v42 = vadd.f32 %v7712_v0, %v2674_v62 }
 0x340   : > { %v8081_v40 = vpop.permute.xlu0 %3363  ;;  %v2988_v51 = vadd.f32 %v8076_v2, %v2952_v42 }
 0x341   : > { %10032 = vst [vmem:[#allocation99_spill] sm:$0xff] %v8081_v40  ;;  %6057 = vset.pattern.permute.xlu2 %v9946_v58 }
 0x342   : > { %6072 = vset.pattern.permute.xlu0 %v9961_v24  ;;  %4717 = vperm.xlu2 %6057, %v3015_v50   ;;  %v8113_v44 = vmax.f32 %v2988_v51, 0.0 }
 0x343   : > { %4500 = vperm.xlu0 %6072, %v8004_v27   ;;  %v8087_v49 = vpop.permute.xlu2 %4472  ;;  %v8089_v45 = vpop.permute.xlu1 %3355 }
 0x344   : > { %10033 = vst [vmem:[#allocation100_spill] sm:$0xff] %v8087_v49 }
 0x345   : > { %10034 = vst [vmem:[#allocation101_spill] sm:$0xff] %v8089_v45  ;;  %6064 = vset.pattern.permute.xlu1 %v9961_v24 }
 0x346   : > { %4496 = vperm.xlu1 %6064, %v3016_v29  }
 0x349   : > { %v8097_v50 = vpop.permute.xlu0 %3588 }
 0x34a   : > { %10035 = vst [vmem:[#allocation102_spill] sm:$0xff] %v8097_v50  ;;  %6058 = vset.pattern.permute.xlu2 %v9948_v35 }
 0x34b   : > { %6080 = vset.pattern.permute.xlu0 %v9946_v58  ;;  %3126 = vperm.xlu2 %6058, %v3016_v29  }
 0x34c   : > { %4729 = vperm.xlu0 %6080, %v8099_v8   ;;  %v8105_v5 = vpop.permute.xlu2 %4701  ;;  %v8107_v15 = vpop.permute.xlu1 %3580 }
 0x34d   : > { %10036 = vst [vmem:[#allocation103_spill] sm:$0xff] %v8105_v5 }
 0x34e   : > { %10037 = vst [vmem:[#allocation104_spill] sm:$0xff] %v8107_v15  ;;  %6065 = vset.pattern.permute.xlu1 %v9946_v58  ;;  %v10096_v15 = vld [vmem:[#allocation33_spill] sm:$0xff] }
 0x34f   : > { %4721 = vperm.xlu1 %6065, %v3016_v29  }
 0x352   : > { %v8111_v48 = vpop.permute.xlu0 %3813 }
 0x353   : > { %10038 = vst [vmem:[#allocation105_spill] sm:$0xff] %v8111_v48  ;;  %6059 = vset.pattern.permute.xlu2 %v9952_v52 }
 0x354   : > { %6089 = vset.pattern.permute.xlu0 %v9948_v35  ;;  %3371 = vperm.xlu2 %6059, %v3016_v29  }
 0x355   : > { %3146 = vperm.xlu0 %6089, %v8113_v44   ;;  %v8118_v0 = vpop.permute.xlu2 %3111  ;;  %v8120_v43 = vpop.permute.xlu1 %3805 }
 0x356   : > { %10039 = vst [vmem:[#allocation106_spill] sm:$0xff] %v8118_v0  ;;  %v10055_v0 = vld [vmem:[#allocation38_spill] sm:$0xff] }
 0x357   : > { %10040 = vst [vmem:[#allocation107_spill] sm:$0xff] %v8120_v43  ;;  %4725 = vperm.xlu1 %6065, %v8004_v27  }
 0x35b   : > { %v8123_v16 = vpop.permute.xlu0 %4038 }
 0x35c   : > { %10041 = vst [vmem:[#allocation108_spill] sm:$0xff] %v8123_v16  ;;  %6060 = vset.pattern.permute.xlu2 %v9947_v47 }
 0x35d   : > { %6090 = vset.pattern.permute.xlu0 %v9952_v52  ;;  %3596 = vperm.xlu2 %6060, %v3016_v29  }
 0x35e   : > { %3387 = vperm.xlu0 %6090, %v8113_v44   ;;  %v8128_v9 = vpop.permute.xlu2 %3359  ;;  %v8130_v62 = vpop.permute.xlu1 %4030 }
 0x35f   : > { %10042 = vst [vmem:[#allocation109_spill] sm:$0xff] %v8128_v9  ;;  %6073 = vset.pattern.permute.xlu1 %v9948_v35 }
 0x360   : > { %10043 = vst [vmem:[#allocation110_spill] sm:$0xff] %v8130_v62  ;;  %3136 = vperm.xlu1 %6073, %v8099_v8   ;;  %v10054_v62 = vld [vmem:[#allocation27_spill] sm:$0xff] }
 0x364   : > { %v8134_v42 = vpop.permute.xlu0 %4263 }
 0x365   : > { %10044 = vst [vmem:[#allocation111_spill] sm:$0xff] %v8134_v42  ;;  %6061 = vset.pattern.permute.xlu2 %v9950_v6 }
 0x366   : > { %6091 = vset.pattern.permute.xlu0 %v9947_v47  ;;  %3821 = vperm.xlu2 %6061, %v3016_v29  }
 0x367   : > { %3612 = vperm.xlu0 %6091, %v8113_v44   ;;  %v8139_v27 = vpop.permute.xlu2 %3584  ;;  %v8141_v51 = vpop.permute.xlu1 %4255 }
 0x368   : > { %10045 = vst [vmem:[#allocation112_spill] sm:$0xff] %v8139_v27  ;;  %6074 = vset.pattern.permute.xlu1 %v9952_v52 }
 0x369   : > { %10046 = vst [vmem:[#allocation113_spill] sm:$0xff] %v8141_v51  ;;  %3379 = vperm.xlu1 %6074, %v8099_v8   ;;  %v2119_v51 = vadd.f32 %v7721_v36, %v7274_v34 }
 0x36d   : > { %v8145_v16 = vpop.permute.xlu0 %4488 }
 0x36e   : > { %10047 = vst [vmem:[#allocation114_spill] sm:$0xff] %v8145_v16  ;;  %6062 = vset.pattern.permute.xlu2 %v9953_v37 }
 0x36f   : > { %6092 = vset.pattern.permute.xlu0 %v9950_v6  ;;  %4046 = vperm.xlu2 %6062, %v3016_v29  }
 0x370   : > { %3837 = vperm.xlu0 %6092, %v8113_v44   ;;  %v8150_v42 = vpop.permute.xlu2 %3809  ;;  %v8152_v48 = vpop.permute.xlu1 %4480 }
 0x371   : > { %10048 = vst [vmem:[#allocation115_spill] sm:$0xff] %v8150_v42  ;;  %6075 = vset.pattern.permute.xlu1 %v9947_v47  ;;  %v10053_v42 = vld [vmem:[#allocation25_spill] sm:$0xff] }
 0x372   : > { %10049 = vst [vmem:[#allocation116_spill] sm:$0xff] %v8152_v48  ;;  %3604 = vperm.xlu1 %6075, %v8099_v8   ;;  %v2116_v48 = vadd.f32 %v7662_v54, %v7245_v56  ;;  %v10057_v56 = vld [vmem:[#allocation40_spill] sm:$0xff] }
 0x376   : > { %v8156_v5 = vpop.permute.xlu0 %4713 }
 0x377   : > { %10050 = vst [vmem:[#allocation117_spill] sm:$0xff] %v8156_v5  ;;  %6063 = vset.pattern.permute.xlu2 %v9956_v7  ;;  %v2395_v5 = vadd.f32 %v7679_v39, %v2116_v48 }
 0x378   : > { %6093 = vset.pattern.permute.xlu0 %v9953_v37  ;;  %4271 = vperm.xlu2 %6063, %v3016_v29   ;;  %v2398_v29 = vadd.f32 %v10053_v42, %v2119_v51 }
 0x379   : > { %4062 = vperm.xlu0 %6093, %v8113_v44   ;;  %v8161_v16 = vpop.permute.xlu2 %4034  ;;  %v8163_v50 = vpop.permute.xlu1 %4709  ;;  %v2673_v27 = vadd.f32 %v10054_v62, %v2395_v5  ;;  %v10060_v5 = vld [vmem:[#allocation45_spill] sm:$0xff] }
 0x37a   : > { %10051 = vst [vmem:[#allocation118_spill] sm:$0xff] %v8161_v16  ;;  %6076 = vset.pattern.permute.xlu1 %v9950_v6  ;;  %v2676_v16 = vadd.f32 %v10055_v0, %v2398_v29 }
 0x37b   : > { %10052 = vst [vmem:[#allocation119_spill] sm:$0xff] %v8163_v50  ;;  %3829 = vperm.xlu1 %6076, %v8099_v8   ;;  %v10056_v50 = vld [vmem:[#allocation22_spill] sm:$0xff] }
 0x37c   : > { %v2951_v40 = vadd.f32 %v10056_v50, %v2673_v27  ;;  %v2954_v54 = vadd.f32 %v10057_v56, %v2676_v16  ;;  %v10061_v50 = vld [vmem:[#allocation36_spill] sm:$0xff]  ;;  %v10062_v16 = vld [vmem:[#allocation37_spill] sm:$0xff] }
 0x37d   : > { %v2120_v48 = vadd.f32 %v10061_v50, %v10060_v5  ;;  %v10066_v5 = vld [vmem:[#allocation18_spill] sm:$0xff] }
 0x37e   : > { %v2987_v39 = vadd.f32 %v8076_v2, %v2951_v40  ;;  %v2990_v0 = vadd.f32 %v8076_v2, %v2954_v54 }
 0x37f   : > { %v3132_v43 = vpop.permute.xlu0 %3131  ;;  %v2399_v62 = vadd.f32 %v10062_v16, %v2120_v48 }
 0x380   : > { %6079 = vset.pattern.permute.xlu2 %v9961_v24  ;;  %v8192_v42 = vmax.f32 %v2987_v39, 0.0  ;;  %v8195_v29 = vmax.f32 %v2990_v0, 0.0  ;;  %v10065_v39 = vld [vmem:[#allocation44_spill] sm:$0xff] }
 0x381   : > { %6094 = vset.pattern.permute.xlu0 %v9956_v7  ;;  %4504 = vperm.xlu2 %6079, %v8099_v8   ;;  %v2677_v27 = vadd.f32 %v7777_v63, %v2399_v62  ;;  %v2118_v50 = vadd.f32 %v10066_v5, %v10065_v39  ;;  %v10068_v62 = vld [vmem:[#allocation34_spill] sm:$0xff]  ;;  %v5691_v5 = vld [vmem:[%s10072_s3 + $0x160] sm:$0xff] }
 0x382   : > { %4287 = vperm.xlu0 %6094, %v8113_v44   ;;  %v8181_v34 = vpop.permute.xlu2 %4259  ;;  %v8183_v36 = vpop.permute.xlu1 %3121 }
 0x383   : > { %10058 = vst [vmem:[#allocation25_spill] sm:$0xff] %v8181_v34  ;;  %6077 = vset.pattern.permute.xlu1 %v9953_v37  ;;  %v2955_v40 = vadd.f32 %v7779_v1, %v2677_v27  ;;  %v10067_v1 = vld [vmem:[#allocation31_spill] sm:$0xff] }
 0x384   : > { %10059 = vst [vmem:[#allocation27_spill] sm:$0xff] %v8183_v36  ;;  %4054 = vperm.xlu1 %6077, %v8099_v8   ;;  %v2397_v48 = vadd.f32 %v10067_v1, %v2118_v50  ;;  %v3049_v1 = vld [vmem:[%s10072_s3 + $0x60] sm:$0xff] }
 0x385   : > { %v2991_v63 = vadd.f32 %v8076_v2, %v2955_v40  ;;  %v10071_v40 = vld [vmem:[#allocation30_spill] sm:$0xff]  ;;  %v3241_v34 = vmul.f32 %v3132_v43, %v3049_v1 }
 0x386   : > { %v2675_v27 = vadd.f32 %v10068_v62, %v2397_v48  ;;  %v5723_v48 = vld [vmem:[%s10072_s3 + $0x260] sm:$0xff] }
 0x387   : > { %v8212_v16 = vmax.f32 %v2991_v63, 0.0 }
 0x388   : > { %v3376_v51 = vpop.permute.xlu0 %3375  ;;  %v2953_v39 = vadd.f32 %v10071_v40, %v2675_v27 }
 0x389   : > { %6081 = vset.pattern.permute.xlu2 %v9948_v35  ;;  %v3466_v62 = vmul.f32 %v5691_v5, %v3376_v51 }
 0x38a   : > { %6110 = vset.pattern.permute.xlu0 %v9961_v24  ;;  %3141 = vperm.xlu2 %6081, %v8192_v42   ;;  %v2989_v63 = vadd.f32 %v8076_v2, %v2953_v39  ;;  %v5755_v39 = vld [vmem:[%s10072_s3 + $0x360] sm:$0xff] }
 0x38b   : > { %4520 = vperm.xlu0 %6110, %v8195_v29   ;;  %v8202_v56 = vpop.permute.xlu2 %4484  ;;  %v8204_v54 = vpop.permute.xlu1 %3367  ;;  %v3498_v51 = vadd.f32 %v3466_v62, %v3241_v34  ;;  %v5679_v62 = vld [vmem:[%s10072_s3 + $0x100] sm:$0xff] }
 0x38c   : > { %10063 = vst [vmem:[#allocation38_spill] sm:$0xff] %v8202_v56  ;;  %6078 = vset.pattern.permute.xlu1 %v9956_v7  ;;  %v8241_v40 = vmax.f32 %v2989_v63, 0.0  ;;  %v5787_v63 = vld [vmem:[%s10072_s3 + $0x460] sm:$0xff] }
 0x38d   : > { %10064 = vst [vmem:[#allocation22_spill] sm:$0xff] %v8204_v54  ;;  %4279 = vperm.xlu1 %6078, %v8099_v8  }
 0x391   : > { %v3601_v0 = vpop.permute.xlu0 %3600 }
 0x392   : > { %6082 = vset.pattern.permute.xlu2 %v9952_v52 }
 0x393   : > { %6111 = vset.pattern.permute.xlu0 %v9948_v35  ;;  %3383 = vperm.xlu2 %6082, %v8192_v42   ;;  %v8218_v56 = vpop.permute.xlu2 %4492 }
 0x394   : > { %10069 = vst [vmem:[#allocation40_spill] sm:$0xff] %v8218_v56  ;;  %3161 = vperm.xlu0 %6111, %v8212_v16   ;;  %v8221_v8 = vpop.permute.xlu1 %3592 }
 0x395   : > { %10070 = vst [vmem:[#allocation45_spill] sm:$0xff] %v8221_v8  ;;  %6095 = vset.pattern.permute.xlu1 %v9961_v24  ;;  %v3691_v8 = vmul.f32 %v5723_v48, %v3601_v0  ;;  %v3037_v48 = vld [vmem:[%s10072_s3] sm:$0xff] }
 0x396   : > { %4512 = vperm.xlu1 %6095, %v8113_v44  }
 0x39a   : > { %v3826_v50 = vpop.permute.xlu0 %3825 }
 0x39b   : > { %6083 = vset.pattern.permute.xlu2 %v9947_v47  ;;  %v3916_v5 = vmul.f32 %v5755_v39, %v3826_v50 }
 0x39c   : > { %6112 = vset.pattern.permute.xlu0 %v9952_v52  ;;  %3608 = vperm.xlu2 %6083, %v8192_v42   ;;  %v8239_v27 = vpop.permute.xlu2 %4717 }
 0x39d   : > { %10073 = vst [vmem:[#allocation36_spill] sm:$0xff] %v8239_v27  ;;  %3399 = vperm.xlu0 %6112, %v8212_v16   ;;  %v8247_v56 = vpop.permute.xlu1 %3817  ;;  %v3723_v27 = vadd.f32 %v3691_v8, %v3498_v51  ;;  %v5851_v51 = vld [vmem:[%s10072_s3 + $0x660] sm:$0xff] }
 0x39e   : > { %10074 = vst [vmem:[#allocation37_spill] sm:$0xff] %v8247_v56  ;;  %6096 = vset.pattern.permute.xlu1 %v9948_v35 }
 0x39f   : > { %3151 = vperm.xlu1 %6096, %v8241_v40   ;;  %v3948_v54 = vadd.f32 %v3916_v5, %v3723_v27  ;;  %v10079_v27 = vld [vmem:[#allocation21_spill] sm:$0xff]  ;;  %v10080_v5 = vld [vmem:[#allocation23_spill] sm:$0xff] }
 0x3a0   : > { %v3229_v39 = vmul.f32 %v10079_v27, %v3037_v48 }
 0x3a3   : > { %v4051_v36 = vpop.permute.xlu0 %4050 }
 0x3a4   : > { %v4141_v9 = vmul.f32 %v5787_v63, %v4051_v36  ;;  %6084 = vset.pattern.permute.xlu2 %v9950_v6  ;;  %v5819_v36 = vld [vmem:[%s10072_s3 + $0x560] sm:$0xff]  ;;  %v3454_v63 = vmul.f32 %v5679_v62, %v10080_v5  ;;  %v10084_v5 = vld [vmem:[#allocation15_spill] sm:$0xff] }
 0x3a5   : > { %6113 = vset.pattern.permute.xlu0 %v9947_v47  ;;  %3833 = vperm.xlu2 %6084, %v8192_v42   ;;  %v8257_v43 = vpop.permute.xlu2 %3126 }
 0x3a6   : > { %10075 = vst [vmem:[#allocation44_spill] sm:$0xff] %v8257_v43  ;;  %v4173_v0 = vadd.f32 %v4141_v9, %v3948_v54  ;;  %3624 = vperm.xlu0 %6113, %v8212_v16   ;;  %v8260_v34 = vpop.permute.xlu1 %4042  ;;  %v10090_v43 = vld [vmem:[#allocation39_spill] sm:$0xff] }
 0x3a7   : > { %10076 = vst [vmem:[#allocation18_spill] sm:$0xff] %v8260_v34  ;;  %6097 = vset.pattern.permute.xlu1 %v9952_v52  ;;  %v10089_v34 = vld [vmem:[#allocation29_spill] sm:$0xff] }
 0x3a8   : > { %3391 = vperm.xlu1 %6097, %v8241_v40  }
 0x3ac   : > { %v4276_v8 = vpop.permute.xlu0 %4275 }
 0x3ad   : > { %v4366_v50 = vmul.f32 %v5819_v36, %v4276_v8  ;;  %6085 = vset.pattern.permute.xlu2 %v9953_v37  ;;  %v5711_v36 = vld [vmem:[%s10072_s3 + $0x200] sm:$0xff] }
 0x3ae   : > { %6114 = vset.pattern.permute.xlu0 %v9950_v6  ;;  %4058 = vperm.xlu2 %6085, %v8192_v42   ;;  %v8270_v9 = vpop.permute.xlu2 %3371 }
 0x3af   : > { %10077 = vst [vmem:[#allocation31_spill] sm:$0xff] %v8270_v9  ;;  %v4398_v54 = vadd.f32 %v4366_v50, %v4173_v0  ;;  %3849 = vperm.xlu0 %6114, %v8212_v16   ;;  %v8273_v1 = vpop.permute.xlu1 %4267  ;;  %v3486_v50 = vadd.f32 %v3454_v63, %v3229_v39  ;;  %v5743_v39 = vld [vmem:[%s10072_s3 + $0x300] sm:$0xff]  ;;  %v10085_v63 = vld [vmem:[#allocation26_spill] sm:$0xff]  ;;  %v10092_v9 = vld [vmem:[#allocation35_spill] sm:$0xff] }
 0x3b0   : > { %10078 = vst [vmem:[#allocation34_spill] sm:$0xff] %v8273_v1  ;;  %6098 = vset.pattern.permute.xlu1 %v9947_v47  ;;  %v3679_v1 = vmul.f32 %v5711_v36, %v10084_v5  ;;  %v5775_v36 = vld [vmem:[%s10072_s3 + $0x400] sm:$0xff] }
 0x3b1   : > { %3616 = vperm.xlu1 %6098, %v8241_v40   ;;  %v5807_v5 = vld [vmem:[%s10072_s3 + $0x500] sm:$0xff] }
 0x3b2   : > { %v4354_v56 = vmul.f32 %v5807_v5, %v10090_v43  ;;  %v5871_v43 = vld [vmem:[%s10072_s3 + $0x700] sm:$0xff]  ;;  %v10093_v5 = vld [vmem:[#allocation50_spill] sm:$0xff] }
 0x3b3   : > { %v4804_v22 = vmul.f32 %v5871_v43, %v10096_v15  ;;  %v5746_v15 = vld [vmem:[%s10072_s3 + $0x318] sm:$0xff]  ;;  %v10102_v43 = vld [vmem:[#allocation54_spill] sm:$0xff] }
 0x3b5   : > { %v4501_v0 = vpop.permute.xlu0 %4500 }
 0x3b6   : > { %v4591_v8 = vmul.f32 %v5851_v51, %v4501_v0  ;;  %6086 = vset.pattern.permute.xlu2 %v9956_v7  ;;  %v3711_v51 = vadd.f32 %v3679_v1, %v3486_v50  ;;  %v3904_v0 = vmul.f32 %v5743_v39, %v10085_v63  ;;  %v3038_v50 = vld [vmem:[%s10072_s3 + $0x8] sm:$0xff]  ;;  %v5682_v63 = vld [vmem:[%s10072_s3 + $0x118] sm:$0xff] }
 0x3b7   : > { %6115 = vset.pattern.permute.xlu0 %v9953_v37  ;;  %4283 = vperm.xlu2 %6086, %v8192_v42   ;;  %v8294_v48 = vpop.permute.xlu2 %3596  ;;  %v5712_v39 = vld [vmem:[%s10072_s3 + $0x208] sm:$0xff] }
 0x3b8   : > { %10081 = vst [vmem:[#allocation30_spill] sm:$0xff] %v8294_v48  ;;  %v8296_v27 = vadd.f32 %v4591_v8, %v4398_v54  ;;  %4074 = vperm.xlu0 %6115, %v8212_v16   ;;  %v8299_v62 = vpop.permute.xlu1 %4496  ;;  %v5680_v54 = vld [vmem:[%s10072_s3 + $0x108] sm:$0xff]  ;;  %v3040_v8 = vld [vmem:[%s10072_s3 + $0x18] sm:$0xff]  ;;  %v3936_v1 = vadd.f32 %v3904_v0, %v3711_v51  ;;  %v5839_v51 = vld [vmem:[%s10072_s3 + $0x600] sm:$0xff]  ;;  %v4129_v48 = vmul.f32 %v5775_v36, %v10089_v34 }
 0x3b9   : > { %10083 = vst [vmem:[#allocation23_spill] sm:$0xff] %v8299_v62  ;;  %6099 = vset.pattern.permute.xlu1 %v9950_v6  ;;  %v10087_v62 = vld [vmem:[#allocation41_spill] sm:$0xff]  ;;  %v3232_v0 = vmul.f32 %v7922_v17, %v3040_v8  ;;  %v3230_v17 = vmul.f32 %v10092_v9, %v3038_v50  ;;  %v5681_v8 = vld [vmem:[%s10072_s3 + $0x110] sm:$0xff]  ;;  %v3457_v34 = vmul.f32 %v5682_v63, %v7833_v4 }
 0x3ba   : > { %10082 = vst [vmem:[#allocation21_spill] sm:$0xff] %v8296_v27  ;;  %3841 = vperm.xlu1 %6099, %v8241_v40   ;;  %v3455_v6 = vmul.f32 %v5680_v54, %v10087_v62  ;;  %v5744_v62 = vld [vmem:[%s10072_s3 + $0x308] sm:$0xff]  ;;  %v4161_v36 = vadd.f32 %v4129_v48, %v3936_v1  ;;  %v4579_v47 = vmul.f32 %v5839_v51, %v10093_v5  ;;  %v3039_v4 = vld [vmem:[%s10072_s3 + $0x10] sm:$0xff] }
 0x3bb   : > { %v5776_v50 = vld [vmem:[%s10072_s3 + $0x408] sm:$0xff]  ;;  %v3905_v1 = vmul.f32 %v5744_v62, %v7824_v38  ;;  %v10099_v62 = vld [vmem:[#allocation47_spill] sm:$0xff] }
 0x3bc   : > { %v3487_v48 = vadd.f32 %v3455_v6, %v3230_v17  ;;  %v4386_v63 = vadd.f32 %v4354_v56, %v4161_v36  ;;  %v4130_v6 = vmul.f32 %v5776_v50, %v7849_v46  ;;  %v10097_v38 = vld [vmem:[#allocation62_spill] sm:$0xff] }
 0x3bd   : > { %v10098_v56 = vld [vmem:[#allocation46_spill] sm:$0xff] }
 0x3be   : > { %v8320_v27 = vpop.permute.xlu0 %4729  ;;  %v2121_v17 = vadd.f32 %v10099_v62, %v10098_v56  ;;  %v4611_v36 = vadd.f32 %v4579_v47, %v4386_v63  ;;  %v5840_v46 = vld [vmem:[%s10072_s3 + $0x608] sm:$0xff]  ;;  %v5777_v62 = vld [vmem:[%s10072_s3 + $0x410] sm:$0xff] }
 0x3bf   : > { %10086 = vst [vmem:[#allocation15_spill] sm:$0xff] %v8320_v27  ;;  %6087 = vset.pattern.permute.xlu2 %v9961_v24 }
 0x3c0   : > { %6116 = vset.pattern.permute.xlu0 %v9956_v7  ;;  %4508 = vperm.xlu2 %6087, %v8192_v42   ;;  %v8339_v27 = vpop.permute.xlu2 %3821 }
 0x3c1   : > { %10088 = vst [vmem:[#allocation26_spill] sm:$0xff] %v8339_v27  ;;  %4299 = vperm.xlu0 %6116, %v8212_v16   ;;  %v8347_v54 = vpop.permute.xlu1 %4721  ;;  %v3680_v27 = vmul.f32 %v5712_v39, %v7798_v19  ;;  %v5714_v19 = vld [vmem:[%s10072_s3 + $0x218] sm:$0xff]  ;;  %v3489_v39 = vadd.f32 %v3457_v34, %v3232_v0 }
 0x3c2   : > { %10091 = vst [vmem:[#allocation41_spill] sm:$0xff] %v8347_v54  ;;  %6100 = vset.pattern.permute.xlu1 %v9953_v37  ;;  %v10094_v54 = vld [vmem:[#allocation11_spill] sm:$0xff]  ;;  %v5808_v37 = vld [vmem:[%s10072_s3 + $0x508] sm:$0xff]  ;;  %v3682_v0 = vmul.f32 %v5714_v19, %v10097_v38 }
 0x3c3   : > { %v2123_v9 = vadd.f32 %v7804_v59, %v10094_v54  ;;  %4066 = vperm.xlu1 %6100, %v8241_v40   ;;  %v10095_v59 = vld [vmem:[#allocation51_spill] sm:$0xff]  ;;  %v3712_v45 = vadd.f32 %v3680_v27, %v3487_v48  ;;  %v10104_v48 = vld [vmem:[#allocation49_spill] sm:$0xff] }
 0x3c4   : > { %v3456_v51 = vmul.f32 %v5681_v8, %v10095_v59  ;;  %v5713_v54 = vld [vmem:[%s10072_s3 + $0x210] sm:$0xff]  ;;  %v10100_v8 = vld [vmem:[#allocation48_spill] sm:$0xff]  ;;  %v2400_v63 = vadd.f32 %v10104_v48, %v2121_v17  ;;  %v10105_v38 = vld [vmem:[#allocation61_spill] sm:$0xff] }
 0x3c5   : > { %v2402_v5 = vadd.f32 %v7820_v33, %v2123_v9  ;;  %v3231_v34 = vmul.f32 %v10100_v8, %v3039_v4  ;;  %v10101_v59 = vld [vmem:[#allocation59_spill] sm:$0xff]  ;;  %v3681_v9 = vmul.f32 %v5713_v54, %v10102_v43  ;;  %v3937_v50 = vadd.f32 %v3905_v1, %v3712_v45 }
 0x3c6   : > { %v5745_v33 = vld [vmem:[%s10072_s3 + $0x310] sm:$0xff]  ;;  %v3714_v4 = vadd.f32 %v3682_v0, %v3489_v39  ;;  %v10107_v0 = vld [vmem:[#allocation69_spill] sm:$0xff]  ;;  %v5778_v43 = vld [vmem:[%s10072_s3 + $0x418] sm:$0xff] }
 0x3c7   : > { %v2680_v49 = vadd.f32 %v10101_v59, %v2402_v5  ;;  %v3147_v27 = vpop.permute.xlu0 %3146  ;;  %v10103_v19 = vld [vmem:[#allocation67_spill] sm:$0xff]  ;;  %v3488_v5 = vadd.f32 %v3456_v51, %v3231_v34  ;;  %v4162_v39 = vadd.f32 %v4130_v6, %v3937_v50  ;;  %v3907_v17 = vmul.f32 %v5746_v15, %v10107_v0  ;;  %v10108_v51 = vld [vmem:[#allocation74_spill] sm:$0xff] }
 0x3c8   : > { %v4355_v47 = vmul.f32 %v5808_v37, %v10103_v19  ;;  %6088 = vset.pattern.permute.xlu2 %v9946_v58  ;;  %v10106_v37 = vld [vmem:[#allocation57_spill] sm:$0xff]  ;;  %v4580_v8 = vmul.f32 %v5840_v46, %v10108_v51  ;;  %v10109_v34 = vld [vmem:[#allocation43_spill] sm:$0xff] }
 0x3c9   : > { %v2958_v56 = vadd.f32 %v10105_v38, %v2680_v49  ;;  %6118 = vset.pattern.permute.xlu0 %v9946_v58  ;;  %4733 = vperm.xlu2 %6088, %v8192_v42   ;;  %v8407_v54 = vpop.permute.xlu2 %4046  ;;  %v8409_v45 = vpop.permute.xlu1 %4725  ;;  %v3906_v1 = vmul.f32 %v5745_v33, %v10106_v37  ;;  %v4836_v49 = vadd.f32 %v4804_v22, %v4611_v36  ;;  %v5809_v42 = vld [vmem:[%s10072_s3 + $0x510] sm:$0xff]  ;;  %v10110_v33 = vld [vmem:[#allocation64_spill] sm:$0xff]  ;;  %v5872_v22 = vld [vmem:[%s10072_s3 + $0x708] sm:$0xff] }
 0x3ca   : > { %4749 = vperm.xlu0 %6118, %v8212_v16   ;;  %v2678_v59 = vadd.f32 %v10109_v34, %v2400_v63  ;;  %v3713_v6 = vadd.f32 %v3681_v9, %v3488_v5  ;;  %v4131_v15 = vmul.f32 %v5777_v62, %v10110_v33  ;;  %v4387_v46 = vadd.f32 %v4355_v47, %v4162_v39  ;;  %v10111_v36 = vld [vmem:[#allocation52_spill] sm:$0xff]  ;;  %v5841_v63 = vld [vmem:[%s10072_s3 + $0x610] sm:$0xff] }
 0x3cb   : > { %6101 = vset.pattern.permute.xlu1 %v9956_v7  ;;  %v3939_v50 = vadd.f32 %v3907_v17, %v3714_v4  ;;  %v2994_v48 = vadd.f32 %v8076_v2, %v2958_v56  ;;  %v10112_v9 = vld [vmem:[#allocation72_spill] sm:$0xff]  ;;  %v10113_v47 = vld [vmem:[#allocation78_spill] sm:$0xff]  ;;  %v8445_v0 = vsel %vm4868_vm3, %v4836_v49, 0.0  ;;  %v10114_v17 = vld [vmem:[#allocation53_spill] sm:$0xff] }
 0x3cc   : > { %4291 = vperm.xlu1 %6101, %v8241_v40   ;;  %v2956_v19 = vadd.f32 %v10111_v36, %v2678_v59  ;;  %v3938_v38 = vadd.f32 %v3906_v1, %v3713_v6  ;;  %v4356_v5 = vmul.f32 %v5809_v42, %v10112_v9  ;;  %v4612_v62 = vadd.f32 %v4580_v8, %v4387_v46  ;;  %v5683_v37 = vld [vmem:[%s10072_s3 + $0x120] sm:$0xff]  ;;  %v3052_v39 = vld [vmem:[%s10072_s3 + $0x78] sm:$0xff] }
 0x3cd   : > { %v4132_v4 = vmul.f32 %v5778_v43, %v10113_v47  ;;  %v5694_v56 = vld [vmem:[%s10072_s3 + $0x178] sm:$0xff]  ;;  %v4805_v51 = vmul.f32 %v5872_v22, %v10114_v17  ;;  %v5685_v43 = vld [vmem:[%s10072_s3 + $0x130] sm:$0xff]  ;;  %v3041_v6 = vld [vmem:[%s10072_s3 + $0x20] sm:$0xff]  ;;  %v8461_v46 = vmax.f32 %v2994_v48, 0.0  ;;  %v3244_v36 = vmul.f32 %v3147_v27, %v3052_v39 }
 0x3ce   : > { %v5810_v1 = vld [vmem:[%s10072_s3 + $0x518] sm:$0xff]  ;;  %v4163_v8 = vadd.f32 %v4131_v15, %v3938_v38  ;;  %v5715_v49 = vld [vmem:[%s10072_s3 + $0x220] sm:$0xff]  ;;  %v5873_v15 = vld [vmem:[%s10072_s3 + $0x710] sm:$0xff]  ;;  %v8472_v38 = vadd.f32 %v8076_v2, %v2956_v19 }
 0x3cf   : > { %v10115_v34 = vld [vmem:[#allocation79_spill] sm:$0xff]  ;;  %v4164_v42 = vadd.f32 %v4132_v4, %v3939_v50  ;;  %v3458_v50 = vmul.f32 %v5683_v37, %v7970_v10  ;;  %v5684_v22 = vld [vmem:[%s10072_s3 + $0x128] sm:$0xff]  ;;  %v4837_v48 = vadd.f32 %v4805_v51, %v4612_v62  ;;  %v10116_v47 = vld [vmem:[#allocation84_spill] sm:$0xff]  ;;  %v3233_v62 = vmul.f32 %v7966_v61, %v3041_v6 }
 0x3d0   : > { %v4581_v59 = vmul.f32 %v5841_v63, %v10115_v34  ;;  %v3388_v33 = vpop.permute.xlu0 %3387  ;;  %v4388_v9 = vadd.f32 %v4356_v5, %v4163_v8  ;;  %v4357_v4 = vmul.f32 %v5810_v1, %v10116_v47  ;;  %v3043_v17 = vld [vmem:[%s10072_s3 + $0x30] sm:$0xff]  ;;  %v5747_v27 = vld [vmem:[%s10072_s3 + $0x320] sm:$0xff]  ;;  %v5842_v19 = vld [vmem:[%s10072_s3 + $0x618] sm:$0xff]  ;;  %v3460_v5 = vmul.f32 %v5685_v43, %v7952_v20 }
 0x3d1   : > { %v3469_v63 = vmul.f32 %v5694_v56, %v3388_v33  ;;  %4737 = vperm.xlu2 %6088, %v8113_v44   ;;  %v5717_v10 = vld [vmem:[%s10072_s3 + $0x230] sm:$0xff]  ;;  %v3683_v37 = vmul.f32 %v5715_v49, %v7995_v57  ;;  %v3042_v39 = vld [vmem:[%s10072_s3 + $0x28] sm:$0xff]  ;;  %v3459_v61 = vmul.f32 %v5684_v22, %v8023_v23  ;;  %v5779_v57 = vld [vmem:[%s10072_s3 + $0x420] sm:$0xff]  ;;  %v3235_v43 = vmul.f32 %v7931_v3, %v3043_v17 }
 0x3d2   : > { %6134 = vset.pattern.permute.xlu0 %v9948_v35  ;;  %v8485_v2 = vpop.permute.xlu2 %4271  ;;  %v8487_v44 = vpop.permute.xlu1 %3136  ;;  %v5716_v56 = vld [vmem:[%s10072_s3 + $0x228] sm:$0xff]  ;;  %v4613_v51 = vadd.f32 %v4581_v59, %v4388_v9  ;;  %v4389_v33 = vadd.f32 %v4357_v4, %v4164_v42  ;;  %v5749_v20 = vld [vmem:[%s10072_s3 + $0x330] sm:$0xff]  ;;  %v3490_v6 = vadd.f32 %v3458_v50, %v3233_v62  ;;  %v3685_v59 = vmul.f32 %v5717_v10, %v7979_v12  ;;  %v5874_v50 = vld [vmem:[%s10072_s3 + $0x718] sm:$0xff] }
 0x3d3   : > { %v3501_v1 = vadd.f32 %v3469_v63, %v3244_v36  ;;  %3176 = vperm.xlu0 %6134, %v8461_v46   ;;  %v10117_v8 = vld [vmem:[#allocation81_spill] sm:$0xff]  ;;  %v3908_v49 = vmul.f32 %v5747_v27, %v8014_v53  ;;  %v4870_v23 = vsel %vm4868_vm3, %v4837_v48, 0.0  ;;  %v3234_v22 = vmul.f32 %v8012_v21, %v3042_v39  ;;  %v5781_v3 = vld [vmem:[%s10072_s3 + $0x430] sm:$0xff] }
 0x3d4   : > { %v4806_v34 = vmul.f32 %v5873_v15, %v10117_v8  ;;  %6102 = vset.pattern.permute.xlu1 %v9961_v24  ;;  %v5748_v42 = vld [vmem:[%s10072_s3 + $0x328] sm:$0xff]  ;;  %v4582_v15 = vmul.f32 %v5842_v19, %v7943_v25  ;;  %v3684_v12 = vmul.f32 %v5716_v56, %v8034_v32  ;;  %v5811_v53 = vld [vmem:[%s10072_s3 + $0x520] sm:$0xff]  ;;  %v3492_v36 = vadd.f32 %v3460_v5, %v3235_v43  ;;  %v5726_v32 = vld [vmem:[%s10072_s3 + $0x278] sm:$0xff] }
 0x3d5   : > { %4516 = vperm.xlu1 %6102, %v8241_v40   ;;  %v3715_v63 = vadd.f32 %v3683_v37, %v3490_v6  ;;  %v3910_v25 = vmul.f32 %v5749_v20, %v8001_v28  ;;  %v4133_v21 = vmul.f32 %v5779_v57, %v8025_v55  ;;  %v5780_v9 = vld [vmem:[%s10072_s3 + $0x428] sm:$0xff]  ;;  %v3491_v4 = vadd.f32 %v3459_v61, %v3234_v22  ;;  %v5813_v17 = vld [vmem:[%s10072_s3 + $0x530] sm:$0xff]  ;;  %v5843_v28 = vld [vmem:[%s10072_s3 + $0x620] sm:$0xff] }
 0x3d6   : > { %v4838_v48 = vadd.f32 %v4806_v34, %v4613_v51  ;;  %v4614_v47 = vadd.f32 %v4582_v15, %v4389_v33  ;;  %v3909_v10 = vmul.f32 %v5748_v42, %v8045_v31  ;;  %v3717_v55 = vadd.f32 %v3685_v59, %v3492_v36  ;;  %v5812_v62 = vld [vmem:[%s10072_s3 + $0x528] sm:$0xff]  ;;  %v5845_v56 = vld [vmem:[%s10072_s3 + $0x630] sm:$0xff]  ;;  %v5686_v20 = vld [vmem:[%s10072_s3 + $0x138] sm:$0xff] }
 0x3d7   : > { %v3940_v27 = vadd.f32 %v3908_v49, %v3715_v63  ;;  %v4135_v19 = vmul.f32 %v5781_v3, %v8017_v13  ;;  %v4358_v5 = vmul.f32 %v5811_v53, %v8036_v14  ;;  %v4807_v39 = vmul.f32 %v5874_v50, %v7945_v18  ;;  %v5844_v18 = vld [vmem:[%s10072_s3 + $0x628] sm:$0xff]  ;;  %v3044_v15 = vld [vmem:[%s10072_s3 + $0x38] sm:$0xff]  ;;  %v5687_v36 = vld [vmem:[%s10072_s3 + $0x140] sm:$0xff] }
 0x3d8   : > { %v3716_v31 = vadd.f32 %v3684_v12, %v3491_v4  ;;  %v4134_v51 = vmul.f32 %v5780_v9, %v8056_v26  ;;  %v3942_v13 = vadd.f32 %v3910_v25, %v3717_v55  ;;  %v4360_v34 = vmul.f32 %v5813_v17, %v8028_v41  ;;  %v5718_v22 = vld [vmem:[%s10072_s3 + $0x238] sm:$0xff]  ;;  %v5719_v17 = vld [vmem:[%s10072_s3 + $0x240] sm:$0xff] }
 0x3d9   : > { %v3613_v37 = vpop.permute.xlu0 %3612  ;;  %6104 = vset.pattern.permute.xlu2 %v9948_v35  ;;  %v4165_v14 = vadd.f32 %v4133_v21, %v3940_v27  ;;  %v4583_v33 = vmul.f32 %v5843_v28, %v8047_v60  ;;  %v4872_v57 = vsel %vm4868_vm3, %v4838_v48, 0.0  ;;  %v4359_v41 = vmul.f32 %v5812_v62, %v8065_v30  ;;  %v10118_v12 = vld [vmem:[#allocation100_spill] sm:$0xff]  ;;  %v10120_v48 = vld [vmem:[#allocation98_spill] sm:$0xff]  ;;  %v10122_v55 = vld [vmem:[#allocation93_spill] sm:$0xff] }
 0x3da   : > { %v3694_v8 = vmul.f32 %v5726_v32, %v3613_v37  ;;  %3156 = vperm.xlu2 %6104, %v8195_v29   ;;  %v3941_v43 = vadd.f32 %v3909_v10, %v3716_v31  ;;  %v4839_v6 = vadd.f32 %v4807_v39, %v4614_v47  ;;  %v4167_v59 = vadd.f32 %v4135_v19, %v3942_v13  ;;  %v5750_v21 = vld [vmem:[%s10072_s3 + $0x338] sm:$0xff]  ;;  %v3046_v62 = vld [vmem:[%s10072_s3 + $0x48] sm:$0xff] }
 0x3db   : > { %6135 = vset.pattern.permute.xlu0 %v9952_v52  ;;  %v8567_v26 = vpop.permute.xlu2 %4504  ;;  %v8569_v61 = vpop.permute.xlu1 %3379  ;;  %v4390_v49 = vadd.f32 %v4358_v5, %v4165_v14  ;;  %v4585_v42 = vmul.f32 %v5845_v56, %v8039_v11  ;;  %v4871_v30 = vadd.f32 %v4870_v23, %v8445_v0  ;;  %v4584_v53 = vmul.f32 %v5844_v18, %v10118_v12  ;;  %v10119_v11 = vld [vmem:[#allocation101_spill] sm:$0xff]  ;;  %v10121_v4 = vld [vmem:[#allocation104_spill] sm:$0xff]  ;;  %v10124_v56 = vld [vmem:[#allocation99_spill] sm:$0xff] }
 0x3dc   : > { %v8573_v60 = vadd.f32 %v3694_v8, %v3501_v1  ;;  %3411 = vperm.xlu0 %6135, %v8461_v46   ;;  %v5875_v1 = vld [vmem:[%s10072_s3 + $0x720] sm:$0xff]  ;;  %v4166_v3 = vadd.f32 %v4134_v51, %v3941_v43  ;;  %v3461_v50 = vmul.f32 %v5686_v20, %v10119_v11  ;;  %v8595_v63 = vmax.f32 %v8472_v38, 0.0  ;;  %v5688_v23 = vld [vmem:[%s10072_s3 + $0x148] sm:$0xff]  ;;  %v5758_v10 = vld [vmem:[%s10072_s3 + $0x378] sm:$0xff] }
 0x3dd   : > { %6103 = vset.pattern.permute.xlu1 %v9946_v58  ;;  %v4392_v25 = vadd.f32 %v4360_v34, %v4167_v59  ;;  %v4615_v0 = vadd.f32 %v4583_v33, %v4390_v49  ;;  %v8603_v9 = vadd.f32 %v4872_v57, %v4871_v30  ;;  %v3236_v47 = vmul.f32 %v10120_v48, %v3044_v15  ;;  %v3045_v38 = vld [vmem:[%s10072_s3 + $0x40] sm:$0xff]  ;;  %v5876_v5 = vld [vmem:[%s10072_s3 + $0x728] sm:$0xff]  ;;  %v5782_v31 = vld [vmem:[%s10072_s3 + $0x438] sm:$0xff] }
 0x3de   : > { %4741 = vperm.xlu1 %6103, %v8241_v40   ;;  %v4391_v32 = vadd.f32 %v4359_v41, %v4166_v3  ;;  %v3686_v40 = vmul.f32 %v5718_v22, %v10121_v4  ;;  %v8617_v28 = vsel %vm4868_vm3, %v4839_v6, 0.0  ;;  %v4808_v27 = vmul.f32 %v5875_v1, %v10122_v55  ;;  %v10123_v37 = vld [vmem:[#allocation109_spill] sm:$0xff]  ;;  %v10125_v14 = vld [vmem:[#allocation107_spill] sm:$0xff]  ;;  %v10126_v43 = vld [vmem:[#allocation106_spill] sm:$0xff] }
 0x3df   : > { %v8620_v19 = vadd.f32 %v4585_v42, %v4392_v25  ;;  %v3462_v39 = vmul.f32 %v5687_v36, %v10123_v37  ;;  %v3463_v51 = vmul.f32 %v5688_v23, %v10124_v56  ;;  %v3493_v13 = vadd.f32 %v3461_v50, %v3236_v47  ;;  %v5751_v33 = vld [vmem:[%s10072_s3 + $0x340] sm:$0xff]  ;;  %v5689_v18 = vld [vmem:[%s10072_s3 + $0x150] sm:$0xff]  ;;  %v5814_v49 = vld [vmem:[%s10072_s3 + $0x538] sm:$0xff] }
 0x3e0   : > { %v4616_v8 = vadd.f32 %v4584_v53, %v4391_v32  ;;  %v3911_v34 = vmul.f32 %v5750_v21, %v10125_v14  ;;  %v8641_v57 = vadd.f32 %v4808_v27, %v4615_v0  ;;  %v3237_v41 = vmul.f32 %v10126_v43, %v3045_v38  ;;  %v10127_v6 = vld [vmem:[#allocation112_spill] sm:$0xff]  ;;  %v10129_v30 = vld [vmem:[#allocation97_spill] sm:$0xff]  ;;  %v10130_v12 = vld [vmem:[#allocation110_spill] sm:$0xff] }
 0x3e1   : > { %v3687_v59 = vmul.f32 %v5719_v17, %v10127_v6  ;;  %v10128_v15 = vld [vmem:[#allocation96_spill] sm:$0xff]  ;;  %v3238_v1 = vmul.f32 %v10129_v30, %v3046_v62  ;;  %v3718_v3 = vadd.f32 %v3686_v40, %v3493_v13  ;;  %v4136_v53 = vmul.f32 %v5782_v31, %v10130_v12  ;;  %v3047_v50 = vld [vmem:[%s10072_s3 + $0x50] sm:$0xff]  ;;  %v5720_v21 = vld [vmem:[%s10072_s3 + $0x248] sm:$0xff] }
 0x3e2   : > { %v3838_v20 = vpop.permute.xlu0 %3837  ;;  %6105 = vset.pattern.permute.xlu2 %v9952_v52  ;;  %v4809_v22 = vmul.f32 %v5876_v5, %v10128_v15  ;;  %v5783_v11 = vld [vmem:[%s10072_s3 + $0x440] sm:$0xff]  ;;  %v5721_v36 = vld [vmem:[%s10072_s3 + $0x250] sm:$0xff]  ;;  %v10131_v25 = vmov 2   ;;  %v3494_v32 = vadd.f32 %v3462_v39, %v3237_v41  ;;  %v5846_v4 = vld [vmem:[%s10072_s3 + $0x638] sm:$0xff] }
 0x3e3   : > { %v3919_v42 = vmul.f32 %v5758_v10, %v3838_v20  ;;  %3395 = vperm.xlu2 %6105, %v8195_v29   ;;  %v10132_v48 = vld [vmem:[#allocation115_spill] sm:$0xff]  ;;  %v10133_v40 = vld [vmem:[#allocation22_spill] sm:$0xff]  ;;  %v8679_v55 = vadd.f32 %v3463_v51, %v3238_v1  ;;  %v3943_v62 = vadd.f32 %v3911_v34, %v3718_v3  ;;  %v10134_v37 = vld [vmem:[#allocation113_spill] sm:$0xff] }
 0x3e4   : > { %6136 = vset.pattern.permute.xlu0 %v10131_v25  ;;  %v8662_v0 = vpop.permute.xlu2 %3141  ;;  %v8664_v23 = vpop.permute.xlu1 %3604  ;;  %v3912_v47 = vmul.f32 %v5751_v33, %v10132_v48  ;;  %v3464_v38 = vmul.f32 %v5689_v18, %v10133_v40  ;;  %v5690_v17 = vld [vmem:[%s10072_s3 + $0x158] sm:$0xff]  ;;  %v8681_v27 = vadd.f32 %v4809_v22, %v4616_v8  ;;  %v5877_v5 = vld [vmem:[%s10072_s3 + $0x730] sm:$0xff]  ;;  %v4361_v39 = vmul.f32 %v5814_v49, %v10134_v37  ;;  %v5815_v31 = vld [vmem:[%s10072_s3 + $0x540] sm:$0xff] }
 0x3e5   : > { %v3951_v10 = vadd.f32 %v3919_v42, %v8573_v60  ;;  %3636 = vperm.xlu0 %6136, %v8461_v46   ;;  %v5753_v60 = vld [vmem:[%s10072_s3 + $0x350] sm:$0xff]  ;;  %v5752_v56 = vld [vmem:[%s10072_s3 + $0x348] sm:$0xff]  ;;  %v3719_v51 = vadd.f32 %v3687_v59, %v3494_v32  ;;  %v3048_v20 = vld [vmem:[%s10072_s3 + $0x58] sm:$0xff]  ;;  %v4168_v49 = vadd.f32 %v4136_v53, %v3943_v62 }
 0x3e6   : > { %4745 = vperm.xlu1 %6103, %v8195_v29   ;;  %v10135_v8 = vld [vmem:[#allocation118_spill] sm:$0xff]  ;;  %v10136_v14 = vld [vmem:[#allocation27_spill] sm:$0xff]  ;;  %v10137_v33 = vld [vmem:[#allocation45_spill] sm:$0xff] }
 0x3e7   : > { %v4137_v13 = vmul.f32 %v5783_v11, %v10135_v8  ;;  %v3239_v34 = vmul.f32 %v10136_v14, %v3047_v50  ;;  %v3689_v18 = vmul.f32 %v5721_v36, %v10137_v33  ;;  %v5722_v43 = vld [vmem:[%s10072_s3 + $0x258] sm:$0xff]  ;;  %v10138_v41 = vld [vmem:[#allocation102_spill] sm:$0xff]  ;;  %v5847_v59 = vld [vmem:[%s10072_s3 + $0x640] sm:$0xff]  ;;  %v3944_v1 = vadd.f32 %v3912_v47, %v3719_v51 }
 0x3e8   : > { %v3688_v6 = vmul.f32 %v5720_v21, %v10138_v41  ;;  %v10139_v42 = vld [vmem:[#allocation116_spill] sm:$0xff]  ;;  %v10140_v22 = vld [vmem:[#allocation31_spill] sm:$0xff]  ;;  %v10141_v3 = vld [vmem:[#allocation25_spill] sm:$0xff] }
 0x3e9   : > { %v4586_v15 = vmul.f32 %v5846_v4, %v10139_v42  ;;  %v3465_v30 = vmul.f32 %v5690_v17, %v10140_v22  ;;  %v4362_v12 = vmul.f32 %v5815_v31, %v10141_v3  ;;  %v3496_v11 = vadd.f32 %v3464_v38, %v3239_v34  ;;  %v10142_v50 = vld [vmem:[#allocation37_spill] sm:$0xff]  ;;  %v5785_v32 = vld [vmem:[%s10072_s3 + $0x450] sm:$0xff]  ;;  %v5754_v53 = vld [vmem:[%s10072_s3 + $0x358] sm:$0xff] }
 0x3ea   : > { %v3914_v36 = vmul.f32 %v5753_v60, %v10142_v50  ;;  %v5790_v21 = vld [vmem:[%s10072_s3 + $0x478] sm:$0xff]  ;;  %v10144_v47 = vld [vmem:[#allocation105_spill] sm:$0xff]  ;;  %v5817_v62 = vld [vmem:[%s10072_s3 + $0x550] sm:$0xff]  ;;  %v4393_v60 = vadd.f32 %v4361_v39, %v4168_v49  ;;  %v4169_v51 = vadd.f32 %v4137_v13, %v3944_v1  ;;  %v10151_v50 = vmov 3  }
 0x3eb   : > { %v10143_v48 = vld [vmem:[#allocation103_spill] sm:$0xff]  ;;  %v3913_v40 = vmul.f32 %v5752_v56, %v10144_v47  ;;  %v10145_v17 = vld [vmem:[#allocation44_spill] sm:$0xff]  ;;  %v10146_v37 = vld [vmem:[#allocation30_spill] sm:$0xff]  ;;  %v3721_v34 = vadd.f32 %v3689_v18, %v3496_v11  ;;  %6106 = vset.pattern.permute.xlu2 %v10131_v25 }
 0x3ec   : > { %v4810_v4 = vmul.f32 %v5877_v5, %v10143_v48  ;;  %v3240_v38 = vmul.f32 %v10145_v17, %v3048_v20  ;;  %v3690_v31 = vmul.f32 %v5722_v43, %v10146_v37  ;;  %v10147_v8 = vld [vmem:[#allocation38_spill] sm:$0xff]  ;;  %v5786_v33 = vld [vmem:[%s10072_s3 + $0x458] sm:$0xff]  ;;  %v4063_v5 = vpop.permute.xlu0 %4062  ;;  %3620 = vperm.xlu2 %6106, %v8195_v29   ;;  %v4618_v42 = vadd.f32 %v4586_v15, %v4393_v60 }
 0x3ed   : > { %v4587_v14 = vmul.f32 %v5847_v59, %v10147_v8  ;;  %v5878_v56 = vld [vmem:[%s10072_s3 + $0x738] sm:$0xff]  ;;  %v5784_v20 = vld [vmem:[%s10072_s3 + $0x448] sm:$0xff]  ;;  %v4144_v49 = vmul.f32 %v5790_v21, %v4063_v5  ;;  %v4394_v59 = vadd.f32 %v4362_v12, %v4169_v51  ;;  %v3946_v22 = vadd.f32 %v3914_v36, %v3721_v34  ;;  %6137 = vset.pattern.permute.xlu0 %v10151_v50  ;;  %v8749_v48 = vpop.permute.xlu2 %3383  ;;  %v5879_v12 = vld [vmem:[%s10072_s3 + $0x740] sm:$0xff] }
 0x3ee   : > { %v10148_v39 = vld [vmem:[#allocation18_spill] sm:$0xff]  ;;  %v3497_v43 = vadd.f32 %v3465_v30, %v3240_v38  ;;  %v5818_v11 = vld [vmem:[%s10072_s3 + $0x558] sm:$0xff]  ;;  %v4876_v30 = vsel %vm4868_vm3, %v8641_v57, 0.0  ;;  %3861 = vperm.xlu0 %6137, %v8461_v46   ;;  %6119 = vset.pattern.permute.xlu1 %v9948_v35  ;;  %v3720_v57 = vadd.f32 %v3688_v6, %v8679_v55  ;;  %v4842_v60 = vadd.f32 %v4810_v4, %v8620_v19 }
 0x3ef   : > { %v4139_v13 = vmul.f32 %v5785_v32, %v10148_v39  ;;  %v10149_v41 = vld [vmem:[#allocation26_spill] sm:$0xff]  ;;  %v8751_v32 = vpop.permute.xlu1 %3829  ;;  %v4176_v21 = vadd.f32 %v4144_v49, %v3951_v10  ;;  %v10152_v47 = vld [vmem:[#allocation95_spill] sm:$0xff]  ;;  %v10153_v38 = vld [vmem:[#allocation108_spill] sm:$0xff]  ;;  %v4619_v37 = vadd.f32 %v4587_v14, %v4394_v59  ;;  %3166 = vperm.xlu1 %6119, %v8595_v63   ;;  %v4365_v51 = vmul.f32 %v5818_v11, %v8485_v2 }
 0x3f0   : > { %v3915_v18 = vmul.f32 %v5754_v53, %v10149_v41  ;;  %v10150_v1 = vld [vmem:[#allocation34_spill] sm:$0xff]  ;;  %v3722_v36 = vadd.f32 %v3690_v31, %v3497_v43  ;;  %v4140_v53 = vmul.f32 %v5786_v33, %v8407_v54  ;;  %v4811_v17 = vmul.f32 %v5878_v56, %v10152_v47  ;;  %v10154_v55 = vld [vmem:[#allocation111_spill] sm:$0xff]  ;;  %v10157_v49 = vld [vmem:[#allocation40_spill] sm:$0xff] }
 0x3f1   : > { %v4364_v3 = vmul.f32 %v5817_v62, %v10150_v1  ;;  %v5816_v15 = vld [vmem:[%s10072_s3 + $0x548] sm:$0xff]  ;;  %v4138_v62 = vmul.f32 %v5784_v20, %v10153_v38  ;;  %v4171_v10 = vadd.f32 %v4139_v13, %v3946_v22  ;;  %v4875_v8 = vadd.f32 %v8617_v28, %v8603_v9  ;;  %v10155_v33 = vld [vmem:[#allocation119_spill] sm:$0xff] }
 0x3f2   : > { %v5848_v54 = vld [vmem:[%s10072_s3 + $0x648] sm:$0xff]  ;;  %v3947_v31 = vadd.f32 %v3915_v18, %v3722_v36  ;;  %v3945_v34 = vadd.f32 %v3913_v40, %v3720_v57  ;;  %v4363_v6 = vmul.f32 %v5816_v15, %v10154_v55  ;;  %v4812_v14 = vmul.f32 %v5879_v12, %v10155_v33  ;;  %v5849_v19 = vld [vmem:[%s10072_s3 + $0x650] sm:$0xff]  ;;  %v5822_v9 = vld [vmem:[%s10072_s3 + $0x578] sm:$0xff] }
 0x3f3   : > { %v4878_v4 = vsel %vm4868_vm3, %v8681_v27, 0.0  ;;  %v4843_v5 = vadd.f32 %v4811_v17, %v4618_v42  ;;  %v5880_v2 = vld [vmem:[%s10072_s3 + $0x748] sm:$0xff]  ;;  %v4396_v56 = vadd.f32 %v4364_v3, %v4171_v10  ;;  %v4877_v28 = vadd.f32 %v4876_v30, %v4875_v8  ;;  %v5850_v27 = vld [vmem:[%s10072_s3 + $0x658] sm:$0xff]  ;;  %v5881_v15 = vld [vmem:[%s10072_s3 + $0x750] sm:$0xff] }
 0x3f4   : > { %v4172_v20 = vadd.f32 %v4140_v53, %v3947_v31  ;;  %v4170_v40 = vadd.f32 %v4138_v62, %v3945_v34  ;;  %v10156_v39 = vld [vmem:[#allocation114_spill] sm:$0xff]  ;;  %v4844_v43 = vadd.f32 %v4812_v14, %v4619_v37  ;;  %v4880_v18 = vsel %vm4868_vm3, %v4842_v60, 0.0  ;;  %v4288_v22 = vpop.permute.xlu0 %4287  ;;  %6107 = vset.pattern.permute.xlu2 %v10151_v50  ;;  %v10158_v11 = vld [vmem:[#allocation117_spill] sm:$0xff]  ;;  %v10159_v57 = vld [vmem:[#allocation23_spill] sm:$0xff] }
 0x3f5   : > { %v4588_v13 = vmul.f32 %v5848_v54, %v10156_v39  ;;  %v5692_v41 = vld [vmem:[%s10072_s3 + $0x168] sm:$0xff]  ;;  %v4589_v42 = vmul.f32 %v5849_v19, %v10157_v49  ;;  %v4879_v1 = vadd.f32 %v4878_v4, %v4877_v28  ;;  %v4813_v30 = vmul.f32 %v5880_v2, %v10158_v11  ;;  %3845 = vperm.xlu2 %6107, %v8195_v29   ;;  %v5882_v8 = vld [vmem:[%s10072_s3 + $0x758] sm:$0xff] }
 0x3f6   : > { %v4397_v59 = vadd.f32 %v4365_v51, %v4172_v20  ;;  %v4395_v3 = vadd.f32 %v4363_v6, %v4170_v40  ;;  %v3050_v12 = vld [vmem:[%s10072_s3 + $0x68] sm:$0xff]  ;;  %v4369_v53 = vmul.f32 %v5822_v9, %v4288_v22  ;;  %v4882_v47 = vsel %vm4868_vm3, %v4843_v5, 0.0  ;;  %v8813_v60 = vpop.permute.xlu2 %3608  ;;  %v10162_v4 = vld [vmem:[#allocation24_spill] sm:$0xff]  ;;  %v10163_v5 = vld [vmem:[#allocation55_spill] sm:$0xff] }
 0x3f7   : > { %v5724_v36 = vld [vmem:[%s10072_s3 + $0x268] sm:$0xff]  ;;  %v4621_v17 = vadd.f32 %v4589_v42, %v4396_v56  ;;  %v4590_v38 = vmul.f32 %v5850_v27, %v10159_v57  ;;  %v3467_v62 = vmul.f32 %v5692_v41, %v8569_v61  ;;  %v10160_v37 = vmov 4   ;;  %v4055_v54 = vpop.permute.xlu1 %4054  ;;  %6120 = vset.pattern.permute.xlu1 %v9952_v52  ;;  %v10161_v61 = vld [vmem:[#allocation36_spill] sm:$0xff] }
 0x3f8   : > { %6138 = vset.pattern.permute.xlu0 %v10160_v37  ;;  %v4881_v10 = vadd.f32 %v4880_v18, %v4879_v1  ;;  %v4620_v31 = vadd.f32 %v4588_v13, %v4395_v3  ;;  %v4884_v51 = vsel %vm4868_vm3, %v4844_v43, 0.0  ;;  %v5756_v34 = vld [vmem:[%s10072_s3 + $0x368] sm:$0xff]  ;;  %v8822_v55 = vadd.f32 %v4369_v53, %v4176_v21  ;;  %3403 = vperm.xlu1 %6120, %v8595_v63   ;;  %v5883_v27 = vld [vmem:[%s10072_s3 + $0x760] sm:$0xff] }
 0x3f9   : > { %4086 = vperm.xlu0 %6138, %v8461_v46   ;;  %v4814_v6 = vmul.f32 %v5881_v15, %v10161_v61  ;;  %v4622_v33 = vadd.f32 %v4590_v38, %v4397_v59  ;;  %v3242_v14 = vmul.f32 %v8487_v44, %v3050_v12  ;;  %v3692_v19 = vmul.f32 %v5724_v36, %v8664_v23  ;;  %v5788_v21 = vld [vmem:[%s10072_s3 + $0x468] sm:$0xff]  ;;  %v10167_v12 = vld [vmem:[#allocation68_spill] sm:$0xff]  ;;  %v3051_v38 = vld [vmem:[%s10072_s3 + $0x70] sm:$0xff] }
 0x3fa   : > { %v2124_v2 = vadd.f32 %v10163_v5, %v10162_v4  ;;  %v4883_v56 = vadd.f32 %v4882_v47, %v4881_v10  ;;  %v4845_v20 = vadd.f32 %v4813_v30, %v4620_v31  ;;  %v10164_v28 = vld [vmem:[#allocation41_spill] sm:$0xff]  ;;  %v3917_v13 = vmul.f32 %v5756_v34, %v8751_v32  ;;  %v10165_v44 = vld [vmem:[#allocation58_spill] sm:$0xff]  ;;  %v10169_v61 = vld [vmem:[#allocation60_spill] sm:$0xff] }
 0x3fb   : > { %v4846_v9 = vadd.f32 %v4814_v6, %v4621_v17  ;;  %v4815_v40 = vmul.f32 %v5882_v8, %v10164_v28  ;;  %v3499_v39 = vadd.f32 %v3467_v62, %v3242_v14  ;;  %v4142_v49 = vmul.f32 %v5788_v21, %v4055_v54  ;;  %v10166_v42 = vld [vmem:[#allocation65_spill] sm:$0xff]  ;;  %v5693_v30 = vld [vmem:[%s10072_s3 + $0x170] sm:$0xff] }
 0x3fc   : > { %v2403_v43 = vadd.f32 %v10165_v44, %v2124_v2  ;;  %v4885_v23 = vadd.f32 %v4884_v51, %v4883_v56  ;;  %v5820_v32 = vld [vmem:[%s10072_s3 + $0x568] sm:$0xff]  ;;  %v4886_v1 = vsel %vm4868_vm3, %v4845_v20, 0.0  ;;  %v4816_v11 = vmul.f32 %v5883_v27, %v8409_v45  ;;  %v5725_v62 = vld [vmem:[%s10072_s3 + $0x270] sm:$0xff]  ;;  %v8884_v2 = vld [vmem:[%s9942_s2] ss:$0 sm:$0xff] }
 0x3fd   : > { %v4847_v41 = vadd.f32 %v4815_v40, %v4622_v33  ;;  %v3724_v18 = vadd.f32 %v3692_v19, %v3499_v39  ;;  %v8842_v22 = vpop.permute.xlu0 %4520  ;;  %6108 = vset.pattern.permute.xlu2 %v10160_v37  ;;  %v4888_v3 = vsel %vm4868_vm3, %v4846_v9, 0.0  ;;  %v5852_v47 = vld [vmem:[%s10072_s3 + $0x668] sm:$0xff]  ;;  %v3468_v8 = vmul.f32 %v5693_v30, %v8749_v48  ;;  %v5757_v4 = vld [vmem:[%s10072_s3 + $0x370] sm:$0xff] }
 0x3fe   : > { %v2681_v59 = vadd.f32 %v10166_v42, %v2403_v43  ;;  %4070 = vperm.xlu2 %6108, %v8195_v29   ;;  %v4887_v53 = vadd.f32 %v4886_v1, %v4885_v23  ;;  %v5884_v51 = vld [vmem:[%s10072_s3 + $0x768] sm:$0xff]  ;;  %v4592_v19 = vmul.f32 %v5852_v47, %v8567_v26  ;;  %v3243_v20 = vmul.f32 %v8662_v0, %v3051_v38  ;;  %v10171_v9 = vld [vmem:[#allocation63_spill] sm:$0xff] }
 0x3ff   : > { %v3949_v15 = vadd.f32 %v3917_v13, %v3724_v18  ;;  %v3834_v17 = vpop.permute.xlu2 %3833  ;;  %v4280_v57 = vpop.permute.xlu1 %4279  ;;  %v4890_v45 = vsel %vm4868_vm3, %v4847_v41, 0.0  ;;  %v10168_v34 = vld [vmem:[#allocation9_spill] sm:$0xff]  ;;  %v3693_v21 = vmul.f32 %v5725_v62, %v8813_v60  ;;  %v10172_v26 = vld [vmem:[#allocation15_spill] sm:$0xff] }
 0x400   : > { %v2959_v36 = vadd.f32 %v10167_v12, %v2681_v59  ;;  %v4367_v10 = vmul.f32 %v5820_v32, %v4280_v57  ;;  %6121 = vset.pattern.permute.xlu1 %v10131_v25  ;;  %v4889_v31 = vadd.f32 %v4888_v3, %v4887_v53  ;;  %v2125_v6 = vadd.f32 %v10169_v61, %v10168_v34  ;;  %v10170_v33 = vld [vmem:[#allocation21_spill] sm:$0xff]  ;;  %v10173_v43 = vld [vmem:[#allocation71_spill] sm:$0xff]  ;;  %v10177_v57 = vld [vmem:[#allocation70_spill] sm:$0xff] }
 0x401   : > { %6139 = vset.pattern.permute.xlu0 %v9956_v7  ;;  %v4174_v54 = vadd.f32 %v4142_v49, %v3949_v15  ;;  %3628 = vperm.xlu1 %6121, %v8595_v63   ;;  %v4848_v14 = vadd.f32 %v4816_v11, %v10170_v33  ;;  %v4817_v40 = vmul.f32 %v5884_v51, %v10172_v26  ;;  %v5789_v0 = vld [vmem:[%s10072_s3 + $0x470] sm:$0xff] }
 0x402   : > { %4311 = vperm.xlu0 %6139, %v8461_v46   ;;  %v2995_v48 = vadd.f32 %v8884_v2, %v2959_v36  ;;  %v4891_v56 = vadd.f32 %v4890_v45, %v4889_v31  ;;  %v2404_v28 = vadd.f32 %v10171_v9, %v2125_v6  ;;  %v3500_v13 = vadd.f32 %v3468_v8, %v3243_v20  ;;  %v10174_v59 = vld [vmem:[#allocation75_spill] sm:$0xff]  ;;  %v10176_v36 = vld [vmem:[#allocation66_spill] sm:$0xff]  ;;  %v10179_v6 = vld [vmem:[#allocation80_spill] sm:$0xff] }
 0x403   : > { %v4399_v5 = vadd.f32 %v4367_v10, %v4174_v54  ;;  %v3918_v44 = vmul.f32 %v5757_v4, %v3834_v17  ;;  %v4892_v27 = vsel %vm4868_vm3, %v4848_v14, 0.0  ;;  %v3055_v38 = vld [vmem:[%s10072_s3 + $0x90] sm:$0xff]  ;;  %v10178_v54 = vld [vmem:[#allocation77_spill] sm:$0xff] }
 0x404   : > { %v2682_v23 = vadd.f32 %v10173_v43, %v2404_v28  ;;  %v8897_v60 = vmax.f32 %v2995_v48, 0.0  ;;  %v3725_v49 = vadd.f32 %v3693_v21, %v3500_v13  ;;  %v4893_v42 = vadd.f32 %v4892_v27, %v4891_v56  ;;  %v5697_v62 = vld [vmem:[%s10072_s3 + $0x190] sm:$0xff]  ;;  %v10180_v27 = vld [vmem:[#allocation56_spill] sm:$0xff] }
 0x405   : > { %v4624_v39 = vadd.f32 %v4592_v19, %v4399_v5  ;;  %v5821_v51 = vld [vmem:[%s10072_s3 + $0x570] sm:$0xff] }
 0x406   : > { %v3162_v18 = vpop.permute.xlu0 %3161  ;;  %6109 = vset.pattern.permute.xlu2 %v9956_v7  ;;  %v2960_v32 = vadd.f32 %v10174_v59, %v2682_v23  ;;  %v3950_v30 = vadd.f32 %v3918_v44, %v3725_v49  ;;  %v5853_v21 = vld [vmem:[%s10072_s3 + $0x670] sm:$0xff]  ;;  %v5695_v44 = vld [vmem:[%s10072_s3 + $0x180] sm:$0xff] }
 0x407   : > { %v4849_v41 = vadd.f32 %v4817_v40, %v4624_v39  ;;  %4295 = vperm.xlu2 %6109, %v8195_v29   ;;  %v10175_v29 = vld [vmem:[#allocation10_spill] sm:$0xff]  ;;  %v3247_v34 = vmul.f32 %v3162_v18, %v3055_v38  ;;  %v3053_v23 = vld [vmem:[%s10072_s3 + $0x80] sm:$0xff] }
 0x408   : > { %v4059_v1 = vpop.permute.xlu2 %4058  ;;  %v8902_v3 = vpop.permute.xlu1 %4512  ;;  %v2126_v53 = vadd.f32 %v10176_v36, %v10175_v29  ;;  %v2996_v17 = vadd.f32 %v8884_v2, %v2960_v32  ;;  %v5885_v59 = vld [vmem:[%s10072_s3 + $0x770] sm:$0xff]  ;;  %v5727_v32 = vld [vmem:[%s10072_s3 + $0x280] sm:$0xff] }
 0x409   : > { %v4894_v11 = vsel %vm4868_vm3, %v4849_v41, 0.0  ;;  %v4143_v15 = vmul.f32 %v5789_v0, %v4059_v1  ;;  %6122 = vset.pattern.permute.xlu1 %v10151_v50  ;;  %v2993_v41 = vadd.f32 %v8884_v2, %v10180_v27  ;;  %v5761_v0 = vld [vmem:[%s10072_s3 + $0x390] sm:$0xff] }
 0x40a   : > { %6147 = vset.pattern.permute.xlu0 %v9961_v24  ;;  %v8907_v12 = vadd.f32 %v4894_v11, %v4893_v42  ;;  %3853 = vperm.xlu1 %6122, %v8595_v63   ;;  %v2405_v45 = vadd.f32 %v10177_v57, %v2126_v53  ;;  %v8925_v8 = vmax.f32 %v2996_v17, 0.0 }
 0x40b   : > { %4540 = vperm.xlu0 %6147, %v8897_v60   ;;  %v4175_v47 = vadd.f32 %v4143_v15, %v3950_v30  ;;  %v8966_v11 = vmax.f32 %v2993_v41, 0.0 }
 0x40c   : > { %v2683_v10 = vadd.f32 %v10178_v54, %v2405_v45 }
 0x40e   : > { %v2961_v33 = vadd.f32 %v10179_v6, %v2683_v10  ;;  %v5886_v10 = vld [vmem:[%s10072_s3 + $0x778] sm:$0xff] }
 0x40f   : > { %v3400_v31 = vpop.permute.xlu0 %3399  ;;  %6117 = vset.pattern.permute.xlu2 %v9961_v24 }
 0x410   : > { %v3472_v61 = vmul.f32 %v5697_v62, %v3400_v31  ;;  %4524 = vperm.xlu2 %6117, %v8212_v16   ;;  %v2997_v56 = vadd.f32 %v8884_v2, %v2961_v33  ;;  %v5729_v16 = vld [vmem:[%s10072_s3 + $0x290] sm:$0xff] }
 0x411   : > { %v4284_v14 = vpop.permute.xlu2 %4283  ;;  %v3152_v19 = vpop.permute.xlu1 %3151  ;;  %v5793_v62 = vld [vmem:[%s10072_s3 + $0x490] sm:$0xff] }
 0x412   : > { %v3504_v4 = vadd.f32 %v3472_v61, %v3247_v34  ;;  %v4368_v5 = vmul.f32 %v5821_v51, %v4284_v14  ;;  %6123 = vset.pattern.permute.xlu1 %v10160_v37  ;;  %v8941_v9 = vmax.f32 %v2997_v56, 0.0  ;;  %v3245_v49 = vmul.f32 %v3152_v19, %v3053_v23  ;;  %v5823_v23 = vld [vmem:[%s10072_s3 + $0x580] sm:$0xff] }
 0x413   : > { %6156 = vset.pattern.permute.xlu0 %v9946_v58  ;;  %4078 = vperm.xlu1 %6123, %v8595_v63  }
 0x414   : > { %4769 = vperm.xlu0 %6156, %v8925_v8   ;;  %v4400_v48 = vadd.f32 %v4368_v5, %v4175_v47  ;;  %v5854_v47 = vld [vmem:[%s10072_s3 + $0x678] sm:$0xff] }
 0x415   : > { %v4594_v45 = vmul.f32 %v5854_v47, %v8902_v3  ;;  %v5759_v3 = vld [vmem:[%s10072_s3 + $0x380] sm:$0xff] }
 0x417   : > { %v4626_v61 = vadd.f32 %v4594_v45, %v8822_v55  ;;  %v5825_v55 = vld [vmem:[%s10072_s3 + $0x590] sm:$0xff] }
 0x418   : > { %v3625_v20 = vpop.permute.xlu0 %3624  ;;  %4528 = vperm.xlu2 %6117, %v8595_v63  }
 0x419   : > { %v3697_v28 = vmul.f32 %v5729_v16, %v3625_v20  ;;  %v5791_v16 = vld [vmem:[%s10072_s3 + $0x480] sm:$0xff] }
 0x41a   : > { %v4509_v26 = vpop.permute.xlu2 %4508  ;;  %v3392_v40 = vpop.permute.xlu1 %3391 }
 0x41b   : > { %v3729_v39 = vadd.f32 %v3697_v28, %v3504_v4  ;;  %v4593_v13 = vmul.f32 %v5853_v21, %v4509_v26  ;;  %6124 = vset.pattern.permute.xlu1 %v9956_v7  ;;  %v3470_v18 = vmul.f32 %v5695_v44, %v3392_v40  ;;  %v5696_v44 = vld [vmem:[%s10072_s3 + $0x188] sm:$0xff] }
 0x41c   : > { %6157 = vset.pattern.permute.xlu0 %v9948_v35  ;;  %4303 = vperm.xlu1 %6124, %v8595_v63  }
 0x41d   : > { %3191 = vperm.xlu0 %6157, %v8941_v9   ;;  %v4625_v43 = vadd.f32 %v4593_v13, %v4400_v48  ;;  %v3502_v30 = vadd.f32 %v3470_v18, %v3245_v49  ;;  %v3054_v13 = vld [vmem:[%s10072_s3 + $0x88] sm:$0xff]  ;;  %v10182_v49 = vld [vmem:[#allocation28_spill] sm:$0xff] }
 0x420   : > { %6125 = vset.pattern.permute.xlu2 %v9946_v58 }
 0x421   : > { %v3850_v42 = vpop.permute.xlu0 %3849  ;;  %4753 = vperm.xlu2 %6125, %v8595_v63  }
 0x422   : > { %v3922_v1 = vmul.f32 %v5761_v0, %v3850_v42  ;;  %v10181_v0 = vld [vmem:[#allocation13_spill] sm:$0xff] }
 0x423   : > { %v4734_v15 = vpop.permute.xlu2 %4733  ;;  %v3617_v29 = vpop.permute.xlu1 %3616  ;;  %v1851_v42 = vadd.f32 %v10182_v49, %v10181_v0 }
 0x424   : > { %v3954_v36 = vadd.f32 %v3922_v1, %v3729_v39  ;;  %v4818_v53 = vmul.f32 %v5885_v59, %v4734_v15  ;;  %v3695_v63 = vmul.f32 %v5727_v32, %v3617_v29  ;;  %6132 = vset.pattern.permute.xlu1 %v9961_v24  ;;  %v10183_v1 = vld [vmem:[#allocation83_spill] sm:$0xff]  ;;  %v10184_v29 = vld [vmem:[#allocation85_spill] sm:$0xff] }
 0x425   : > { %6158 = vset.pattern.permute.xlu0 %v9952_v52  ;;  %4532 = vperm.xlu1 %6132, %v8966_v11  }
 0x426   : > { %3423 = vperm.xlu0 %6158, %v8941_v9   ;;  %v4850_v17 = vadd.f32 %v4818_v53, %v4625_v43  ;;  %v3727_v57 = vadd.f32 %v3695_v63, %v3502_v30  ;;  %v2129_v30 = vadd.f32 %v10183_v1, %v1851_v42  ;;  %v5728_v53 = vld [vmem:[%s10072_s3 + $0x288] sm:$0xff] }
 0x427   : > { %v10185_v63 = vld [vmem:[#allocation89_spill] sm:$0xff] }
 0x428   : > { %v4896_v38 = vsel %vm4868_vm3, %v4850_v17, 0.0  ;;  %v5764_v42 = vld [vmem:[%s10072_s3 + $0x3a8] sm:$0xff] }
 0x429   : > { %v4897_v54 = vadd.f32 %v4896_v38, %v8907_v12  ;;  %6126 = vset.pattern.permute.xlu2 %v9948_v35  ;;  %v10186_v38 = vld [vmem:[#allocation90_spill] sm:$0xff] }
 0x42a   : > { %v4075_v31 = vpop.permute.xlu0 %4074  ;;  %3171 = vperm.xlu2 %6126, %v8966_v11   ;;  %v5856_v1 = vld [vmem:[%s10072_s3 + $0x688] sm:$0xff] }
 0x42b   : > { %v4147_v51 = vmul.f32 %v5793_v62, %v4075_v31  ;;  %v4738_v34 = vpop.permute.xlu2 %4737 }
 0x42c   : > { %v4819_v6 = vmul.f32 %v5886_v10, %v4738_v34  ;;  %v3842_v12 = vpop.permute.xlu1 %3841 }
 0x42d   : > { %v4179_v33 = vadd.f32 %v4147_v51, %v3954_v36  ;;  %v3920_v14 = vmul.f32 %v5759_v3, %v3842_v12  ;;  %4536 = vperm.xlu1 %6132, %v8461_v46   ;;  %v2408_v36 = vadd.f32 %v10184_v29, %v2129_v30  ;;  %v5760_v12 = vld [vmem:[%s10072_s3 + $0x388] sm:$0xff] }
 0x42e   : > { %6159 = vset.pattern.permute.xlu0 %v10131_v25  ;;  %v4851_v19 = vadd.f32 %v4819_v6, %v4626_v61  ;;  %v3058_v61 = vld [vmem:[%s10072_s3 + $0xa8] sm:$0xff] }
 0x42f   : > { %3648 = vperm.xlu0 %6159, %v8941_v9   ;;  %v3952_v4 = vadd.f32 %v3920_v14, %v3727_v57  ;;  %v2686_v47 = vadd.f32 %v10185_v63, %v2408_v36  ;;  %v5855_v57 = vld [vmem:[%s10072_s3 + $0x680] sm:$0xff]  ;;  %v5700_v6 = vld [vmem:[%s10072_s3 + $0x1a8] sm:$0xff] }
 0x430   : > { %v4898_v5 = vsel %vm4868_vm3, %v4851_v19, 0.0  ;;  %v5887_v14 = vld [vmem:[%s10072_s3 + $0x780] sm:$0xff] }
 0x431   : > { %v8994_v48 = vadd.f32 %v4898_v5, %v4897_v54  ;;  %v2964_v62 = vadd.f32 %v10186_v38, %v2686_v47  ;;  %v5796_v38 = vld [vmem:[%s10072_s3 + $0x4a8] sm:$0xff] }
 0x432   : > { %6127 = vset.pattern.permute.xlu2 %v9952_v52 }
 0x433   : > { %v4300_v56 = vpop.permute.xlu0 %4299  ;;  %3407 = vperm.xlu2 %6127, %v8966_v11   ;;  %v3000_v34 = vadd.f32 %v8884_v2, %v2964_v62 }
 0x434   : > { %v4372_v20 = vmul.f32 %v5825_v55, %v4300_v56  ;;  %v3157_v21 = vpop.permute.xlu2 %3156 }
 0x435   : > { %6140 = vset.pattern.permute.xlu1 %v9946_v58  ;;  %v4067_v28 = vpop.permute.xlu1 %4066  ;;  %v3246_v27 = vmul.f32 %v3157_v21, %v3054_v13  ;;  %v9060_v19 = vmax.f32 %v3000_v34, 0.0  ;;  %v5732_v13 = vld [vmem:[%s10072_s3 + $0x2a8] sm:$0xff] }
 0x436   : > { %v9006_v26 = vadd.f32 %v4372_v20, %v4179_v33  ;;  %v4145_v40 = vmul.f32 %v5791_v16, %v4067_v28  ;;  %4761 = vperm.xlu1 %6140, %v8461_v46  }
 0x437   : > { %6160 = vset.pattern.permute.xlu0 %v10151_v50 }
 0x438   : > { %3873 = vperm.xlu0 %6160, %v8941_v9   ;;  %v4177_v39 = vadd.f32 %v4145_v40, %v3952_v4 }
 0x43b   : > { %6128 = vset.pattern.permute.xlu2 %v10131_v25 }
 0x43c   : > { %v9017_v43 = vpop.permute.xlu0 %4749  ;;  %3632 = vperm.xlu2 %6128, %v8966_v11  }
 0x43d   : > { %v3396_v46 = vpop.permute.xlu2 %3395 }
 0x43e   : > { %v3471_v41 = vmul.f32 %v5696_v44, %v3396_v46  ;;  %6141 = vset.pattern.permute.xlu1 %v9948_v35  ;;  %v4292_v18 = vpop.permute.xlu1 %4291 }
 0x43f   : > { %v4370_v59 = vmul.f32 %v5823_v23, %v4292_v18  ;;  %3181 = vperm.xlu1 %6141, %v8897_v60   ;;  %v5792_v23 = vld [vmem:[%s10072_s3 + $0x488] sm:$0xff] }
 0x440   : > { %6161 = vset.pattern.permute.xlu0 %v10160_v37  ;;  %v3503_v32 = vadd.f32 %v3471_v41, %v3246_v27 }
 0x441   : > { %4098 = vperm.xlu0 %6161, %v8941_v9   ;;  %v4402_v15 = vadd.f32 %v4370_v59, %v4177_v39  ;;  %v5824_v59 = vld [vmem:[%s10072_s3 + $0x588] sm:$0xff] }
 0x444   : > { %6129 = vset.pattern.permute.xlu2 %v10151_v50 }
 0x445   : > { %v3177_v17 = vpop.permute.xlu0 %3176  ;;  %3857 = vperm.xlu2 %6129, %v8966_v11  }
 0x446   : > { %v3621_v45 = vpop.permute.xlu2 %3620  ;;  %v3250_v4 = vmul.f32 %v3177_v17, %v3058_v61 }
 0x447   : > { %v3696_v54 = vmul.f32 %v5728_v53, %v3621_v45  ;;  %6142 = vset.pattern.permute.xlu1 %v9952_v52  ;;  %v4517_v10 = vpop.permute.xlu1 %4516  ;;  %v5888_v53 = vld [vmem:[%s10072_s3 + $0x788] sm:$0xff]  ;;  %v3056_v45 = vld [vmem:[%s10072_s3 + $0x98] sm:$0xff] }
 0x448   : > { %v4595_v31 = vmul.f32 %v5855_v57, %v4517_v10  ;;  %3415 = vperm.xlu1 %6142, %v8897_v60  }
 0x449   : > { %6162 = vset.pattern.permute.xlu0 %v9956_v7  ;;  %v3728_v3 = vadd.f32 %v3696_v54, %v3503_v32  ;;  %v5857_v54 = vld [vmem:[%s10072_s3 + $0x690] sm:$0xff] }
 0x44a   : > { %4323 = vperm.xlu0 %6162, %v8941_v9   ;;  %v4627_v51 = vadd.f32 %v4595_v31, %v4402_v15  ;;  %v5889_v31 = vld [vmem:[%s10072_s3 + $0x790] sm:$0xff] }
 0x44d   : > { %6130 = vset.pattern.permute.xlu2 %v10160_v37 }
 0x44e   : > { %v3412_v33 = vpop.permute.xlu0 %3411  ;;  %4082 = vperm.xlu2 %6130, %v8966_v11  }
 0x44f   : > { %v3475_v5 = vmul.f32 %v5700_v6, %v3412_v33  ;;  %v3846_v55 = vpop.permute.xlu2 %3845 }
 0x450   : > { %v3921_v56 = vmul.f32 %v5760_v12, %v3846_v55  ;;  %6143 = vset.pattern.permute.xlu1 %v10131_v25  ;;  %v4742_v16 = vpop.permute.xlu1 %4741 }
 0x451   : > { %v3507_v20 = vadd.f32 %v3475_v5, %v3250_v4  ;;  %v4820_v21 = vmul.f32 %v5887_v14, %v4742_v16  ;;  %3640 = vperm.xlu1 %6143, %v8897_v60   ;;  %v4822_v5 = vmul.f32 %v5889_v31, %v9017_v43  ;;  %v10187_v16 = vld [vmem:[#allocation14_spill] sm:$0xff]  ;;  %v5730_v43 = vld [vmem:[%s10072_s3 + $0x298] sm:$0xff] }
 0x452   : > { %6178 = vset.pattern.permute.xlu0 %v9948_v35  ;;  %v3953_v28 = vadd.f32 %v3921_v56, %v3728_v3 }
 0x453   : > { %3206 = vperm.xlu0 %6178, %v9060_v19   ;;  %v4852_v40 = vadd.f32 %v4820_v21, %v4627_v51 }
 0x455   : > { %v4900_v39 = vsel %vm4868_vm3, %v4852_v40, 0.0  ;;  %v10189_v40 = vld [vmem:[#allocation76_spill] sm:$0xff] }
 0x456   : > { %v4901_v44 = vadd.f32 %v4900_v39, %v8994_v48  ;;  %6131 = vset.pattern.permute.xlu2 %v9956_v7 }
 0x457   : > { %v3637_v46 = vpop.permute.xlu0 %3636  ;;  %4307 = vperm.xlu2 %6131, %v8966_v11  }
 0x458   : > { %v3700_v27 = vmul.f32 %v5732_v13, %v3637_v46  ;;  %v4071_v41 = vpop.permute.xlu2 %4070  ;;  %v4746_v18 = vpop.permute.xlu1 %4745  ;;  %v5828_v13 = vld [vmem:[%s10072_s3 + $0x5a8] sm:$0xff] }
 0x459   : > { %v4146_v0 = vmul.f32 %v5792_v23, %v4071_v41  ;;  %6144 = vset.pattern.permute.xlu1 %v10151_v50  ;;  %v4821_v17 = vmul.f32 %v5888_v53, %v4746_v18 }
 0x45a   : > { %v3732_v49 = vadd.f32 %v3700_v27, %v3507_v20  ;;  %3865 = vperm.xlu1 %6144, %v8897_v60   ;;  %v10188_v20 = vld [vmem:[#allocation73_spill] sm:$0xff] }
 0x45b   : > { %6179 = vset.pattern.permute.xlu0 %v9952_v52  ;;  %v4178_v48 = vadd.f32 %v4146_v0, %v3953_v28  ;;  %v2127_v21 = vadd.f32 %v10188_v20, %v10187_v16  ;;  %v2653_v16 = vpop.f32.mrf.mxu3 }
 0x45c   : > { %3435 = vperm.xlu0 %6179, %v9060_v19  }
 0x45d   : > { %v2406_v39 = vadd.f32 %v10189_v40, %v2127_v21  ;;  %v3057_v40 = vld [vmem:[%s10072_s3 + $0xa0] sm:$0xff] }
 0x45f   : > { %6133 = vset.pattern.permute.xlu2 %v9946_v58 }
 0x460   : > { %v3862_v32 = vpop.permute.xlu0 %3861  ;;  %4757 = vperm.xlu2 %6133, %v8966_v11   ;;  %v4596_v11 = vmul.f32 %v5856_v1, %v8842_v22  ;;  %v5698_v22 = vld [vmem:[%s10072_s3 + $0x198] sm:$0xff] }
 0x461   : > { %v3925_v30 = vmul.f32 %v5764_v42, %v3862_v32  ;;  %v4296_v15 = vpop.permute.xlu2 %4295  ;;  %v3167_v29 = vpop.permute.xlu1 %3166 }
 0x462   : > { %v4371_v36 = vmul.f32 %v5824_v59, %v4296_v15  ;;  %6145 = vset.pattern.permute.xlu1 %v10160_v37  ;;  %v3248_v51 = vmul.f32 %v3167_v29, %v3056_v45 }
 0x463   : > { %v3957_v63 = vadd.f32 %v3925_v30, %v3732_v49  ;;  %4090 = vperm.xlu1 %6145, %v8897_v60   ;;  %v10191_v49 = vld [vmem:[#allocation42_spill] sm:$0xff]  ;;  %v5762_v30 = vld [vmem:[%s10072_s3 + $0x398] sm:$0xff] }
 0x464   : > { %6180 = vset.pattern.permute.xlu0 %v10131_v25  ;;  %v4403_v47 = vadd.f32 %v4371_v36, %v4178_v48 }
 0x465   : > { %3660 = vperm.xlu0 %6180, %v9060_v19  }
 0x466   : > { %v4628_v57 = vadd.f32 %v4596_v11, %v4403_v47  ;;  %v10193_v11 = vld [vmem:[#allocation17_spill] sm:$0xff] }
 0x468   : > { %v4853_v62 = vadd.f32 %v4821_v17, %v4628_v57  ;;  %6149 = vset.pattern.permute.xlu2 %v9948_v35  ;;  %v10194_v57 = vld [vmem:[#allocation86_spill] sm:$0xff] }
 0x469   : > { %3186 = vperm.xlu2 %6149, %v8925_v8  }
 0x46a   : > { %v4902_v3 = vsel %vm4868_vm3, %v4853_v62, 0.0  ;;  %v4525_v61 = vpop.permute.xlu2 %4524  ;;  %v3404_v6 = vpop.permute.xlu1 %3403 }
 0x46b   : > { %v4087_v10 = vpop.permute.xlu0 %4086  ;;  %v4597_v12 = vmul.f32 %v5857_v54, %v4525_v61  ;;  %v4903_v33 = vadd.f32 %v4902_v3, %v4901_v44  ;;  %v3473_v14 = vmul.f32 %v5698_v22, %v3404_v6  ;;  %6146 = vset.pattern.permute.xlu1 %v9956_v7  ;;  %v5794_v54 = vld [vmem:[%s10072_s3 + $0x498] sm:$0xff] }
 0x46c   : > { %v4150_v34 = vmul.f32 %v5796_v38, %v4087_v10  ;;  %4315 = vperm.xlu1 %6146, %v8897_v60   ;;  %v10195_v38 = vld [vmem:[#allocation88_spill] sm:$0xff]  ;;  %v10196_v22 = vld [vmem:[#allocation91_spill] sm:$0xff] }
 0x46d   : > { %6181 = vset.pattern.permute.xlu0 %v10151_v50  ;;  %v4629_v55 = vadd.f32 %v4597_v12, %v9006_v26  ;;  %v3505_v56 = vadd.f32 %v3473_v14, %v3248_v51  ;;  %v10190_v26 = vld [vmem:[#allocation82_spill] sm:$0xff]  ;;  %v2096_v51 = vpop.f32.mrf.mxu1  ;;  %v10197_v61 = vld [vmem:[#allocation20_spill] sm:$0xff] }
 0x46e   : > { %v4182_v4 = vadd.f32 %v4150_v34, %v3957_v63  ;;  %3885 = vperm.xlu0 %6181, %v9060_v19   ;;  %v2684_v23 = vadd.f32 %v10190_v26, %v2406_v39  ;;  %v10192_v63 = vld [vmem:[#allocation32_spill] sm:$0xff] }
 0x46f   : > { %v4854_v28 = vadd.f32 %v4822_v5, %v4629_v55  ;;  %v1852_v47 = vadd.f32 %v10193_v11, %v10192_v63  ;;  %v10198_v6 = vld [vmem:[#allocation16_spill] sm:$0xff]  ;;  %v2375_v5 = vpop.f32.mrf.mxu2 }
 0x470   : > { %v2962_v48 = vadd.f32 %v10191_v49, %v2684_v23  ;;  %v1854_v12 = vadd.f32 %v10198_v6, %v10197_v61  ;;  %v5699_v39 = vld [vmem:[%s10072_s3 + $0x1a0] sm:$0xff] }
 0x471   : > { %v4904_v44 = vsel %vm4868_vm3, %v4854_v28, 0.0  ;;  %6150 = vset.pattern.permute.xlu2 %v9952_v52  ;;  %v2130_v45 = vadd.f32 %v10194_v57, %v1852_v47  ;;  %v2931_v28 = vpop.f32.mrf.mxu0  ;;  %v3061_v47 = vld [vmem:[%s10072_s3 + $0xc0] sm:$0xff] }
 0x472   : > { %v9135_v46 = vadd.f32 %v4904_v44, %v4903_v33  ;;  %3419 = vperm.xlu2 %6150, %v8925_v8   ;;  %v9138_v41 = vpop.permute.xlu2 %4528  ;;  %v2998_v1 = vadd.f32 %v8884_v2, %v2962_v48  ;;  %v10199_v33 = vld [vmem:[#allocation92_spill] sm:$0xff]  ;;  %v2132_v55 = vadd.f32 %v2096_v51, %v1854_v12 }
 0x473   : > { %v3629_v0 = vpop.permute.xlu1 %3628  ;;  %v2409_v62 = vadd.f32 %v10195_v38, %v2130_v45  ;;  %v5826_v44 = vld [vmem:[%s10072_s3 + $0x598] sm:$0xff]  ;;  %v5731_v57 = vld [vmem:[%s10072_s3 + $0x2a0] sm:$0xff] }
 0x474   : > { %v4312_v27 = vpop.permute.xlu0 %4311  ;;  %v3698_v42 = vmul.f32 %v5730_v43, %v3629_v0  ;;  %6148 = vset.pattern.permute.xlu1 %v9946_v58  ;;  %v9155_v36 = vmax.f32 %v2998_v1, 0.0  ;;  %v2411_v21 = vadd.f32 %v2375_v5, %v2132_v55  ;;  %v5735_v6 = vld [vmem:[%s10072_s3 + $0x2c0] sm:$0xff] }
 0x475   : > { %v4375_v18 = vmul.f32 %v5828_v13, %v4312_v27  ;;  %4765 = vperm.xlu1 %6148, %v8897_v60   ;;  %v2687_v10 = vadd.f32 %v10196_v22, %v2409_v62  ;;  %v5763_v12 = vld [vmem:[%s10072_s3 + $0x3a0] sm:$0xff] }
 0x476   : > { %6182 = vset.pattern.permute.xlu0 %v10160_v37  ;;  %v3730_v32 = vadd.f32 %v3698_v42, %v3505_v56  ;;  %v2689_v13 = vadd.f32 %v2653_v16, %v2411_v21 }
 0x477   : > { %v9143_v59 = vadd.f32 %v4375_v18, %v4182_v4  ;;  %4110 = vperm.xlu0 %6182, %v9060_v19   ;;  %v2965_v14 = vadd.f32 %v10199_v33, %v2687_v10  ;;  %v5858_v18 = vld [vmem:[%s10072_s3 + $0x698] sm:$0xff] }
 0x478   : > { %v2967_v27 = vadd.f32 %v2931_v28, %v2689_v13  ;;  %v5795_v28 = vld [vmem:[%s10072_s3 + $0x4a0] sm:$0xff] }
 0x479   : > { %v3001_v20 = vadd.f32 %v8884_v2, %v2965_v14 }
 0x47a   : > { %6151 = vset.pattern.permute.xlu2 %v10131_v25 }
 0x47b   : > { %3644 = vperm.xlu2 %6151, %v8925_v8   ;;  %v4754_v29 = vpop.permute.xlu2 %4753  ;;  %v9192_v23 = vmax.f32 %v3001_v20, 0.0 }
 0x47c   : > { %v3854_v53 = vpop.permute.xlu1 %3853 }
 0x47d   : > { %v9152_v15 = vpop.permute.xlu0 %4540  ;;  %v3923_v60 = vmul.f32 %v5762_v30, %v3854_v53  ;;  %6164 = vset.pattern.permute.xlu1 %v9948_v35  ;;  %v4598_v30 = vmul.f32 %v5858_v18, %v9138_v41 }
 0x47e   : > { %3196 = vperm.xlu1 %6164, %v9155_v36  }
 0x47f   : > { %6183 = vset.pattern.permute.xlu0 %v9956_v7  ;;  %v3955_v17 = vadd.f32 %v3923_v60, %v3730_v32  ;;  %v5890_v32 = vld [vmem:[%s10072_s3 + $0x798] sm:$0xff]  ;;  %v3003_v60 = vadd.f32 %v8884_v2, %v2967_v27 }
 0x480   : > { %4335 = vperm.xlu0 %6183, %v9060_v19   ;;  %v4823_v63 = vmul.f32 %v5890_v32, %v4754_v29 }
 0x481   : > { %v9216_v41 = vmax.f32 %v3003_v60, 0.0 }
 0x483   : > { %6152 = vset.pattern.permute.xlu2 %v10151_v50 }
 0x484   : > { %3869 = vperm.xlu2 %6152, %v8925_v8   ;;  %v3172_v3 = vpop.permute.xlu2 %3171 }
 0x485   : > { %v4079_v34 = vpop.permute.xlu1 %4078  ;;  %v3249_v0 = vmul.f32 %v3172_v3, %v3057_v40  ;;  %v5892_v40 = vld [vmem:[%s10072_s3 + $0x7a8] sm:$0xff] }
 0x486   : > { %v9170_v31 = vpop.permute.xlu0 %4769  ;;  %v4148_v4 = vmul.f32 %v5794_v54, %v4079_v34  ;;  %6165 = vset.pattern.permute.xlu1 %v9952_v52 }
 0x487   : > { %3427 = vperm.xlu1 %6165, %v9155_v36  }
 0x488   : > { %6184 = vset.pattern.permute.xlu0 %v9961_v24  ;;  %v4180_v56 = vadd.f32 %v4148_v4, %v3955_v17  ;;  %v5703_v17 = vld [vmem:[%s10072_s3 + $0x1c0] sm:$0xff] }
 0x489   : > { %4560 = vperm.xlu0 %6184, %v9060_v19  }
 0x48c   : > { %6153 = vset.pattern.permute.xlu2 %v10160_v37 }
 0x48d   : > { %4094 = vperm.xlu2 %6153, %v8925_v8   ;;  %v3408_v26 = vpop.permute.xlu2 %3407 }
 0x48e   : > { %v3474_v49 = vmul.f32 %v5699_v39, %v3408_v26  ;;  %v4304_v48 = vpop.permute.xlu1 %4303 }
 0x48f   : > { %v3192_v43 = vpop.permute.xlu0 %3191  ;;  %v4373_v42 = vmul.f32 %v5826_v44, %v4304_v48  ;;  %6166 = vset.pattern.permute.xlu1 %v10131_v25  ;;  %v5827_v48 = vld [vmem:[%s10072_s3 + $0x5a0] sm:$0xff] }
 0x490   : > { %v3506_v1 = vadd.f32 %v3474_v49, %v3249_v0  ;;  %3652 = vperm.xlu1 %6166, %v9155_v36   ;;  %v3253_v62 = vmul.f32 %v3192_v43, %v3061_v47  ;;  %v5799_v49 = vld [vmem:[%s10072_s3 + $0x4c0] sm:$0xff] }
 0x491   : > { %6192 = vset.pattern.permute.xlu0 %v9946_v58  ;;  %v4405_v53 = vadd.f32 %v4373_v42, %v4180_v56  ;;  %v5859_v42 = vld [vmem:[%s10072_s3 + $0x6a0] sm:$0xff] }
 0x492   : > { %4789 = vperm.xlu0 %6192, %v9192_v23  }
 0x493   : > { %v4630_v11 = vadd.f32 %v4598_v30, %v4405_v53 }
 0x495   : > { %v4855_v45 = vadd.f32 %v4823_v63, %v4630_v11  ;;  %6154 = vset.pattern.permute.xlu2 %v9956_v7 }
 0x496   : > { %4319 = vperm.xlu2 %6154, %v8925_v8   ;;  %v3633_v29 = vpop.permute.xlu2 %3632 }
 0x497   : > { %v3699_v22 = vmul.f32 %v5731_v57, %v3633_v29  ;;  %v4533_v10 = vpop.permute.xlu1 %4532  ;;  %v4906_v3 = vsel %vm4868_vm3, %v4855_v45, 0.0  ;;  %v5831_v45 = vld [vmem:[%s10072_s3 + $0x5c0] sm:$0xff]  ;;  %v3059_v29 = vld [vmem:[%s10072_s3 + $0xb0] sm:$0xff] }
 0x498   : > { %v3424_v38 = vpop.permute.xlu0 %3423  ;;  %6167 = vset.pattern.permute.xlu1 %v10151_v50  ;;  %v9223_v51 = vadd.f32 %v4906_v3, %v9135_v46  ;;  %v5860_v46 = vld [vmem:[%s10072_s3 + $0x6a8] sm:$0xff]  ;;  %v4599_v63 = vmul.f32 %v5859_v42, %v4533_v10  ;;  %v2099_v10 = vpop.f32.mrf.mxu1  ;;  %v3060_v42 = vld [vmem:[%s10072_s3 + $0xb8] sm:$0xff] }
 0x499   : > { %v3478_v54 = vmul.f32 %v5703_v17, %v3424_v38  ;;  %v3731_v61 = vadd.f32 %v3699_v22, %v3506_v1  ;;  %3877 = vperm.xlu1 %6167, %v9155_v36   ;;  %v5891_v38 = vld [vmem:[%s10072_s3 + $0x7a0] sm:$0xff] }
 0x49a   : > { %6201 = vset.pattern.permute.xlu0 %v9948_v35 }
 0x49b   : > { %v3510_v34 = vadd.f32 %v3478_v54, %v3253_v62  ;;  %3221 = vperm.xlu0 %6201, %v9216_v41   ;;  %v5701_v62 = vld [vmem:[%s10072_s3 + $0x1b0] sm:$0xff] }
 0x49e   : > { %6155 = vset.pattern.permute.xlu2 %v9961_v24 }
 0x49f   : > { %4544 = vperm.xlu2 %6155, %v8925_v8   ;;  %v3858_v14 = vpop.permute.xlu2 %3857  ;;  %v4537_v55 = vpop.permute.xlu1 %4536  ;;  %v5767_v8 = vld [vmem:[%s10072_s3 + $0x3c0] sm:$0xff] }
 0x4a0   : > { %v3924_v5 = vmul.f32 %v5763_v12, %v3858_v14  ;;  %v4600_v56 = vmul.f32 %v5860_v46, %v4537_v55  ;;  %v10202_v12 = vld [vmem:[#allocation12_spill] sm:$0xff] }
 0x4a1   : > { %v3649_v33 = vpop.permute.xlu0 %3648  ;;  %6168 = vset.pattern.permute.xlu1 %v10160_v37 }
 0x4a2   : > { %v3703_v4 = vmul.f32 %v5735_v6, %v3649_v33  ;;  %v3956_v20 = vadd.f32 %v3924_v5, %v3731_v61  ;;  %4102 = vperm.xlu1 %6168, %v9155_v36   ;;  %v4632_v21 = vadd.f32 %v4600_v56, %v9143_v59  ;;  %v10201_v6 = vld [vmem:[#allocation19_spill] sm:$0xff] }
 0x4a3   : > { %6202 = vset.pattern.permute.xlu0 %v9952_v52  ;;  %v1855_v46 = vadd.f32 %v10202_v12, %v10201_v6 }
 0x4a4   : > { %v3735_v16 = vadd.f32 %v3703_v4, %v3510_v34  ;;  %3447 = vperm.xlu0 %6202, %v9216_v41   ;;  %v2378_v4 = vpop.f32.mrf.mxu2 }
 0x4a5   : > { %v2133_v56 = vadd.f32 %v2099_v10, %v1855_v46 }
 0x4a7   : > { %4548 = vperm.xlu2 %6155, %v8941_v9  }
 0x4a8   : > { %v4083_v13 = vpop.permute.xlu2 %4082  ;;  %v4762_v26 = vpop.permute.xlu1 %4761 }
 0x4a9   : > { %v4149_v43 = vmul.f32 %v5795_v28, %v4083_v13  ;;  %v4825_v59 = vmul.f32 %v5892_v40, %v4762_v26  ;;  %v2934_v40 = vpop.f32.mrf.mxu0 }
 0x4aa   : > { %v3874_v39 = vpop.permute.xlu0 %3873  ;;  %6169 = vset.pattern.permute.xlu1 %v9956_v7 }
 0x4ab   : > { %v3928_v44 = vmul.f32 %v5767_v8, %v3874_v39  ;;  %v4181_v18 = vadd.f32 %v4149_v43, %v3956_v20  ;;  %4327 = vperm.xlu1 %6169, %v9155_v36   ;;  %v4857_v0 = vadd.f32 %v4825_v59, %v4632_v21  ;;  %v2656_v20 = vpop.f32.mrf.mxu3  ;;  %v2412_v8 = vadd.f32 %v2378_v4, %v2133_v56  ;;  %v5766_v4 = vld [vmem:[%s10072_s3 + $0x3b8] sm:$0xff] }
 0x4ac   : > { %6203 = vset.pattern.permute.xlu0 %v10131_v25 }
 0x4ad   : > { %v3960_v27 = vadd.f32 %v3928_v44, %v3735_v16  ;;  %3672 = vperm.xlu0 %6203, %v9216_v41   ;;  %v4910_v39 = vsel %vm4868_vm3, %v4857_v0, 0.0  ;;  %v2690_v13 = vadd.f32 %v2656_v20, %v2412_v8  ;;  %v5733_v44 = vld [vmem:[%s10072_s3 + $0x2b0] sm:$0xff] }
 0x4ae   : > { %v5861_v20 = vld [vmem:[%s10072_s3 + $0x6b0] sm:$0xff] }
 0x4af   : > { %6163 = vset.pattern.permute.xlu2 %v9946_v58 }
 0x4b0   : > { %4773 = vperm.xlu2 %6163, %v8941_v9   ;;  %v10200_v9 = vld [vmem:[#allocation87_spill] sm:$0xff] }
 0x4b1   : > { %v4308_v1 = vpop.permute.xlu2 %4307  ;;  %v3182_v60 = vpop.permute.xlu1 %3181  ;;  %v2999_v17 = vadd.f32 %v8884_v2, %v10200_v9 }
 0x4b2   : > { %v4374_v53 = vmul.f32 %v5827_v48, %v4308_v1  ;;  %v3251_v33 = vmul.f32 %v3182_v60, %v3059_v29  ;;  %v3064_v48 = vld [vmem:[%s10072_s3 + $0xd8] sm:$0xff]  ;;  %v5765_v1 = vld [vmem:[%s10072_s3 + $0x3b0] sm:$0xff] }
 0x4b3   : > { %v4099_v32 = vpop.permute.xlu0 %4098  ;;  %6170 = vset.pattern.permute.xlu1 %v9961_v24  ;;  %v9287_v54 = vmax.f32 %v2999_v17, 0.0 }
 0x4b4   : > { %v4153_v30 = vmul.f32 %v5799_v49, %v4099_v32  ;;  %v4406_v47 = vadd.f32 %v4374_v53, %v4181_v18  ;;  %4552 = vperm.xlu1 %6170, %v9155_v36   ;;  %v5706_v32 = vld [vmem:[%s10072_s3 + $0x1d8] sm:$0xff] }
 0x4b5   : > { %6204 = vset.pattern.permute.xlu0 %v10151_v50 }
 0x4b6   : > { %v4185_v11 = vadd.f32 %v4153_v30, %v3960_v27  ;;  %3897 = vperm.xlu0 %6204, %v9216_v41   ;;  %v4631_v57 = vadd.f32 %v4599_v63, %v4406_v47  ;;  %v2968_v27 = vadd.f32 %v2934_v40, %v2690_v13 }
 0x4b8   : > { %4777 = vperm.xlu2 %6163, %v9155_v36   ;;  %v3004_v49 = vadd.f32 %v8884_v2, %v2968_v27  ;;  %v5702_v2 = vld [vmem:[%s10072_s3 + $0x1b8] sm:$0xff] }
 0x4b9   : > { %v5802_v27 = vld [vmem:[%s10072_s3 + $0x4d8] sm:$0xff] }
 0x4ba   : > { %v4758_v36 = vpop.permute.xlu2 %4757  ;;  %v3416_v61 = vpop.permute.xlu1 %3415  ;;  %v9328_v30 = vmax.f32 %v3004_v49, 0.0 }
 0x4bb   : > { %v4824_v34 = vmul.f32 %v5891_v38, %v4758_v36  ;;  %v3476_v14 = vmul.f32 %v5701_v62, %v3416_v61  ;;  %v5738_v62 = vld [vmem:[%s10072_s3 + $0x2d8] sm:$0xff] }
 0x4bc   : > { %v4324_v22 = vpop.permute.xlu0 %4323  ;;  %4556 = vperm.xlu1 %6170, %v9287_v54  }
 0x4bd   : > { %v4378_v3 = vmul.f32 %v5831_v45, %v4324_v22  ;;  %v4856_v55 = vadd.f32 %v4824_v34, %v4631_v57  ;;  %v3508_v16 = vadd.f32 %v3476_v14, %v3251_v33  ;;  %v5797_v22 = vld [vmem:[%s10072_s3 + $0x4b0] sm:$0xff]  ;;  %v5770_v14 = vld [vmem:[%s10072_s3 + $0x3d8] sm:$0xff] }
 0x4be   : > { %6205 = vset.pattern.permute.xlu0 %v10160_v37 }
 0x4bf   : > { %v9293_v5 = vadd.f32 %v4378_v3, %v4185_v11  ;;  %4122 = vperm.xlu0 %6205, %v9216_v41   ;;  %v4908_v21 = vsel %vm4868_vm3, %v4856_v55, 0.0  ;;  %v5829_v55 = vld [vmem:[%s10072_s3 + $0x5b0] sm:$0xff] }
 0x4c0   : > { %v4909_v28 = vadd.f32 %v4908_v21, %v9223_v51  ;;  %6171 = vset.pattern.permute.xlu2 %v9948_v35 }
 0x4c1   : > { %3201 = vperm.xlu2 %6171, %v9287_v54  }
 0x4c2   : > { %v9304_v43 = vadd.f32 %v4910_v39, %v4909_v28 }
 0x4c3   : > { %v3187_v59 = vpop.permute.xlu2 %3186  ;;  %v3641_v18 = vpop.permute.xlu1 %3640 }
 0x4c4   : > { %6177 = vset.pattern.permute.xlu1 %v9946_v58  ;;  %v3701_v51 = vmul.f32 %v5733_v44, %v3641_v18  ;;  %v3252_v11 = vmul.f32 %v3187_v59, %v3060_v42  ;;  %v4601_v44 = vmul.f32 %v5861_v20, %v9152_v15  ;;  %v5798_v18 = vld [vmem:[%s10072_s3 + $0x4b8] sm:$0xff] }
 0x4c5   : > { %v3207_v26 = vpop.permute.xlu0 %3206  ;;  %4781 = vperm.xlu1 %6177, %v9287_v54  }
 0x4c6   : > { %v3733_v0 = vadd.f32 %v3701_v51, %v3508_v16  ;;  %v3256_v63 = vmul.f32 %v3207_v26, %v3064_v48  ;;  %v5893_v51 = vld [vmem:[%s10072_s3 + $0x7b0] sm:$0xff] }
 0x4c7   : > { %6206 = vset.pattern.permute.xlu0 %v9956_v7 }
 0x4c8   : > { %4347 = vperm.xlu0 %6206, %v9216_v41  }
 0x4c9   : > { %6172 = vset.pattern.permute.xlu2 %v9952_v52 }
 0x4ca   : > { %3431 = vperm.xlu2 %6172, %v9287_v54  }
 0x4cc   : > { %v3420_v60 = vpop.permute.xlu2 %3419  ;;  %v3866_v17 = vpop.permute.xlu1 %3865 }
 0x4cd   : > { %v3477_v9 = vmul.f32 %v5702_v2, %v3420_v60  ;;  %4785 = vperm.xlu1 %6177, %v9060_v19   ;;  %v3926_v57 = vmul.f32 %v5765_v1, %v3866_v17  ;;  %v5734_v19 = vld [vmem:[%s10072_s3 + $0x2b8] sm:$0xff] }
 0x4ce   : > { %v3436_v53 = vpop.permute.xlu0 %3435 }
 0x4cf   : > { %v3481_v47 = vmul.f32 %v5706_v32, %v3436_v53  ;;  %v3509_v38 = vadd.f32 %v3477_v9, %v3252_v11  ;;  %v3958_v29 = vadd.f32 %v3926_v57, %v3733_v0  ;;  %v5830_v11 = vld [vmem:[%s10072_s3 + $0x5b8] sm:$0xff] }
 0x4d0   : > { %6215 = vset.pattern.permute.xlu0 %v9946_v58 }
 0x4d1   : > { %v3513_v45 = vadd.f32 %v3481_v47, %v3256_v63  ;;  %4801 = vperm.xlu0 %6215, %v9328_v30  }
 0x4d2   : > { %6173 = vset.pattern.permute.xlu2 %v10131_v25 }
 0x4d3   : > { %3656 = vperm.xlu2 %6173, %v9287_v54  }
 0x4d5   : > { %v3645_v10 = vpop.permute.xlu2 %3644  ;;  %6185 = vset.pattern.permute.xlu1 %v9948_v35  ;;  %v4091_v61 = vpop.permute.xlu1 %4090 }
 0x4d6   : > { %v3702_v34 = vmul.f32 %v5734_v19, %v3645_v10  ;;  %3211 = vperm.xlu1 %6185, %v9192_v23   ;;  %v4151_v6 = vmul.f32 %v5797_v22, %v4091_v61  ;;  %v10203_v19 = vld [vmem:[#allocation94_spill] sm:$0xff] }
 0x4d7   : > { %v3661_v36 = vpop.permute.xlu0 %3660 }
 0x4d8   : > { %v3706_v3 = vmul.f32 %v5738_v62, %v3661_v36  ;;  %v3734_v46 = vadd.f32 %v3702_v34, %v3509_v38  ;;  %v4183_v33 = vadd.f32 %v4151_v6, %v3958_v29  ;;  %v5894_v38 = vld [vmem:[%s10072_s3 + $0x7b8] sm:$0xff]  ;;  %v6238_v62 = vld [vmem:[%s9942_s2] ss:$0 sm:$0xff] }
 0x4d9   : > { %v3002_v22 = vadd.f32 %v6238_v62, %v10203_v19  ;;  %v4827_v61 = vmul.f32 %v5894_v38, %v9170_v31  ;;  %v5737_v19 = vld [vmem:[%s10072_s3 + $0x2d0] sm:$0xff] }
 0x4da   : > { %v3738_v12 = vadd.f32 %v3706_v3, %v3513_v45  ;;  %v5704_v45 = vld [vmem:[%s10072_s3 + $0x1c8] sm:$0xff] }
 0x4db   : > { %6174 = vset.pattern.permute.xlu2 %v10151_v50 }
 0x4dc   : > { %3881 = vperm.xlu2 %6174, %v9287_v54  }
 0x4de   : > { %v3870_v16 = vpop.permute.xlu2 %3869  ;;  %6186 = vset.pattern.permute.xlu1 %v9952_v52  ;;  %v4316_v28 = vpop.permute.xlu1 %4315 }
 0x4df   : > { %v3927_v8 = vmul.f32 %v5766_v4, %v3870_v16  ;;  %3439 = vperm.xlu1 %6186, %v9192_v23   ;;  %v4376_v40 = vmul.f32 %v5829_v55, %v4316_v28  ;;  %v5736_v55 = vld [vmem:[%s10072_s3 + $0x2c8] sm:$0xff] }
 0x4e0   : > { %v3886_v56 = vpop.permute.xlu0 %3885 }
 0x4e1   : > { %v3931_v21 = vmul.f32 %v5770_v14, %v3886_v56  ;;  %v3959_v13 = vadd.f32 %v3927_v8, %v3734_v46  ;;  %v4408_v26 = vadd.f32 %v4376_v40, %v4183_v33  ;;  %v9412_v46 = vmax.f32 %v3002_v22, 0.0  ;;  %v5863_v14 = vld [vmem:[%s10072_s3 + $0x6c0] sm:$0xff] }
 0x4e2   : > { %v5895_v40 = vld [vmem:[%s10072_s3 + $0x7c0] sm:$0xff] }
 0x4e3   : > { %v3963_v39 = vadd.f32 %v3931_v21, %v3738_v12  ;;  %v4633_v59 = vadd.f32 %v4601_v44, %v4408_v26 }
 0x4e4   : > { %6175 = vset.pattern.permute.xlu2 %v10160_v37 }
 0x4e5   : > { %4106 = vperm.xlu2 %6175, %v9287_v54  }
 0x4e7   : > { %v4095_v15 = vpop.permute.xlu2 %4094  ;;  %6187 = vset.pattern.permute.xlu1 %v10131_v25  ;;  %v4766_v42 = vpop.permute.xlu1 %4765 }
 0x4e8   : > { %v4152_v48 = vmul.f32 %v5798_v18, %v4095_v15  ;;  %3664 = vperm.xlu1 %6187, %v9192_v23   ;;  %v4826_v32 = vmul.f32 %v5893_v51, %v4766_v42 }
 0x4e9   : > { %v4111_v0 = vpop.permute.xlu0 %4110 }
 0x4ea   : > { %v4156_v49 = vmul.f32 %v5802_v27, %v4111_v0  ;;  %v4184_v1 = vadd.f32 %v4152_v48, %v3959_v13  ;;  %v4858_v53 = vadd.f32 %v4826_v32, %v4633_v59  ;;  %v5800_v0 = vld [vmem:[%s10072_s3 + $0x4c8] sm:$0xff] }
 0x4eb   : > { %v5832_v32 = vld [vmem:[%s10072_s3 + $0x5c8] sm:$0xff] }
 0x4ec   : > { %v9376_v2 = vadd.f32 %v4156_v49, %v3963_v39  ;;  %v4912_v60 = vsel %vm4868_vm3, %v4858_v53, 0.0  ;;  %v5768_v39 = vld [vmem:[%s10072_s3 + $0x3c8] sm:$0xff] }
 0x4ed   : > { %6176 = vset.pattern.permute.xlu2 %v9956_v7  ;;  %v4913_v63 = vadd.f32 %v4912_v60, %v9304_v43  ;;  %v3062_v43 = vld [vmem:[%s10072_s3 + $0xc8] sm:$0xff]  ;;  %v3063_v60 = vld [vmem:[%s10072_s3 + $0xd0] sm:$0xff] }
 0x4ee   : > { %4331 = vperm.xlu2 %6176, %v9287_v54   ;;  %v5862_v54 = vld [vmem:[%s10072_s3 + $0x6b8] sm:$0xff] }
 0x4f0   : > { %v4320_v47 = vpop.permute.xlu2 %4319  ;;  %6188 = vset.pattern.permute.xlu1 %v10151_v50  ;;  %v3197_v17 = vpop.permute.xlu1 %3196 }
 0x4f1   : > { %v4377_v9 = vmul.f32 %v5830_v11, %v4320_v47  ;;  %3889 = vperm.xlu1 %6188, %v9192_v23   ;;  %v3254_v3 = vmul.f32 %v3197_v17, %v3062_v43  ;;  %v4980_v11 = vld [vmem:[%s9803_s6 + $0xc8] sm:$0xff] }
 0x4f2   : > { %5041 = vmatpush.msrb.mxu2 %v4980_v11  ;;  %v5864_v47 = vld [vmem:[%s10072_s3 + $0x6c8] sm:$0xff]  ;;  %v5739_v11 = vld [vmem:[%s10072_s3 + $0x2e0] sm:$0xff] }
 0x4f3   : > { %v4409_v57 = vadd.f32 %v4377_v9, %v4184_v1 }
 0x4f6   : > { %6191 = vset.pattern.permute.xlu2 %v9961_v24 }
 0x4f7   : > { %4564 = vperm.xlu2 %6191, %v9192_v23  }
 0x4f9   : > { %v4545_v29 = vpop.permute.xlu2 %4544  ;;  %6189 = vset.pattern.permute.xlu1 %v10160_v37  ;;  %v3428_v10 = vpop.permute.xlu1 %3427 }
 0x4fa   : > { %v4602_v36 = vmul.f32 %v5862_v54, %v4545_v29  ;;  %4114 = vperm.xlu1 %6189, %v9192_v23   ;;  %v3479_v34 = vmul.f32 %v5704_v45, %v3428_v10 }
 0x4fc   : > { %v4634_v6 = vadd.f32 %v4602_v36, %v4409_v57  ;;  %v3511_v12 = vadd.f32 %v3479_v34, %v3254_v3  ;;  %v5896_v57 = vld [vmem:[%s10072_s3 + $0x7c8] sm:$0xff]  ;;  %v4336_v34 = vpop.permute.xlu0 %4335 }
 0x4fe   : > { %v4859_v33 = vadd.f32 %v4827_v61, %v4634_v6  ;;  %v4979_v6 = vld [vmem:[%s9803_s6 + $0xc0] sm:$0xff] }
 0x4ff   : > { %6193 = vset.pattern.permute.xlu2 %v9948_v35  ;;  %5021 = vmatpush.msrb.mxu1 %v4979_v6 }
 0x500   : > { %v4914_v4 = vsel %vm4868_vm3, %v4859_v33, 0.0  ;;  %3216 = vperm.xlu2 %6193, %v9412_v46   ;;  %v5769_v33 = vld [vmem:[%s10072_s3 + $0x3d0] sm:$0xff] }
 0x501   : > { %v4549_v31 = vpop.permute.xlu2 %4548  ;;  %v4915_v56 = vadd.f32 %v4914_v4, %v4913_v63  ;;  %v5705_v63 = vld [vmem:[%s10072_s3 + $0x1d0] sm:$0xff] }
 0x502   : > { %v4603_v16 = vmul.f32 %v5863_v14, %v4549_v31  ;;  %6190 = vset.pattern.permute.xlu1 %v9956_v7  ;;  %v3653_v20 = vpop.permute.xlu1 %3652  ;;  %v5834_v14 = vld [vmem:[%s10072_s3 + $0x5d8] sm:$0xff] }
 0x503   : > { %v3704_v21 = vmul.f32 %v5736_v55, %v3653_v20  ;;  %4339 = vperm.xlu1 %6190, %v9192_v23   ;;  %v5866_v31 = vld [vmem:[%s10072_s3 + $0x6d8] sm:$0xff]  ;;  %v4381_v20 = vmul.f32 %v5834_v14, %v4336_v34 }
 0x504   : > { %v4635_v8 = vadd.f32 %v4603_v16, %v9293_v5 }
 0x505   : > { %v3736_v28 = vadd.f32 %v3704_v21, %v3511_v12  ;;  %v4981_v12 = vld [vmem:[%s9803_s6 + $0xd0] sm:$0xff] }
 0x506   : > { %5061 = vmatpush.msrb.mxu3 %v4981_v12 }
 0x508   : > { %6194 = vset.pattern.permute.xlu2 %v9952_v52 }
 0x509   : > { %3443 = vperm.xlu2 %6194, %v9412_v46  }
 0x50a   : > { %v4774_v13 = vpop.permute.xlu2 %4773 }
 0x50b   : > { %v4828_v44 = vmul.f32 %v5895_v40, %v4774_v13  ;;  %6207 = vset.pattern.permute.xlu1 %v9961_v24  ;;  %v3878_v23 = vpop.permute.xlu1 %3877 }
 0x50c   : > { %v3929_v26 = vmul.f32 %v5768_v39, %v3878_v23  ;;  %4572 = vperm.xlu1 %6207, %v9216_v41  }
 0x50d   : > { %v4860_v5 = vadd.f32 %v4828_v44, %v4635_v8  ;;  %v5801_v8 = vld [vmem:[%s10072_s3 + $0x4d0] sm:$0xff] }
 0x50e   : > { %v3961_v59 = vadd.f32 %v3929_v26, %v3736_v28  ;;  %v5898_v28 = vld [vmem:[%s10072_s3 + $0x7d8] sm:$0xff] }
 0x50f   : > { %v4916_v27 = vsel %vm4868_vm3, %v4860_v5, 0.0 }
 0x510   : > { %v4917_v18 = vadd.f32 %v4916_v27, %v4915_v56  ;;  %v4561_v56 = vpop.permute.xlu0 %4560 }
 0x511   : > { %6195 = vset.pattern.permute.xlu2 %v10131_v25  ;;  %v4606_v21 = vmul.f32 %v5866_v31, %v4561_v56 }
 0x512   : > { %3668 = vperm.xlu2 %6195, %v9412_v46   ;;  %v4778_v51 = vpop.permute.xlu2 %4777 }
 0x513   : > { %v4829_v38 = vmul.f32 %v5896_v57, %v4778_v51  ;;  %v5771_v57 = vld [vmem:[%s10072_s3 + $0x3e0] sm:$0xff] }
 0x514   : > { %6208 = vset.pattern.permute.xlu1 %v9948_v35  ;;  %v4103_v15 = vpop.permute.xlu1 %4102 }
 0x515   : > { %v4154_v49 = vmul.f32 %v5800_v0, %v4103_v15  ;;  %3226 = vperm.xlu1 %6208, %v9328_v30  }
 0x517   : > { %v4186_v48 = vadd.f32 %v4154_v49, %v3961_v59  ;;  %v5833_v59 = vld [vmem:[%s10072_s3 + $0x5d0] sm:$0xff]  ;;  %v3065_v49 = vld [vmem:[%s10072_s3 + $0xe0] sm:$0xff] }
 0x518   : > { %v4790_v34 = vpop.permute.xlu0 %4789 }
 0x51a   : > { %6196 = vset.pattern.permute.xlu2 %v10151_v50 }
 0x51b   : > { %3893 = vperm.xlu2 %6196, %v9412_v46   ;;  %v3202_v42 = vpop.permute.xlu2 %3201 }
 0x51c   : > { %v3255_v9 = vmul.f32 %v3202_v42, %v3063_v60 }
 0x51d   : > { %6209 = vset.pattern.permute.xlu1 %v9952_v52  ;;  %v4328_v1 = vpop.permute.xlu1 %4327 }
 0x51e   : > { %v4379_v53 = vmul.f32 %v5832_v32, %v4328_v1  ;;  %3451 = vperm.xlu1 %6209, %v9328_v30  }
 0x520   : > { %v4411_v35 = vadd.f32 %v4379_v53, %v4186_v48  ;;  %v5707_v48 = vld [vmem:[%s10072_s3 + $0x1e0] sm:$0xff] }
 0x523   : > { %6197 = vset.pattern.permute.xlu2 %v10160_v37 }
 0x524   : > { %4118 = vperm.xlu2 %6197, %v9412_v46   ;;  %v3432_v52 = vpop.permute.xlu2 %3431 }
 0x525   : > { %v3480_v17 = vmul.f32 %v5705_v63, %v3432_v52 }
 0x526   : > { %6210 = vset.pattern.permute.xlu1 %v10131_v25  ;;  %v4553_v54 = vpop.permute.xlu1 %4552 }
 0x527   : > { %v3512_v43 = vadd.f32 %v3480_v17, %v3255_v9  ;;  %v4604_v45 = vmul.f32 %v5864_v47, %v4553_v54  ;;  %3676 = vperm.xlu1 %6210, %v9328_v30   ;;  %v4972_v54 = vld [vmem:[%s9803_s6 + $0x88] sm:$0xff] }
 0x528   : > { %5042 = vmatpush.msrb.mxu2 %v4972_v54 }
 0x529   : > { %v4636_v29 = vadd.f32 %v4604_v45, %v4411_v35 }
 0x52b   : > { %v4861_v62 = vadd.f32 %v4829_v38, %v4636_v29 }
 0x52c   : > { %6198 = vset.pattern.permute.xlu2 %v9956_v7 }
 0x52d   : > { %v4918_v22 = vsel %vm4868_vm3, %v4861_v62, 0.0  ;;  %4343 = vperm.xlu2 %6198, %v9412_v46   ;;  %v3657_v36 = vpop.permute.xlu2 %3656  ;;  %v4971_v62 = vld [vmem:[%s9803_s6 + $0x80] sm:$0xff] }
 0x52e   : > { %v4919_v25 = vadd.f32 %v4918_v22, %v4917_v18  ;;  %v3705_v10 = vmul.f32 %v5737_v19, %v3657_v36  ;;  %v4557_v3 = vpop.permute.xlu1 %4556  ;;  %v4973_v19 = vld [vmem:[%s9803_s6 + $0x90] sm:$0xff]  ;;  %5022 = vmatpush.msrb.mxu1 %v4971_v62 }
 0x52f   : > { %6211 = vset.pattern.permute.xlu1 %v10151_v50  ;;  %5062 = vmatpush.msrb.mxu3 %v4973_v19 }
 0x530   : > { %v3737_v61 = vadd.f32 %v3705_v10, %v3512_v43  ;;  %3901 = vperm.xlu1 %6211, %v9328_v30  }
 0x535   : > { %6199 = vset.pattern.permute.xlu2 %v9961_v24 }
 0x536   : > { %4568 = vperm.xlu2 %6199, %v9412_v46   ;;  %v3882_v50 = vpop.permute.xlu2 %3881 }
 0x537   : > { %v3930_v4 = vmul.f32 %v5769_v33, %v3882_v50  ;;  %v4782_v55 = vpop.permute.xlu1 %4781  ;;  %v5899_v50 = vld [vmem:[%s10072_s3 + $0x7e0] sm:$0xff] }
 0x538   : > { %6212 = vset.pattern.permute.xlu1 %v10160_v37  ;;  %v4413_v37 = vadd.f32 %v4381_v20, %v9376_v2  ;;  %v4832_v31 = vmul.f32 %v5899_v50, %v4790_v34  ;;  %v3222_v20 = vpop.permute.xlu0 %3221 }
 0x539   : > { %v3962_v16 = vadd.f32 %v3930_v4, %v3737_v61  ;;  %4126 = vperm.xlu1 %6212, %v9328_v30   ;;  %v5867_v61 = vld [vmem:[%s10072_s3 + $0x6e0] sm:$0xff] }
 0x53a   : > { %v4638_v13 = vadd.f32 %v4606_v21, %v4413_v37 }
 0x53e   : > { %6200 = vset.pattern.permute.xlu2 %v9946_v58  ;;  %v5865_v58 = vld [vmem:[%s10072_s3 + $0x6d0] sm:$0xff] }
 0x53f   : > { %4793 = vperm.xlu2 %6200, %v9412_v46   ;;  %v4107_v40 = vpop.permute.xlu2 %4106  ;;  %v4786_v39 = vpop.permute.xlu1 %4785  ;;  %v4605_v18 = vmul.f32 %v5865_v58, %v4557_v3  ;;  %v5835_v3 = vld [vmem:[%s10072_s3 + $0x5e0] sm:$0xff] }
 0x540   : > { %v4155_v44 = vmul.f32 %v5801_v8, %v4107_v40  ;;  %v4831_v23 = vmul.f32 %v5898_v28, %v4786_v39  ;;  %v3448_v39 = vpop.permute.xlu0 %3447 }
 0x541   : > { %6213 = vset.pattern.permute.xlu1 %v9956_v7  ;;  %v5897_v7 = vld [vmem:[%s10072_s3 + $0x7d0] sm:$0xff] }
 0x542   : > { %v4187_v26 = vadd.f32 %v4155_v44, %v3962_v16  ;;  %v4863_v5 = vadd.f32 %v4831_v23, %v4638_v13  ;;  %4351 = vperm.xlu1 %6213, %v9328_v30   ;;  %v4830_v0 = vmul.f32 %v5897_v7, %v4782_v55  ;;  %v5709_v7 = vld [vmem:[%s10072_s3 + $0x1f0] sm:$0xff] }
 0x544   : > { %v4922_v35 = vsel %vm4868_vm3, %v4863_v5, 0.0 }
 0x547   : > { %4797 = vperm.xlu2 %6200, %v9216_v41  }
 0x548   : > { %v4332_v2 = vpop.permute.xlu2 %4331  ;;  %v3212_v46 = vpop.permute.xlu1 %3211 }
 0x549   : > { %v4380_v27 = vmul.f32 %v5833_v59, %v4332_v2  ;;  %v3257_v1 = vmul.f32 %v3212_v46, %v3065_v49  ;;  %v3673_v23 = vpop.permute.xlu0 %3672  ;;  %v5772_v49 = vld [vmem:[%s10072_s3 + $0x3e8] sm:$0xff] }
 0x54a   : > { %6214 = vset.pattern.permute.xlu1 %v9961_v24  ;;  %v6217_v24 = vld [vmem:[%s10204_s28] ss:$0 sm:$0xff]  ;;  %s9661_s28 = sand.u32 1, %s6325_s14  }
 0x54b   : > { %v4412_v51 = vadd.f32 %v4380_v27, %v4187_v26  ;;  %4576 = vperm.xlu1 %6214, %v9328_v30   ;;  %v5708_v27 = vld [vmem:[%s10072_s3 + $0x1e8] sm:$0xff]  ;;  %s372_s11 = scalar_lea.vmem [#allocation3], %s9661_s28  ;;  %s378_s12 = scalar_lea.vmem [#allocation5], %s9661_s28 }
 0x54c   : > { %s5236_s1 = sshll.u32 %s372_s11, 4  ;;  %s5219_s26 = scalar_lea.sflag [#allocation4], %s9661_s28  ;;  %s5237_s1 = int_to_ptr.vmem [resolvable:$true] %s5236_s1 }
 0x54d   : > { %v4637_v15 = vadd.f32 %v4605_v18, %v4412_v51  ;;  %v3066_v18 = vld [vmem:[%s10072_s3 + $0xe8] sm:$0xff] }
 0x54e   : > { %v5740_v51 = vld [vmem:[%s10072_s3 + $0x2e8] sm:$0xff] }
 0x54f   : > { %v4862_v41 = vadd.f32 %v4830_v0, %v4637_v15  ;;  %v3067_v0 = vld [vmem:[%s10072_s3 + $0xf0] sm:$0xff] }
 0x550   : > { %v5741_v15 = vld [vmem:[%s10072_s3 + $0x2f0] sm:$0xff] }
 0x551   : > { %v4920_v42 = vsel %vm4868_vm3, %v4862_v41, 0.0  ;;  %v3440_v32 = vpop.permute.xlu1 %3439  ;;  %v4565_v47 = vpop.permute.xlu2 %4564 }
 0x552   : > { %v4921_v30 = vadd.f32 %v4920_v42, %v4919_v25  ;;  %v3482_v53 = vmul.f32 %v5707_v48, %v3440_v32  ;;  %v5803_v25 = vld [vmem:[%s10072_s3 + $0x4e0] sm:$0xff]  ;;  %v4607_v14 = vmul.f32 %v5867_v61, %v4565_v47  ;;  %v3898_v59 = vpop.permute.xlu0 %3897  ;;  %v3484_v48 = vmul.f32 %v5709_v7, %v3448_v39  ;;  %v4964_v32 = vld [vmem:[%s9803_s6 + $0x48] sm:$0xff]  ;;  %v5805_v47 = vld [vmem:[%s10072_s3 + $0x4f0] sm:$0xff] }
 0x553   : > { %4946 = vrot.lane.b32.xlu1 %v6217_v24, %s6344_s27  ;;  %5043 = vmatpush.msrb.mxu2 %v4964_v32  ;;  %v5869_v61 = vld [vmem:[%s10072_s3 + $0x6f0] sm:$0xff]  ;;  %s6253_s27 = sshra.s32 %s5239_s25, 4  ;;  %s6254_s27 = int_to_ptr.hbm [resolvable:$true] %s6253_s27 }
 0x554   : > { %v3514_v60 = vadd.f32 %v3482_v53, %v3257_v1  ;;  %v4923_v63 = vadd.f32 %v4922_v35, %v4921_v30  ;;  %v4963_v30 = vld [vmem:[%s9803_s6 + $0x40] sm:$0xff]  ;;  %v4965_v1 = vld [vmem:[%s9803_s6 + $0x50] sm:$0xff]  ;;  %s6255_s29 = scalar_lea.hbm %s6254_s27, 1  ;;  %p6260_p0 = scmp.lt.s32.totalorder %s6254_s27, %s9806_s9 }
 0x555   : > { %v5773_v53 = vld [vmem:[%s10072_s3 + $0x3f0] sm:$0xff]  ;;  %5023 = vmatpush.msrb.mxu1 %v4963_v30  ;;  %5063 = vmatpush.msrb.mxu3 %v4965_v1  ;;  %p6256_p11 = scmp.ne.s32.totalorder %s6254_s27, %s6255_s29 }
 0x556   : > { %v3934_v54 = vmul.f32 %v5773_v53, %v3898_v59  ;;  %v5901_v39 = vld [vmem:[%s10072_s3 + $0x7f0] sm:$0xff] }
 0x557   : > { %p6257_p12 = pnand %p6256_p11, %p6439_p5 }
 0x559   : > { %p6258_p13 = pneg %p6257_p12 }
 0x55a   : > { %v3665_v52 = vpop.permute.xlu1 %3664  ;;  %v3217_v38 = vpop.permute.xlu2 %3216 }
 0x55b   : > { %v3707_v9 = vmul.f32 %v5739_v11, %v3665_v52  ;;  %v4123_v46 = vpop.permute.xlu0 %4122  ;;  %v3258_v35 = vmul.f32 %v3217_v38, %v3066_v18  ;;  %v3709_v11 = vmul.f32 %v5741_v15, %v3673_v23  ;;  %v5804_v52 = vld [vmem:[%s10072_s3 + $0x4e8] sm:$0xff]  ;;  %v5837_v38 = vld [vmem:[%s10072_s3 + $0x5f0] sm:$0xff] }
 0x55d   : > { %v3739_v17 = vadd.f32 %v3707_v9, %v3514_v60 }
 0x563   : > { %v3890_v43 = vpop.permute.xlu1 %3889  ;;  %v3444_v36 = vpop.permute.xlu2 %3443 }
 0x564   : > { %v3932_v45 = vmul.f32 %v5771_v57, %v3890_v43  ;;  %v3483_v41 = vmul.f32 %v5708_v27, %v3444_v36  ;;  %v5836_v43 = vld [vmem:[%s10072_s3 + $0x5e8] sm:$0xff]  ;;  %v4159_v36 = vmul.f32 %v5805_v47, %v4123_v46  ;;  %v4955_v47 = vld [vmem:[%s9803_s6] sm:$0xff] }
 0x565   : > { %5024 = vmatpush.msrb.mxu1 %v4955_v47 }
 0x566   : > { %v3964_v29 = vadd.f32 %v3932_v45, %v3739_v17  ;;  %v3515_v9 = vadd.f32 %v3483_v41, %v3258_v35  ;;  %v5710_v45 = vld [vmem:[%s10072_s3 + $0x1f8] sm:$0xff] }
 0x567   : > { %v5870_v41 = vld [vmem:[%s10072_s3 + $0x6f8] sm:$0xff] }
 0x56c   : > { %v4115_v22 = vpop.permute.xlu1 %4114  ;;  %v3669_v55 = vpop.permute.xlu2 %3668 }
 0x56d   : > { %v4157_v10 = vmul.f32 %v5803_v25, %v4115_v22  ;;  %v3708_v60 = vmul.f32 %v5740_v51, %v3669_v55  ;;  %v3068_v25 = vld [vmem:[%s10072_s3 + $0xf8] sm:$0xff] }
 0x56f   : > { %v4189_v12 = vadd.f32 %v4157_v10, %v3964_v29  ;;  %v4348_v29 = vpop.permute.xlu0 %4347  ;;  %v3740_v62 = vadd.f32 %v3708_v60, %v3515_v9  ;;  %v5868_v10 = vld [vmem:[%s10072_s3 + $0x6e8] sm:$0xff]  ;;  %v4957_v9 = vld [vmem:[%s9803_s6 + $0x10] sm:$0xff] }
 0x570   : > { %v4384_v50 = vmul.f32 %v5837_v38, %v4348_v29  ;;  %5064 = vmatpush.msrb.mxu3 %v4957_v9 }
 0x575   : > { %v4340_v6 = vpop.permute.xlu1 %4339  ;;  %v3894_v37 = vpop.permute.xlu2 %3893 }
 0x576   : > { %v4382_v33 = vmul.f32 %v5835_v3, %v4340_v6  ;;  %v3933_v17 = vmul.f32 %v5772_v49, %v3894_v37  ;;  %v5742_v3 = vld [vmem:[%s10072_s3 + $0x2f8] sm:$0xff] }
 0x578   : > { %v4414_v4 = vadd.f32 %v4382_v33, %v4189_v12  ;;  %v3965_v34 = vadd.f32 %v3933_v17, %v3740_v62  ;;  %v4938_v62 = vld [vmem:[%s10205_s4] sm:$0x1] }
 0x57a   : > { %v4639_v56 = vadd.f32 %v4607_v14, %v4414_v4  ;;  %v5900_v14 = vld [vmem:[%s10072_s3 + $0x7e8] sm:$0xff]  ;;  %v5774_v4 = vld [vmem:[%s10072_s3 + $0x3f8] sm:$0xff] }
 0x57c   : > { %v4864_v16 = vadd.f32 %v4832_v31, %v4639_v56 }
 0x57e   : > { %v9560_v21 = vpop.permute.xlu1 %4572  ;;  %v4924_v8 = vsel %vm4868_vm3, %v4864_v16, 0.0  ;;  %v4119_v13 = vpop.permute.xlu2 %4118 }
 0x57f   : > { %v9563_v28 = vadd.f32 %v4924_v8, %v4923_v63  ;;  %v3259_v63 = vmul.f32 %v3222_v20, %v3067_v0  ;;  %v4158_v19 = vmul.f32 %v5804_v52, %v4119_v13  ;;  %v4609_v37 = vmul.f32 %v5869_v61, %v9560_v21  ;;  %v4956_v52 = vld [vmem:[%s9803_s6 + $0x8] sm:$0xff]  ;;  %v4983_v61 = vld [vmem:[%s9803_s6 + $0xe0] sm:$0xff] }
 0x580   : > { %5044 = vmatpush.msrb.mxu2 %v4956_v52 }
 0x581   : > { %v3516_v57 = vadd.f32 %v3484_v48, %v3259_v63  ;;  %v4190_v55 = vadd.f32 %v4158_v19, %v3965_v34 }
 0x582   : > { %5101 = vmatpush.msra.mxu2 %v4983_v61 }
 0x583   : > { %v3741_v22 = vadd.f32 %v3709_v11, %v3516_v57 }
 0x585   : > { %v3966_v33 = vadd.f32 %v3934_v54, %v3741_v22 }
 0x587   : > { %v3227_v40 = vpop.permute.xlu1 %3226  ;;  %v4344_v26 = vpop.permute.xlu2 %4343  ;;  %v4191_v8 = vadd.f32 %v4159_v36, %v3966_v33  ;;  %v4975_v33 = vld [vmem:[%s9803_s6 + $0xa0] sm:$0xff] }
 0x588   : > { %v4383_v6 = vmul.f32 %v5836_v43, %v4344_v26  ;;  %v3260_v31 = vmul.f32 %v3227_v40, %v3068_v25  ;;  %5102 = vmatpush.msra.mxu2 %v4975_v33 }
 0x589   : > { %v4416_v40 = vadd.f32 %v4384_v50, %v4191_v8  ;;  %v4974_v50 = vld [vmem:[%s9803_s6 + $0x98] sm:$0xff] }
 0x58a   : > { %v4415_v23 = vadd.f32 %v4383_v6, %v4190_v55  ;;  %v4982_v6 = vld [vmem:[%s9803_s6 + $0xd8] sm:$0xff] }
 0x58b   : > { %v4641_v18 = vadd.f32 %v4609_v37, %v4416_v40  ;;  %5081 = vmatpush.msra.mxu1 %v4982_v6  ;;  %v4966_v55 = vld [vmem:[%s9803_s6 + $0x58] sm:$0xff]  ;;  %v4961_v40 = vld [vmem:[%s9803_s6 + $0x30] sm:$0xff] }
 0x58d   : > { %5082 = vmatpush.msra.mxu1 %v4974_v50 }
 0x58f   : > { %5083 = vmatpush.msra.mxu1 %v4966_v55 }
 0x590   : > { %v3452_v44 = vpop.permute.xlu1 %3451  ;;  %v4569_v58 = vpop.permute.xlu2 %4568 }
 0x591   : > { %v3485_v12 = vmul.f32 %v5710_v45, %v3452_v44  ;;  %v4608_v56 = vmul.f32 %v5868_v10, %v4569_v58  ;;  %v5806_v44 = vld [vmem:[%s10072_s3 + $0x4f8] sm:$0xff] }
 0x593   : > { %v3517_v26 = vadd.f32 %v3485_v12, %v3260_v31  ;;  %v4640_v58 = vadd.f32 %v4608_v56, %v4415_v23  ;;  %v4984_v12 = vld [vmem:[%s9803_s6 + $0xe8] sm:$0xff]  ;;  %v4959_v56 = vld [vmem:[%s9803_s6 + $0x20] sm:$0xff]  ;;  %v4977_v23 = vld [vmem:[%s9803_s6 + $0xb0] sm:$0xff] }
 0x594   : > { %5121 = vmatpush.msra.mxu3 %v4984_v12  ;;  %v4968_v31 = vld [vmem:[%s9803_s6 + $0x68] sm:$0xff] }
 0x599   : > { %v3677_v5 = vpop.permute.xlu1 %3676  ;;  %v4794_v24 = vpop.permute.xlu2 %4793 }
 0x59a   : > { %v3710_v16 = vmul.f32 %v5742_v3, %v3677_v5  ;;  %v4833_v59 = vmul.f32 %v5900_v14, %v4794_v24  ;;  %v5838_v5 = vld [vmem:[%s10072_s3 + $0x5f8] sm:$0xff]  ;;  %v4802_v24 = vpop.permute.xlu0 %4801  ;;  %v4976_v14 = vld [vmem:[%s9803_s6 + $0xa8] sm:$0xff] }
 0x59b   : > { %5122 = vmatpush.msra.mxu3 %v4976_v14 }
 0x59c   : > { %v3742_v21 = vadd.f32 %v3710_v16, %v3517_v26  ;;  %v4865_v51 = vadd.f32 %v4833_v59, %v4640_v58  ;;  %v4958_v16 = vld [vmem:[%s9803_s6 + $0x18] sm:$0xff]  ;;  %v4969_v59 = vld [vmem:[%s9803_s6 + $0x70] sm:$0xff] }
 0x59d   : > { %5123 = vmatpush.msra.mxu3 %v4968_v31  ;;  %5084 = vmatpush.msra.mxu1 %v4958_v16  ;;  %v4970_v26 = vld [vmem:[%s9803_s6 + $0x78] sm:$0xff] }
 0x59e   : > { %v4926_v30 = vsel %vm4868_vm3, %v4865_v51, 0.0 }
 0x59f   : > { %v4927_v63 = vadd.f32 %v4926_v30, %v9563_v28 }
 0x5a1   : > { %v4798_v13 = vpop.permute.xlu2 %4797 }
 0x5a2   : > { %v3902_v2 = vpop.permute.xlu1 %3901  ;;  %v4834_v27 = vmul.f32 %v5901_v39, %v4798_v13  ;;  %v4986_v39 = vld [vmem:[%s9803_s6 + $0xf8] sm:$0xff]  ;;  %v4985_v13 = vld [vmem:[%s9803_s6 + $0xf0] sm:$0xff] }
 0x5a3   : > { %v3935_v46 = vmul.f32 %v5774_v4, %v3902_v2  ;;  %v5902_v2 = vld [vmem:[%s10072_s3 + $0x7f8] sm:$0xff]  ;;  %v4967_v4 = vld [vmem:[%s9803_s6 + $0x60] sm:$0xff]  ;;  %s6259_s3 = scalar_lea.hbm %s9806_s9, 2 }
 0x5a4   : > { %v4866_v49 = vadd.f32 %v4834_v27, %v4641_v18  ;;  %v4835_v53 = vmul.f32 %v5902_v2, %v4802_v24  ;;  %5103 = vmatpush.msra.mxu2 %v4967_v4  ;;  %p6261_p1 = scmp.lt.s32.totalorder %s6259_s3, %s6255_s29 }
 0x5a5   : > { %v3967_v0 = vadd.f32 %v3935_v46, %v3742_v21  ;;  %v4962_v46 = vld [vmem:[%s9803_s6 + $0x38] sm:$0xff] }
 0x5a6   : > { %v4928_v35 = vsel %vm4868_vm3, %v4866_v49, 0.0  ;;  %5104 = vmatpush.msra.mxu2 %v4959_v56  ;;  %p6262_p2 = por %p6261_p1, %p6260_p0 }
 0x5a7   : > { %v4929_v17 = vadd.f32 %v4928_v35, %v4927_v63 }
 0x5a8   : > { %p6263_p3 = pnand %p6262_p2, %p6258_p13 }
 0x5ab   : > { %v4127_v42 = vpop.permute.xlu1 %4126 }
 0x5ac   : > { %v4160_v7 = vmul.f32 %v5806_v44, %v4127_v42  ;;  %v4978_v44 = vld [vmem:[%s9803_s6 + $0xb8] sm:$0xff] }
 0x5ae   : > { %v4192_v48 = vadd.f32 %v4160_v7, %v3967_v0 }
 0x5b4   : > { %v4352_v20 = vpop.permute.xlu1 %4351 }
 0x5b5   : > { %v4385_v15 = vmul.f32 %v5838_v5, %v4352_v20  ;;  %v4960_v20 = vld [vmem:[%s9803_s6 + $0x28] sm:$0xff] }
 0x5b6   : > { %5124 = vmatpush.msra.mxu3 %v4960_v20 }
 0x5b7   : > { %v4417_v1 = vadd.f32 %v4385_v15, %v4192_v48 }
 0x5bd   : > { %v4577_v32 = vpop.permute.xlu1 %4576 }
 0x5be   : > { %v4610_v42 = vmul.f32 %v5870_v41, %v4577_v32 }
 0x5c0   : > { %v4642_v60 = vadd.f32 %v4610_v42, %v4417_v1 }
 0x5c2   : > { %v4867_v11 = vadd.f32 %v4835_v53, %v4642_v60 }
 0x5c4   : > { %v4930_v57 = vsel %vm4868_vm3, %v4867_v11, 0.0 }
 0x5c5   : > { %v4931_v28 = vadd.f32 %v4930_v57, %v4929_v17  ;;  %v4947_v10 = vpop.permute.xlu1 %4946 }
 0x5c7   : > { %v4932_v54 = vrot.slane %v4931_v28, 4 }
 0x5c9   : > { %v4933_v43 = vadd.f32 %v4932_v54, %v4931_v28 }
 0x5cb   : > { %v4934_v45 = vrot.slane %v4933_v43, 2 }
 0x5cd   : > { %v4935_v38 = vadd.f32 %v4934_v45, %v4933_v43 }
 0x5cf   : > { %v4936_v29 = vrot.slane %v4935_v38, 1 }
 0x5d1   : > { %v4937_v19 = vadd.f32 %v4936_v29, %v4935_v38 }
 0x5d3   : > { %v4939_v22 = vadd.f32 %v4938_v62, %v4937_v19 }
 0x5d5   : > { %5210 = vrot.lane.b32.xlu0 %v4939_v22, %s6345_s30  ;;  %v4940_v36 = vmul.f32 0.5, %v4939_v22  ;;  %5208 = vst.msk [vmem:[%s372_s11] sm:$0x1] %vm5207_vm4, %v4939_v22 }
 0x5d7   : > { %v4941_v25 = vmul.f32 1.442695, %v4940_v36 }
 0x5d9   : > { %6218 = vpow2.f32 %v4941_v25 }
 0x5df   : > { %v6219_v3 = vpop.eup %6218 }
 0x5e0   : > { %v4949_v34 = vmul.f32 %v6219_v3, %v4947_v10 }
 0x5e2   : > { %4951 = vrot.lane.b32.xlu2 %v4949_v34, %s6345_s30 }
 0x63c   : > { %v4952_v8 = vpop.permute.xlu2 %4951 }
 0x63d   : > { %v4954_v37 = vadd.f32 %v4952_v8, %v4939_v22 }
 0x63f   : > { %5903 = vmatmul.msk.f32.vlgmr.msrb.gmra.mxu1 %vm5005_vm5, %v4954_v37  ;;  %5904 = vmatmul.msk.f32.vlgmr.msrb.gmra.mxu2 %vm5005_vm5, %v4954_v37 }
 0x640   : > { %5905 = vmatmul.msk.f32.vlgmr.msrb.gmra.mxu3 %vm5005_vm5, %v4954_v37  ;;  %5161 = vmatpush.msrb.mxu2 %v4986_v39 }
 0x641   : > { %5141 = vmatpush.msrb.mxu1 %v4985_v13 }
 0x642   : > { %5162 = vmatpush.msrb.mxu2 %v4978_v44 }
 0x643   : > { %5142 = vmatpush.msrb.mxu1 %v4977_v23 }
 0x644   : > { %5163 = vmatpush.msrb.mxu2 %v4970_v26 }
 0x645   : > { %5143 = vmatpush.msrb.mxu1 %v4969_v59 }
 0x646   : > { %5164 = vmatpush.msrb.mxu2 %v4962_v46 }
 0x647   : > { %v5211_v5 = vpop.permute.xlu0 %5210  ;;  %5906 = vmatmul.msk.f32.vlgmr.msra.gmra.mxu1 %vm5005_vm5, %v4954_v37  ;;  %5907 = vmatmul.msk.f32.vlgmr.msra.gmra.mxu2 %vm5005_vm5, %v4954_v37 }
 0x648   : > { %5213 = vst.msk [vmem:[%s378_s12] sm:$0x1] %vm5207_vm4, %v5211_v5  ;;  %5908 = vmatmul.msk.f32.vlgmr.msra.gmra.mxu3 %vm5005_vm5, %v4954_v37  ;;  %5144 = vmatpush.msrb.mxu1 %v4961_v40 }
 0x64f   : > { %5909 = vmatmul.msk.f32.vlgmr.msrb.gmra.mxu1 %vm5005_vm5, %v4954_v37  ;;  %5910 = vmatmul.msk.f32.vlgmr.msrb.gmra.mxu2 %vm5005_vm5, %v4954_v37 }
 0x650   : > { %6266 = shalt.err (!%p6263_p3)
}
 0x651   : > { %5917 = dma.vmem_to_hbm [thread:$0]  (%p6439_p5), %s5237_s1, 16, %s5239_s25, %s5219_s26  }
 0x652   : > { %s5247_s0 = scalar_lea.hbm %s9807_s10, %s6422_s17  ;;  %s5249_s2 = sshll.u32 %s378_s12, 4  ;;  %s5250_s2 = int_to_ptr.vmem [resolvable:$true] %s5249_s2 }
 0x653   : > { %s5251_s30 = sshll.u32 %s5247_s0, 4  ;;  %s5223_s4 = scalar_lea.sflag [#allocation6], %s9661_s28  ;;  %s5252_s30 = int_to_ptr.hbm [resolvable:$true] %s5251_s30 }
 0x654   : > { %s6281_s27 = sshra.s32 %s5252_s30, 4  ;;  %s6287_s1 = scalar_lea.hbm %s9807_s10, 2  ;;  %s6282_s27 = int_to_ptr.hbm [resolvable:$true] %s6281_s27 }
 0x655   : > { %s6283_s3 = scalar_lea.hbm %s6282_s27, 1  ;;  %p6288_p9 = scmp.lt.s32.totalorder %s6282_s27, %s9807_s10 }
 0x656   : > { %p6284_p4 = scmp.ne.s32.totalorder %s6282_s27, %s6283_s3  ;;  %p6289_p10 = scmp.lt.s32.totalorder %s6287_s1, %s6283_s3 }
 0x658   : > { %p6285_p7 = pnand %p6284_p4, %p6439_p5  ;;  %p6290_p11 = por %p6289_p10, %p6288_p9 }
 0x65a   : > { %p6286_p8 = pneg %p6285_p7 }
 0x65c   : > { %p6291_p12 = pnand %p6290_p11, %p6286_p8 }
 0x65e   : > { %6294 = shalt.err (!%p6291_p12)
}
 0x65f   : > { %5918 = dma.vmem_to_hbm [thread:$0]  (%p6439_p5), %s5250_s2, 16, %s5252_s30, %s5223_s4   ;;  %v4987_v7 = vld [vmem:[%s9804_s7] sm:$0xff]  ;;  %vm5194_vm6 = vcmask 1042434   ;;  %vm5192_vm7 = vcmask 1040384   ;;  %vm5196_vm8 = vcmask 1041408   ;;  %vm5198_vm9 = vcmask 1044484  }
 0x660   : > { %v4990_v51 = vperm.slane %v4987_v7, 1  ;;  %v4991_v0 = vperm.slane %v4987_v7, 2  ;;  %v4992_v15 = vperm.slane %v4987_v7, 3  ;;  %v4993_v41 = vperm.slane %v4987_v7, 4  ;;  %s5373_s23 = sshll.u32 %s6558_s21, 3 }
 0x661   : > { %v4994_v48 = vperm.slane %v4987_v7, 5  ;;  %v4995_v1 = vperm.slane %v4987_v7, 6  ;;  %v4989_v60 = vperm.slane %v4987_v7, 0  ;;  %v4996_v11 = vperm.slane %v4987_v7, 7  ;;  %s390_s20 = scalar_lea.vmem %s9805_s8, %s5373_s23 }
 0x662   : > { %vm5200_vm10 = vcmask 1046534   ;;  %vm5202_vm11 = vcmask 1045508  }
 0x6bc   : > { %v5026_v58 = vpop.f32.mrf.mxu1 }
 0x6bd   : > { %v5027_v9 = vadd.f32 %v5026_v58, %v4989_v60 }
 0x6c2   : > { %v5046_v21 = vpop.f32.mrf.mxu2 }
 0x6c3   : > { %v5066_v27 = vpop.f32.mrf.mxu3  ;;  %v5047_v49 = vadd.f32 %v5046_v21, %v4990_v51 }
 0x6c4   : > { %v5086_v18 = vpop.f32.mrf.mxu1  ;;  %v5067_v2 = vadd.f32 %v5066_v27, %v4991_v0 }
 0x6c5   : > { %v5087_v32 = vadd.f32 %v5086_v18, %v4992_v15  ;;  %6220 = vtanh.f32 %v5047_v49 }
 0x6c6   : > { %6222 = vtanh.f32 %v5067_v2 }
 0x6c7   : > { %6224 = vtanh.f32 %v5087_v32 }
 0x6ca   : > { %v5106_v24 = vpop.f32.mrf.mxu2 }
 0x6cb   : > { %v5126_v30 = vpop.f32.mrf.mxu3  ;;  %v5107_v42 = vadd.f32 %v5106_v24, %v4993_v41  ;;  %v6221_v47 = vpop.eup %6220 }
 0x6cc   : > { %v5146_v53 = vpop.f32.mrf.mxu1  ;;  %v5127_v35 = vadd.f32 %v5126_v30, %v4994_v48  ;;  %v6223_v57 = vpop.eup %6222  ;;  %v5185_v29 = vrot.slane %v6221_v47, 7 }
 0x6cd   : > { %v5147_v63 = vadd.f32 %v5146_v53, %v4995_v1  ;;  %6226 = vtanh.f32 %v5107_v42  ;;  %v6225_v28 = vpop.eup %6224  ;;  %v5186_v62 = vrot.slane %v6223_v57, 6 }
 0x6ce   : > { %6228 = vtanh.f32 %v5127_v35  ;;  %v5187_v45 = vrot.slane %v6225_v28, 5 }
 0x6cf   : > { %6230 = vtanh.f32 %v5147_v63 }
 0x6d0   : > { %v5195_v25 = vsel %vm5194_vm6, %v5186_v62, %v5187_v45 }
 0x6d2   : > { %v5166_v52 = vpop.f32.mrf.mxu2 }
 0x6d3   : > { %v5167_v17 = vadd.f32 %v5166_v52, %v4996_v11  ;;  %v6227_v54 = vpop.eup %6226 }
 0x6d4   : > { %v6229_v43 = vpop.eup %6228  ;;  %v5188_v19 = vrot.slane %v6227_v54, 4 }
 0x6d5   : > { %6232 = vtanh.f32 %v5167_v17  ;;  %v6231_v38 = vpop.eup %6230  ;;  %v5189_v22 = vrot.slane %v6229_v43, 3 }
 0x6d6   : > { %6234 = vtanh.f32 %v5027_v9  ;;  %v5190_v10 = vrot.slane %v6231_v38, 2 }
 0x6d7   : > { %v5199_v6 = vsel %vm5198_vm9, %v5188_v19, %v5189_v22 }
 0x6db   : > { %v6233_v36 = vpop.eup %6232 }
 0x6dc   : > { %v5191_v3 = vrot.slane %v6233_v36, 1  ;;  %v6235_v34 = vpop.eup %6234 }
 0x6dd   : > { %v5193_v61 = vsel %vm5192_vm7, %v6235_v34, %v5185_v29 }
 0x6de   : > { %v5201_v12 = vsel %vm5200_vm10, %v5190_v10, %v5191_v3  ;;  %v5197_v33 = vsel %vm5196_vm8, %v5193_v61, %v5195_v25 }
 0x6df   : > { %v5203_v50 = vsel %vm5202_vm11, %v5199_v6, %v5201_v12 }
 0x6e0   : > { %v5204_v14 = vsel %vm693_vm0, %v5197_v33, %v5203_v50 }
 0x6e1   : > { %5206 = vst [vmem:[%s390_s20] sm:$0xff] %v5204_v14 }
 0x6e2 PF: > { %p5928_p5 = scmp.ge.s32.totalorder %s6333_s16, 2  ;;  %s5270_s21 = sand.u32 1, %s6321_s13  }
 0x6e3   : > { %s5271_s0 = scalar_lea.sflag [#allocation4], %s5270_s21 }
 0x6e4   : > { %p5922_p13 = pnand %p5928_p5, %p6443_p6 }
 0x6e6   : > { %p5923_p0 = pneg %p5922_p13 }
 0x6e8   : > { %6312 = dma.done.wait (%p5923_p0), %s5271_s0, 16  }
 0x6e9   : > { %6314 = vsyncadd (%p5923_p0), %s5271_s0, 4294967280  ;;  %s5280_s2 = scalar_lea.sflag [#allocation6], %s5270_s21 }
 0x6ea   : > { %6316 = dma.done.wait (%p5923_p0), %s5280_s2, 16  }
 0x6eb   : > { %6318 = vsyncadd (%p5923_p0), %s5280_s2, 4294967280  ;;  %p24_p1 = scmp.ge.s32.totalorder %s6426_s19, 4   ;;  %s10206_s13 = smov %s6325_s14 }
 0x6ec   : > { %s10207_s14 = smov %s6329_s15  ;;  %s10208_s15 = smov %s6437_s22 }
 0x6ed   : > { %s10209_s16 = smov %s6426_s19  ;;  %26 = sbr.rel (!%p24_p1) target bundleno = 11 (0xb), region = 136 }
 0x6f2   :  { %5285 = vsyncpa [#allocation4], 1 }
 0x6f3   :  { %5287 = vsyncpa [#allocation4 + $0x1], 1 }
 0x6f4   :  { %5288 = vsyncpa [#allocation6], 1 }
 0x6f5   :  { %5290 = vsyncpa [#allocation6 + $0x1], 1 }

</bundles_post_ra>
